<compile_context>
chip_gen: v6e
topology: v6e:2x2x1
jax: 0.10.0
libtpu: 0.0.40
codegen_flags: <defaults>
</compile_context>

<pallas_src>
import functools
import math

import jax
import jax.numpy as jnp
from jax import lax
from jax.experimental import pallas as pl
from jax.experimental.pallas import tpu as pltpu


# ----------------------------- shared math helpers -----------------------------

def _layer_norm(x, gamma, beta, eps=1e-12):
    mu = jnp.mean(x, axis=-1, keepdims=True)
    xc = x - mu
    var = jnp.mean(xc * xc, axis=-1, keepdims=True)
    return xc * lax.rsqrt(var + eps) * gamma + beta


def _gelu_tanh(x):
    # TODO(synk): HuggingFace BertModel defaults to erf-based GELU; the tanh
    # approximation is kept here (matches the JAX reference below).
    c = math.sqrt(2.0 / math.pi)
    return 0.5 * x * (1.0 + jnp.tanh(c * (x + 0.044715 * x * x * x)))


def _softmax_ref(x):
    m = jnp.max(x, axis=-1, keepdims=True)
    e = jnp.exp(x - m)
    return e / jnp.sum(e, axis=-1, keepdims=True)


def _softmax_fast(x):
    # exp + approximate reciprocal both run on the EUP slot (co-issues with
    # VPU/MXU work) instead of a VALU divide sequence.
    m = jnp.max(x, axis=-1, keepdims=True)
    e = jnp.exp(x - m)
    return e * pl.reciprocal(jnp.sum(e, axis=-1, keepdims=True), approx=True)


# --------------------------------- the kernel ----------------------------------

def _bert_kernel(
    ids_ref,                                   # scalar prefetch: (B*S,) int32 in SMEM
    mask_ref,
    wte_ref, wpe_ref, wtt_ref, emb_g_ref, emb_b_ref,
    wq_ref, bq_ref, wk_ref, bk_ref, wv_ref, bv_ref, wo_ref, bo_ref,
    ln1_g_ref, ln1_b_ref,
    wi_ref, bi_ref, wf_ref, bf_ref, ln2_g_ref, ln2_b_ref,
    wp_ref, bp_ref, wc_ref, bc_ref,
    out_ref,
    x_ref,                                     # VMEM scratch: (B*S, H) f32 residual carry
    *, B, S, H, NH,
):
    l = pl.program_id(0)
    n_layers = pl.num_programs(0)
    Dh = H // NH
    BS = B * S
    scale = 1.0 / math.sqrt(Dh)
    bf16 = jnp.bfloat16

    # ---- step 0: embeddings via row gather (no one-hot matmul) ----
    @pl.when(l == 0)
    def _embed():
        def gather_row(t, carry):
            tok = ids_ref[t]
            x_ref[pl.ds(t, 1), :] = wte_ref[pl.ds(tok, 1), :]
            return carry
        lax.fori_loop(0, BS, gather_row, 0, unroll=True)
        emb = (x_ref[...].reshape(B, S, H)
               + wpe_ref[...][None, :, :]           # (S, H) block: only first S rows DMA'd
               + wtt_ref[0:1, :][None, :, :])       # token_type_ids == 0
        x_ref[...] = _layer_norm(emb.reshape(BS, H), emb_g_ref[...], emb_b_ref[...])

    # additive attention mask: 0 = keep, -1e9 = padding (applied in f32, post-matmul)
    add_mask = (mask_ref[...] - 1.0) * 1e9                        # (B, S)

    # ---- encoder layer `l` (per-layer weights streamed this grid step) ----
    x = x_ref[...]                                                # (BS, H) f32
    xb = x.astype(bf16)

    attn = jnp.zeros((BS, H), jnp.float32)
    for h in range(NH):
        # per-head weights indexed on a leading dim: no lane slicing of activations.
        qh = jnp.dot(xb, wq_ref[0, h], preferred_element_type=jnp.float32) + bq_ref[0, h]
        kh = jnp.dot(xb, wk_ref[0, h], preferred_element_type=jnp.float32) + bk_ref[0, h]
        vh = jnp.dot(xb, wv_ref[0, h], preferred_element_type=jnp.float32) + bv_ref[0, h]
        q3 = qh.reshape(B, S, Dh)
        k3 = kh.reshape(B, S, Dh)
        v3 = vh.reshape(B, S, Dh)
        s = jnp.einsum('bqd,bkd->bqk', q3.astype(bf16), k3.astype(bf16),
                       preferred_element_type=jnp.float32) * scale
        p = _softmax_fast(s + add_mask[:, None, :])               # (B, S, S) f32
        ctx = jnp.einsum('bqk,bkd->bqd', p.astype(bf16), v3.astype(bf16),
                         preferred_element_type=jnp.float32)      # (B, S, Dh)
        # accumulate this head's share of the output projection: no lane concat.
        attn = attn + jnp.dot(ctx.reshape(BS, Dh).astype(bf16), wo_ref[0, h],
                              preferred_element_type=jnp.float32)
    attn = attn + bo_ref[0]
    x = _layer_norm(x + attn, ln1_g_ref[0], ln1_b_ref[0])

    # ---- feed-forward ----
    h1 = _gelu_tanh(jnp.dot(x.astype(bf16), wi_ref[0],
                            preferred_element_type=jnp.float32) + bi_ref[0])
    h2 = jnp.dot(h1.astype(bf16), wf_ref[0],
                 preferred_element_type=jnp.float32) + bf_ref[0]
    x = _layer_norm(x + h2, ln2_g_ref[0], ln2_b_ref[0])
    x_ref[...] = x

    # ---- last step: pooler (CLS token) + classifier; dropout = identity ----
    @pl.when(l == n_layers - 1)
    def _head():
        cls = x.reshape(B, S, H)[:, 0, :]                          # (B, H)
        pooled = jnp.tanh(jnp.dot(cls.astype(bf16), wp_ref[...],
                                  preferred_element_type=jnp.float32) + bp_ref[...])
        logits = jnp.dot(pooled.astype(bf16), wc_ref[...],
                         preferred_element_type=jnp.float32) + bc_ref[...]
        out_ref[...] = logits.astype(out_ref.dtype)


# --------------------------------- wrapper --------------------------------------

def bert_classifier_forward(input_ids, attention_mask, params, *, num_heads):
    (wte, wpe, wtt, emb_g, emb_b,
     wq, bq, wk, bk, wv, bv, wo, bo, ln1_g, ln1_b,
     wi, bi, wf, bf, ln2_g, ln2_b,
     wp, bp, wc, bc) = params
    B, S = input_ids.shape
    V, H = wte.shape
    L = wq.shape[0]
    O = wc.shape[1]
    NH = num_heads
    Dh = H // NH
    bf16 = jnp.bfloat16

    # Per-head weight layout (done once, outside the kernel); GEMM weights in bf16.
    wq_h = wq.reshape(L, H, NH, Dh).transpose(0, 2, 1, 3).astype(bf16)   # (L, NH, H, Dh)
    wk_h = wk.reshape(L, H, NH, Dh).transpose(0, 2, 1, 3).astype(bf16)
    wv_h = wv.reshape(L, H, NH, Dh).transpose(0, 2, 1, 3).astype(bf16)
    wo_h = wo.reshape(L, NH, Dh, H).astype(bf16)                         # pure reshape
    bq_h = bq.reshape(L, 1, NH, Dh).transpose(0, 2, 1, 3)                # (L, NH, 1, Dh) f32
    bk_h = bk.reshape(L, 1, NH, Dh).transpose(0, 2, 1, 3)
    bv_h = bv.reshape(L, 1, NH, Dh).transpose(0, 2, 1, 3)
    wi_b, wf_b = wi.astype(bf16), wf.astype(bf16)
    wp_b, wc_b = wp.astype(bf16), wc.astype(bf16)

    ids_flat = input_ids.reshape(-1).astype(jnp.int32)
    mask = attention_mask.astype(jnp.float32)

    def const(arr):          # resident block, same tile every grid step
        nd = arr.ndim
        return pl.BlockSpec(arr.shape, lambda l, ids: (0,) * nd)

    def per_layer(arr):      # (L, ...) stacked weight, streamed one layer per step
        nd = arr.ndim
        return pl.BlockSpec((1,) + arr.shape[1:], lambda l, ids: (l,) + (0,) * (nd - 1))

    grid_spec = pltpu.PrefetchScalarGridSpec(
        num_scalar_prefetch=1,
        grid=(L,),
        in_specs=[
            const(mask),
            const(wte),
            pl.BlockSpec((S, H), lambda l, ids: (0, 0)),    # only first S position rows
            const(wtt), const(emb_g), const(emb_b),
            per_layer(wq_h), per_layer(bq_h),
            per_layer(wk_h), per_layer(bk_h),
            per_layer(wv_h), per_layer(bv_h),
            per_layer(wo_h), per_layer(bo),
            per_layer(ln1_g), per_layer(ln1_b),
            per_layer(wi_b), per_layer(bi),
            per_layer(wf_b), per_layer(bf),
            per_layer(ln2_g), per_layer(ln2_b),
            const(wp_b), const(bp), const(wc_b), const(bc),
        ],
        out_specs=pl.BlockSpec((B, O), lambda l, ids: (0, 0)),
        scratch_shapes=[pltpu.VMEM((B * S, H), jnp.float32)],
    )

    kernel = functools.partial(_bert_kernel, B=B, S=S, H=H, NH=NH)
    return pl.pallas_call(
        kernel,
        out_shape=jax.ShapeDtypeStruct((B, O), jnp.float32),
        grid_spec=grid_spec,
        compiler_params=pltpu.CompilerParams(
            dimension_semantics=("arbitrary",),          # x is carried layer-to-layer
            vmem_limit_bytes=48 * 1024 * 1024),
    )(ids_flat, mask,
      wte, wpe, wtt, emb_g, emb_b,
      wq_h, bq_h, wk_h, bk_h, wv_h, bv_h, wo_h, bo,
      ln1_g, ln1_b, wi_b, bi, wf_b, bf, ln2_g, ln2_b,
      wp_b, bp, wc_b, bc)


# ----------------------------- parameter construction ---------------------------

def make_params(key, *, vocab_size, max_seq, hidden, intermediate, layers, num_labels):
    """Deterministic BERT-style init (f32 masters). GEMM weights are (in, out);
    per-layer tensors stacked along a leading L axis."""
    V, H, I, L = vocab_size, hidden, intermediate, layers
    keys = iter(jax.random.split(key, 32))

    def nrm(shape, std=0.02):
        return std * jax.random.normal(next(keys), shape, jnp.float32)

    wte = nrm((V, H)); wpe = nrm((max_seq, H)); wtt = nrm((2, H))
    emb_g = 1.0 + nrm((1, H), 0.1); emb_b = nrm((1, H), 0.1)

    wq = nrm((L, H, H)); bq = nrm((L, 1, H))
    wk = nrm((L, H, H)); bk = nrm((L, 1, H))
    wv = nrm((L, H, H)); bv = nrm((L, 1, H))
    wo = nrm((L, H, H)); bo = nrm((L, 1, H))
    ln1_g = 1.0 + nrm((L, 1, H), 0.1); ln1_b = nrm((L, 1, H), 0.1)
    wi = nrm((L, H, I)); bi = nrm((L, 1, I))
    wf = nrm((L, I, H)); bf = nrm((L, 1, H))
    ln2_g = 1.0 + nrm((L, 1, H), 0.1); ln2_b = nrm((L, 1, H), 0.1)

    wp = nrm((H, H)); bp = nrm((1, H))
    wc = nrm((H, num_labels)); bc = nrm((1, num_labels))

    return (wte, wpe, wtt, emb_g, emb_b,
            wq, bq, wk, bk, wv, bv, wo, bo, ln1_g, ln1_b,
            wi, bi, wf, bf, ln2_g, ln2_b,
            wp, bp, wc, bc)


# ----------------------------- pure-JAX reference --------------------------------

def reference_forward(input_ids, attention_mask, params, *, num_heads):
    (wte, wpe, wtt, emb_g, emb_b,
     wq, bq, wk, bk, wv, bv, wo, bo, ln1_g, ln1_b,
     wi, bi, wf, bf, ln2_g, ln2_b,
     wp, bp, wc, bc) = params
    B, S = input_ids.shape
    V, H = wte.shape
    L = wq.shape[0]
    NH = num_heads
    Dh = H // NH

    x = wte[input_ids] + wpe[None, :S, :] + wtt[0][None, None, :]     # (B, S, H)
    x = _layer_norm(x, emb_g, emb_b)
    add_mask = (attention_mask.astype(jnp.float32) - 1.0) * 1e9       # (B, S)

    for l in range(L):
        q = x @ wq[l] + bq[l]
        k = x @ wk[l] + bk[l]
        v = x @ wv[l] + bv[l]
        heads = []
        for h in range(NH):
            sl = slice(h * Dh, (h + 1) * Dh)
            s = jnp.einsum('bqd,bkd->bqk', q[..., sl], k[..., sl]) / math.sqrt(Dh)
            s = s + add_mask[:, None, :]
            p = _softmax_ref(s)
            heads.append(jnp.einsum('bqk,bkd->bqd', p, v[..., sl]))
        ctx = jnp.concatenate(heads, axis=-1)
        x = _layer_norm(x + ctx @ wo[l] + bo[l], ln1_g[l], ln1_b[l])
        hmid = _gelu_tanh(x @ wi[l] + bi[l])
        x = _layer_norm(x + hmid @ wf[l] + bf[l], ln2_g[l], ln2_b[l])

    pooled = jnp.tanh(x[:, 0, :] @ wp + bp)
    return pooled @ wc + bc


# ------------------------------------ main ---------------------------------------

if __name__ == "__main__":
    # Small BERT-like config consistent with the module's forward pass.
    B, S = 2, 8
    VOCAB, MAX_SEQ, HIDDEN, INTER = 128, 16, 128, 512   # MAX_SEQ > S exercises the slice
    LAYERS, HEADS, NUM_LABELS = 2, 2, 4

    key = jax.random.PRNGKey(0)
    k_ids, k_params = jax.random.split(key)

    input_ids = jax.random.randint(k_ids, (B, S), 0, VOCAB, dtype=jnp.int32)
    # attention mask: batch element 1 has 2 padding tokens at the end
    attention_mask = jnp.ones((B, S), jnp.float32).at[1, S - 2:].set(0.0)

    params = make_params(k_params, vocab_size=VOCAB, max_seq=MAX_SEQ, hidden=HIDDEN,
                         intermediate=INTER, layers=LAYERS, num_labels=NUM_LABELS)

    logits = bert_classifier_forward(input_ids, attention_mask, params,
                                     num_heads=HEADS)
    logits = jax.block_until_ready(logits)

    ref = reference_forward(input_ids, attention_mask, params, num_heads=HEADS)
    assert logits.shape == (B, NUM_LABELS)
    max_err = float(jnp.max(jnp.abs(logits - ref)))
    # bf16 MXU operands + approx reciprocal vs the all-f32 reference.
    assert jnp.allclose(logits, ref, atol=3e-2, rtol=3e-2), \
        f"mismatch vs reference (max abs err {max_err})"

    print("KERNEL_OK")
</pallas_src>

<mosaic_0001>
module attributes {stable_mosaic.version = 11 : i64} {
  func.func @_bert_kernel(%arg0: i32, %arg1: memref<16xi32, #tpu.memory_space<smem>>, %arg2: memref<2x8xf32, #tpu.memory_space<vmem>>, %arg3: memref<128x128xf32, #tpu.memory_space<vmem>>, %arg4: memref<8x128xf32, #tpu.memory_space<vmem>>, %arg5: memref<2x128xf32, #tpu.memory_space<vmem>>, %arg6: memref<1x128xf32, #tpu.memory_space<vmem>>, %arg7: memref<1x128xf32, #tpu.memory_space<vmem>>, %arg8: memref<1x2x128x64xbf16, #tpu.memory_space<vmem>>, %arg9: memref<1x2x1x64xf32, #tpu.memory_space<vmem>>, %arg10: memref<1x2x128x64xbf16, #tpu.memory_space<vmem>>, %arg11: memref<1x2x1x64xf32, #tpu.memory_space<vmem>>, %arg12: memref<1x2x128x64xbf16, #tpu.memory_space<vmem>>, %arg13: memref<1x2x1x64xf32, #tpu.memory_space<vmem>>, %arg14: memref<1x2x64x128xbf16, #tpu.memory_space<vmem>>, %arg15: memref<1x1x128xf32, #tpu.memory_space<vmem>>, %arg16: memref<1x1x128xf32, #tpu.memory_space<vmem>>, %arg17: memref<1x1x128xf32, #tpu.memory_space<vmem>>, %arg18: memref<1x128x512xbf16, #tpu.memory_space<vmem>>, %arg19: memref<1x1x512xf32, #tpu.memory_space<vmem>>, %arg20: memref<1x512x128xbf16, #tpu.memory_space<vmem>>, %arg21: memref<1x1x128xf32, #tpu.memory_space<vmem>>, %arg22: memref<1x1x128xf32, #tpu.memory_space<vmem>>, %arg23: memref<1x1x128xf32, #tpu.memory_space<vmem>>, %arg24: memref<128x128xbf16, #tpu.memory_space<vmem>>, %arg25: memref<1x128xf32, #tpu.memory_space<vmem>>, %arg26: memref<128x4xbf16, #tpu.memory_space<vmem>>, %arg27: memref<1x4xf32, #tpu.memory_space<vmem>>, %arg28: memref<2x4xf32, #tpu.memory_space<vmem>>, %arg29: memref<16x128xf32, #tpu.memory_space<vmem>>) attributes {dimension_semantics = [#tpu.dimension_semantics<arbitrary>], iteration_bounds = array<i64: 2>, scalar_prefetch = 1 : i64, scratch_operands = 1 : i64, tpu.core_type = #tpu.core_type<tc>, window_params = [{pipeline_mode = #tpu.pipeline_mode<synchronous>, transform_indices = @transform_0, window_bounds = array<i64: 2, 8>}, {pipeline_mode = #tpu.pipeline_mode<synchronous>, transform_indices = @transform_1, window_bounds = array<i64: 128, 128>}, {transform_indices = @transform_2, window_bounds = array<i64: 8, 128>}, {pipeline_mode = #tpu.pipeline_mode<synchronous>, transform_indices = @transform_3, window_bounds = array<i64: 2, 128>}, {pipeline_mode = #tpu.pipeline_mode<synchronous>, transform_indices = @transform_4, window_bounds = array<i64: 1, 128>}, {pipeline_mode = #tpu.pipeline_mode<synchronous>, transform_indices = @transform_5, window_bounds = array<i64: 1, 128>}, {transform_indices = @transform_6, window_bounds = array<i64: 1, 2, 128, 64>}, {transform_indices = @transform_7, window_bounds = array<i64: 1, 2, 1, 64>}, {transform_indices = @transform_8, window_bounds = array<i64: 1, 2, 128, 64>}, {transform_indices = @transform_9, window_bounds = array<i64: 1, 2, 1, 64>}, {transform_indices = @transform_10, window_bounds = array<i64: 1, 2, 128, 64>}, {transform_indices = @transform_11, window_bounds = array<i64: 1, 2, 1, 64>}, {transform_indices = @transform_12, window_bounds = array<i64: 1, 2, 64, 128>}, {transform_indices = @transform_13, window_bounds = array<i64: 1, 1, 128>}, {transform_indices = @transform_14, window_bounds = array<i64: 1, 1, 128>}, {transform_indices = @transform_15, window_bounds = array<i64: 1, 1, 128>}, {transform_indices = @transform_16, window_bounds = array<i64: 1, 128, 512>}, {transform_indices = @transform_17, window_bounds = array<i64: 1, 1, 512>}, {transform_indices = @transform_18, window_bounds = array<i64: 1, 512, 128>}, {transform_indices = @transform_19, window_bounds = array<i64: 1, 1, 128>}, {transform_indices = @transform_20, window_bounds = array<i64: 1, 1, 128>}, {transform_indices = @transform_21, window_bounds = array<i64: 1, 1, 128>}, {pipeline_mode = #tpu.pipeline_mode<synchronous>, transform_indices = @transform_22, window_bounds = array<i64: 128, 128>}, {pipeline_mode = #tpu.pipeline_mode<synchronous>, transform_indices = @transform_23, window_bounds = array<i64: 1, 128>}, {pipeline_mode = #tpu.pipeline_mode<synchronous>, transform_indices = @transform_24, window_bounds = array<i64: 128, 4>}, {pipeline_mode = #tpu.pipeline_mode<synchronous>, transform_indices = @transform_25, window_bounds = array<i64: 1, 4>}, {pipeline_mode = #tpu.pipeline_mode<synchronous>, transform_indices = @transform_26, window_bounds = array<i64: 2, 4>}]} {
    %c0_i32 = arith.constant 0 : i32
    %0 = arith.cmpi eq, %arg0, %c0_i32 : i32
    %1 = arith.extui %0 : i1 to i32
    %c0_i32_0 = arith.constant 0 : i32
    %2 = arith.cmpi ne, %1, %c0_i32_0 : i32
    scf.if %2 {
      %c0_i32_125 = arith.constant 0 : i32
      %200 = arith.index_cast %c0_i32_125 : i32 to index
      %201 = memref.load %arg1[%200] : memref<16xi32, #tpu.memory_space<smem>>
      %202 = arith.index_cast %201 : i32 to index
      %c0_126 = arith.constant 0 : index
      %203 = vector.load %arg3[%202, %c0_126] : memref<128x128xf32, #tpu.memory_space<vmem>>, vector<1x128xf32>
      %204 = arith.index_cast %c0_i32_125 : i32 to index
      %c0_127 = arith.constant 0 : index
      %205 = vector.load %arg29[%204, %c0_127] : memref<16x128xf32, #tpu.memory_space<vmem>>, vector<1x128xf32>
      tpu.vector_store %arg29[%204, %c0_127], %203 {strides = array<i32>} : memref<16x128xf32, #tpu.memory_space<vmem>>, vector<1x128xf32>,
      %c1_i32_128 = arith.constant 1 : i32
      %206 = arith.index_cast %c1_i32_128 : i32 to index
      %207 = memref.load %arg1[%206] : memref<16xi32, #tpu.memory_space<smem>>
      %208 = arith.index_cast %207 : i32 to index
      %c0_129 = arith.constant 0 : index
      %209 = vector.load %arg3[%208, %c0_129] : memref<128x128xf32, #tpu.memory_space<vmem>>, vector<1x128xf32>
      %210 = arith.index_cast %c1_i32_128 : i32 to index
      %c0_130 = arith.constant 0 : index
      %211 = vector.load %arg29[%210, %c0_130] : memref<16x128xf32, #tpu.memory_space<vmem>>, vector<1x128xf32>
      tpu.vector_store %arg29[%210, %c0_130], %209 {strides = array<i32>} : memref<16x128xf32, #tpu.memory_space<vmem>>, vector<1x128xf32>,
      %c2_i32 = arith.constant 2 : i32
      %212 = arith.index_cast %c2_i32 : i32 to index
      %213 = memref.load %arg1[%212] : memref<16xi32, #tpu.memory_space<smem>>
      %214 = arith.index_cast %213 : i32 to index
      %c0_131 = arith.constant 0 : index
      %215 = vector.load %arg3[%214, %c0_131] : memref<128x128xf32, #tpu.memory_space<vmem>>, vector<1x128xf32>
      %216 = arith.index_cast %c2_i32 : i32 to index
      %c0_132 = arith.constant 0 : index
      %217 = vector.load %arg29[%216, %c0_132] : memref<16x128xf32, #tpu.memory_space<vmem>>, vector<1x128xf32>
      tpu.vector_store %arg29[%216, %c0_132], %215 {strides = array<i32>} : memref<16x128xf32, #tpu.memory_space<vmem>>, vector<1x128xf32>,
      %c3_i32 = arith.constant 3 : i32
      %218 = arith.index_cast %c3_i32 : i32 to index
      %219 = memref.load %arg1[%218] : memref<16xi32, #tpu.memory_space<smem>>
      %220 = arith.index_cast %219 : i32 to index
      %c0_133 = arith.constant 0 : index
      %221 = vector.load %arg3[%220, %c0_133] : memref<128x128xf32, #tpu.memory_space<vmem>>, vector<1x128xf32>
      %222 = arith.index_cast %c3_i32 : i32 to index
      %c0_134 = arith.constant 0 : index
      %223 = vector.load %arg29[%222, %c0_134] : memref<16x128xf32, #tpu.memory_space<vmem>>, vector<1x128xf32>
      tpu.vector_store %arg29[%222, %c0_134], %221 {strides = array<i32>} : memref<16x128xf32, #tpu.memory_space<vmem>>, vector<1x128xf32>,
      %c4_i32 = arith.constant 4 : i32
      %224 = arith.index_cast %c4_i32 : i32 to index
      %225 = memref.load %arg1[%224] : memref<16xi32, #tpu.memory_space<smem>>
      %226 = arith.index_cast %225 : i32 to index
      %c0_135 = arith.constant 0 : index
      %227 = vector.load %arg3[%226, %c0_135] : memref<128x128xf32, #tpu.memory_space<vmem>>, vector<1x128xf32>
      %228 = arith.index_cast %c4_i32 : i32 to index
      %c0_136 = arith.constant 0 : index
      %229 = vector.load %arg29[%228, %c0_136] : memref<16x128xf32, #tpu.memory_space<vmem>>, vector<1x128xf32>
      tpu.vector_store %arg29[%228, %c0_136], %227 {strides = array<i32>} : memref<16x128xf32, #tpu.memory_space<vmem>>, vector<1x128xf32>,
      %c5_i32 = arith.constant 5 : i32
      %230 = arith.index_cast %c5_i32 : i32 to index
      %231 = memref.load %arg1[%230] : memref<16xi32, #tpu.memory_space<smem>>
      %232 = arith.index_cast %231 : i32 to index
      %c0_137 = arith.constant 0 : index
      %233 = vector.load %arg3[%232, %c0_137] : memref<128x128xf32, #tpu.memory_space<vmem>>, vector<1x128xf32>
      %234 = arith.index_cast %c5_i32 : i32 to index
      %c0_138 = arith.constant 0 : index
      %235 = vector.load %arg29[%234, %c0_138] : memref<16x128xf32, #tpu.memory_space<vmem>>, vector<1x128xf32>
      tpu.vector_store %arg29[%234, %c0_138], %233 {strides = array<i32>} : memref<16x128xf32, #tpu.memory_space<vmem>>, vector<1x128xf32>,
      %c6_i32 = arith.constant 6 : i32
      %236 = arith.index_cast %c6_i32 : i32 to index
      %237 = memref.load %arg1[%236] : memref<16xi32, #tpu.memory_space<smem>>
      %238 = arith.index_cast %237 : i32 to index
      %c0_139 = arith.constant 0 : index
      %239 = vector.load %arg3[%238, %c0_139] : memref<128x128xf32, #tpu.memory_space<vmem>>, vector<1x128xf32>
      %240 = arith.index_cast %c6_i32 : i32 to index
      %c0_140 = arith.constant 0 : index
      %241 = vector.load %arg29[%240, %c0_140] : memref<16x128xf32, #tpu.memory_space<vmem>>, vector<1x128xf32>
      tpu.vector_store %arg29[%240, %c0_140], %239 {strides = array<i32>} : memref<16x128xf32, #tpu.memory_space<vmem>>, vector<1x128xf32>,
      %c7_i32 = arith.constant 7 : i32
      %242 = arith.index_cast %c7_i32 : i32 to index
      %243 = memref.load %arg1[%242] : memref<16xi32, #tpu.memory_space<smem>>
      %244 = arith.index_cast %243 : i32 to index
      %c0_141 = arith.constant 0 : index
      %245 = vector.load %arg3[%244, %c0_141] : memref<128x128xf32, #tpu.memory_space<vmem>>, vector<1x128xf32>
      %246 = arith.index_cast %c7_i32 : i32 to index
      %c0_142 = arith.constant 0 : index
      %247 = vector.load %arg29[%246, %c0_142] : memref<16x128xf32, #tpu.memory_space<vmem>>, vector<1x128xf32>
      tpu.vector_store %arg29[%246, %c0_142], %245 {strides = array<i32>} : memref<16x128xf32, #tpu.memory_space<vmem>>, vector<1x128xf32>,
      %c8_i32 = arith.constant 8 : i32
      %248 = arith.index_cast %c8_i32 : i32 to index
      %249 = memref.load %arg1[%248] : memref<16xi32, #tpu.memory_space<smem>>
      %250 = arith.index_cast %249 : i32 to index
      %c0_143 = arith.constant 0 : index
      %251 = vector.load %arg3[%250, %c0_143] : memref<128x128xf32, #tpu.memory_space<vmem>>, vector<1x128xf32>
      %252 = arith.index_cast %c8_i32 : i32 to index
      %c0_144 = arith.constant 0 : index
      %253 = vector.load %arg29[%252, %c0_144] : memref<16x128xf32, #tpu.memory_space<vmem>>, vector<1x128xf32>
      tpu.vector_store %arg29[%252, %c0_144], %251 {strides = array<i32>} : memref<16x128xf32, #tpu.memory_space<vmem>>, vector<1x128xf32>,
      %c9_i32 = arith.constant 9 : i32
      %254 = arith.index_cast %c9_i32 : i32 to index
      %255 = memref.load %arg1[%254] : memref<16xi32, #tpu.memory_space<smem>>
      %256 = arith.index_cast %255 : i32 to index
      %c0_145 = arith.constant 0 : index
      %257 = vector.load %arg3[%256, %c0_145] : memref<128x128xf32, #tpu.memory_space<vmem>>, vector<1x128xf32>
      %258 = arith.index_cast %c9_i32 : i32 to index
      %c0_146 = arith.constant 0 : index
      %259 = vector.load %arg29[%258, %c0_146] : memref<16x128xf32, #tpu.memory_space<vmem>>, vector<1x128xf32>
      tpu.vector_store %arg29[%258, %c0_146], %257 {strides = array<i32>} : memref<16x128xf32, #tpu.memory_space<vmem>>, vector<1x128xf32>,
      %c10_i32 = arith.constant 10 : i32
      %260 = arith.index_cast %c10_i32 : i32 to index
      %261 = memref.load %arg1[%260] : memref<16xi32, #tpu.memory_space<smem>>
      %262 = arith.index_cast %261 : i32 to index
      %c0_147 = arith.constant 0 : index
      %263 = vector.load %arg3[%262, %c0_147] : memref<128x128xf32, #tpu.memory_space<vmem>>, vector<1x128xf32>
      %264 = arith.index_cast %c10_i32 : i32 to index
      %c0_148 = arith.constant 0 : index
      %265 = vector.load %arg29[%264, %c0_148] : memref<16x128xf32, #tpu.memory_space<vmem>>, vector<1x128xf32>
      tpu.vector_store %arg29[%264, %c0_148], %263 {strides = array<i32>} : memref<16x128xf32, #tpu.memory_space<vmem>>, vector<1x128xf32>,
      %c11_i32 = arith.constant 11 : i32
      %266 = arith.index_cast %c11_i32 : i32 to index
      %267 = memref.load %arg1[%266] : memref<16xi32, #tpu.memory_space<smem>>
      %268 = arith.index_cast %267 : i32 to index
      %c0_149 = arith.constant 0 : index
      %269 = vector.load %arg3[%268, %c0_149] : memref<128x128xf32, #tpu.memory_space<vmem>>, vector<1x128xf32>
      %270 = arith.index_cast %c11_i32 : i32 to index
      %c0_150 = arith.constant 0 : index
      %271 = vector.load %arg29[%270, %c0_150] : memref<16x128xf32, #tpu.memory_space<vmem>>, vector<1x128xf32>
      tpu.vector_store %arg29[%270, %c0_150], %269 {strides = array<i32>} : memref<16x128xf32, #tpu.memory_space<vmem>>, vector<1x128xf32>,
      %c12_i32 = arith.constant 12 : i32
      %272 = arith.index_cast %c12_i32 : i32 to index
      %273 = memref.load %arg1[%272] : memref<16xi32, #tpu.memory_space<smem>>
      %274 = arith.index_cast %273 : i32 to index
      %c0_151 = arith.constant 0 : index
      %275 = vector.load %arg3[%274, %c0_151] : memref<128x128xf32, #tpu.memory_space<vmem>>, vector<1x128xf32>
      %276 = arith.index_cast %c12_i32 : i32 to index
      %c0_152 = arith.constant 0 : index
      %277 = vector.load %arg29[%276, %c0_152] : memref<16x128xf32, #tpu.memory_space<vmem>>, vector<1x128xf32>
      tpu.vector_store %arg29[%276, %c0_152], %275 {strides = array<i32>} : memref<16x128xf32, #tpu.memory_space<vmem>>, vector<1x128xf32>,
      %c13_i32 = arith.constant 13 : i32
      %278 = arith.index_cast %c13_i32 : i32 to index
      %279 = memref.load %arg1[%278] : memref<16xi32, #tpu.memory_space<smem>>
      %280 = arith.index_cast %279 : i32 to index
      %c0_153 = arith.constant 0 : index
      %281 = vector.load %arg3[%280, %c0_153] : memref<128x128xf32, #tpu.memory_space<vmem>>, vector<1x128xf32>
      %282 = arith.index_cast %c13_i32 : i32 to index
      %c0_154 = arith.constant 0 : index
      %283 = vector.load %arg29[%282, %c0_154] : memref<16x128xf32, #tpu.memory_space<vmem>>, vector<1x128xf32>
      tpu.vector_store %arg29[%282, %c0_154], %281 {strides = array<i32>} : memref<16x128xf32, #tpu.memory_space<vmem>>, vector<1x128xf32>,
      %c14_i32 = arith.constant 14 : i32
      %284 = arith.index_cast %c14_i32 : i32 to index
      %285 = memref.load %arg1[%284] : memref<16xi32, #tpu.memory_space<smem>>
      %286 = arith.index_cast %285 : i32 to index
      %c0_155 = arith.constant 0 : index
      %287 = vector.load %arg3[%286, %c0_155] : memref<128x128xf32, #tpu.memory_space<vmem>>, vector<1x128xf32>
      %288 = arith.index_cast %c14_i32 : i32 to index
      %c0_156 = arith.constant 0 : index
      %289 = vector.load %arg29[%288, %c0_156] : memref<16x128xf32, #tpu.memory_space<vmem>>, vector<1x128xf32>
      tpu.vector_store %arg29[%288, %c0_156], %287 {strides = array<i32>} : memref<16x128xf32, #tpu.memory_space<vmem>>, vector<1x128xf32>,
      %c15_i32 = arith.constant 15 : i32
      %290 = arith.index_cast %c15_i32 : i32 to index
      %291 = memref.load %arg1[%290] : memref<16xi32, #tpu.memory_space<smem>>
      %292 = arith.index_cast %291 : i32 to index
      %c0_157 = arith.constant 0 : index
      %293 = vector.load %arg3[%292, %c0_157] : memref<128x128xf32, #tpu.memory_space<vmem>>, vector<1x128xf32>
      %294 = arith.index_cast %c15_i32 : i32 to index
      %c0_158 = arith.constant 0 : index
      %295 = vector.load %arg29[%294, %c0_158] : memref<16x128xf32, #tpu.memory_space<vmem>>, vector<1x128xf32>
      tpu.vector_store %arg29[%294, %c0_158], %293 {strides = array<i32>} : memref<16x128xf32, #tpu.memory_space<vmem>>, vector<1x128xf32>,
      %c16_i32 = arith.constant 16 : i32
      %c0_159 = arith.constant 0 : index
      %c0_160 = arith.constant 0 : index
      %296 = vector.load %arg29[%c0_159, %c0_160] : memref<16x128xf32, #tpu.memory_space<vmem>>, vector<16x128xf32>
      %297 = vector.shape_cast %296 : vector<16x128xf32> to vector<2x8x128xf32>
      %c0_161 = arith.constant 0 : index
      %c0_162 = arith.constant 0 : index
      %298 = vector.load %arg4[%c0_161, %c0_162] : memref<8x128xf32, #tpu.memory_space<vmem>>, vector<8x128xf32>
      %299 = vector.shape_cast %298 : vector<8x128xf32> to vector<1x8x128xf32>
      %300 = vector.broadcast %299 : vector<1x8x128xf32> to vector<2x8x128xf32>
      %301 = arith.addf %297, %300 : vector<2x8x128xf32>
      %c0_163 = arith.constant 0 : index
      %c0_164 = arith.constant 0 : index
      %302 = vector.load %arg5[%c0_163, %c0_164] : memref<2x128xf32, #tpu.memory_space<vmem>>, vector<1x128xf32>
      %303 = vector.shape_cast %302 : vector<1x128xf32> to vector<1x1x128xf32>
      %304 = vector.broadcast %303 : vector<1x1x128xf32> to vector<2x8x128xf32>
      %305 = arith.addf %301, %304 : vector<2x8x128xf32>
      %306 = vector.shape_cast %305 : vector<2x8x128xf32> to vector<16x128xf32>
      %c0_165 = arith.constant 0 : index
      %c0_166 = arith.constant 0 : index
      %307 = vector.load %arg6[%c0_165, %c0_166] : memref<1x128xf32, #tpu.memory_space<vmem>>, vector<1x128xf32>
      %c0_167 = arith.constant 0 : index
      %c0_168 = arith.constant 0 : index
      %308 = vector.load %arg7[%c0_167, %c0_168] : memref<1x128xf32, #tpu.memory_space<vmem>>, vector<1x128xf32>
      %cst_169 = arith.constant dense<0.000000e+00> : vector<16xf32>
      %309 = vector.multi_reduction <add>, %306, %cst_169 [1] : vector<16x128xf32> to vector<16xf32>
      %310 = vector.shape_cast %309 : vector<16xf32> to vector<16x1xf32>
      %cst_170 = arith.constant 1.280000e+02 : f32
      %311 = vector.broadcast %cst_170 : f32 to vector<16x1xf32>
      %312 = arith.divf %310, %311 : vector<16x1xf32>
      %313 = vector.broadcast %312 : vector<16x1xf32> to vector<16x128xf32>
      %314 = arith.subf %306, %313 : vector<16x128xf32>
      %315 = arith.mulf %314, %314 : vector<16x128xf32>
      %cst_171 = arith.constant dense<0.000000e+00> : vector<16xf32>
      %316 = vector.multi_reduction <add>, %315, %cst_171 [1] : vector<16x128xf32> to vector<16xf32>
      %317 = vector.shape_cast %316 : vector<16xf32> to vector<16x1xf32>
      %cst_172 = arith.constant 1.280000e+02 : f32
      %318 = vector.broadcast %cst_172 : f32 to vector<16x1xf32>
      %319 = arith.divf %317, %318 : vector<16x1xf32>
      %cst_173 = arith.constant 9.99999996E-13 : f32
      %320 = vector.broadcast %cst_173 : f32 to vector<16x1xf32>
      %321 = arith.addf %319, %320 : vector<16x1xf32>
      %322 = math.rsqrt %321 : vector<16x1xf32>
      %323 = vector.broadcast %322 : vector<16x1xf32> to vector<16x128xf32>
      %324 = arith.mulf %314, %323 : vector<16x128xf32>
      %325 = vector.broadcast %307 : vector<1x128xf32> to vector<16x128xf32>
      %326 = arith.mulf %324, %325 : vector<16x128xf32>
      %327 = vector.broadcast %308 : vector<1x128xf32> to vector<16x128xf32>
      %328 = arith.addf %326, %327 : vector<16x128xf32>
      %c0_174 = arith.constant 0 : index
      %c0_175 = arith.constant 0 : index
      %329 = vector.load %arg29[%c0_174, %c0_175] : memref<16x128xf32, #tpu.memory_space<vmem>>, vector<16x128xf32>
      tpu.vector_store %arg29[%c0_174, %c0_175], %328 {strides = array<i32>} : memref<16x128xf32, #tpu.memory_space<vmem>>, vector<16x128xf32>,
    } else {
    }
    %c0 = arith.constant 0 : index
    %c0_1 = arith.constant 0 : index
    %3 = vector.load %arg2[%c0, %c0_1] : memref<2x8xf32, #tpu.memory_space<vmem>>, vector<2x8xf32>
    %cst = arith.constant 1.000000e+00 : f32
    %4 = vector.broadcast %cst : f32 to vector<2x8xf32>
    %5 = arith.subf %3, %4 : vector<2x8xf32>
    %cst_2 = arith.constant 1.000000e+09 : f32
    %6 = vector.broadcast %cst_2 : f32 to vector<2x8xf32>
    %7 = arith.mulf %5, %6 : vector<2x8xf32>
    %c0_3 = arith.constant 0 : index
    %c0_4 = arith.constant 0 : index
    %8 = vector.load %arg29[%c0_3, %c0_4] : memref<16x128xf32, #tpu.memory_space<vmem>>, vector<16x128xf32>
    %9 = arith.truncf %8 : vector<16x128xf32> to vector<16x128xbf16>
    %cst_5 = arith.constant 0.000000e+00 : f32
    %10 = vector.broadcast %cst_5 : f32 to vector<16x128xf32>
    %c0_6 = arith.constant 0 : index
    %c0_7 = arith.constant 0 : index
    %c0_8 = arith.constant 0 : index
    %c0_9 = arith.constant 0 : index
    %11 = vector.load %arg8[%c0_6, %c0_7, %c0_8, %c0_9] : memref<1x2x128x64xbf16, #tpu.memory_space<vmem>>, vector<1x1x128x64xbf16>
    %12 = vector.shape_cast %11 : vector<1x1x128x64xbf16> to vector<128x64xbf16>
    %cst_10 = arith.constant dense<0.000000e+00> : vector<16x64xf32>
    %13 = tpu.matmul %9, %12, %cst_10 {dimension_numbers = #tpu.dot_dimension_numbers<[1], [0], [0], [1], [0, 0, 1, 1], [], []>} : vector<16x128xbf16>, vector<128x64xbf16>, vector<16x64xf32> -> vector<16x64xf32>
    %c0_11 = arith.constant 0 : index
    %c0_12 = arith.constant 0 : index
    %c0_13 = arith.constant 0 : index
    %c0_14 = arith.constant 0 : index
    %14 = vector.load %arg9[%c0_11, %c0_12, %c0_13, %c0_14] : memref<1x2x1x64xf32, #tpu.memory_space<vmem>>, vector<1x1x1x64xf32>
    %15 = vector.shape_cast %14 : vector<1x1x1x64xf32> to vector<1x64xf32>
    %16 = vector.broadcast %15 : vector<1x64xf32> to vector<16x64xf32>
    %17 = arith.addf %13, %16 : vector<16x64xf32>
    %c0_15 = arith.constant 0 : index
    %c0_16 = arith.constant 0 : index
    %c0_17 = arith.constant 0 : index
    %c0_18 = arith.constant 0 : index
    %18 = vector.load %arg10[%c0_15, %c0_16, %c0_17, %c0_18] : memref<1x2x128x64xbf16, #tpu.memory_space<vmem>>, vector<1x1x128x64xbf16>
    %19 = vector.shape_cast %18 : vector<1x1x128x64xbf16> to vector<128x64xbf16>
    %cst_19 = arith.constant dense<0.000000e+00> : vector<16x64xf32>
    %20 = tpu.matmul %9, %19, %cst_19 {dimension_numbers = #tpu.dot_dimension_numbers<[1], [0], [0], [1], [0, 0, 1, 1], [], []>} : vector<16x128xbf16>, vector<128x64xbf16>, vector<16x64xf32> -> vector<16x64xf32>
    %c0_20 = arith.constant 0 : index
    %c0_21 = arith.constant 0 : index
    %c0_22 = arith.constant 0 : index
    %c0_23 = arith.constant 0 : index
    %21 = vector.load %arg11[%c0_20, %c0_21, %c0_22, %c0_23] : memref<1x2x1x64xf32, #tpu.memory_space<vmem>>, vector<1x1x1x64xf32>
    %22 = vector.shape_cast %21 : vector<1x1x1x64xf32> to vector<1x64xf32>
    %23 = vector.broadcast %22 : vector<1x64xf32> to vector<16x64xf32>
    %24 = arith.addf %20, %23 : vector<16x64xf32>
    %c0_24 = arith.constant 0 : index
    %c0_25 = arith.constant 0 : index
    %c0_26 = arith.constant 0 : index
    %c0_27 = arith.constant 0 : index
    %25 = vector.load %arg12[%c0_24, %c0_25, %c0_26, %c0_27] : memref<1x2x128x64xbf16, #tpu.memory_space<vmem>>, vector<1x1x128x64xbf16>
    %26 = vector.shape_cast %25 : vector<1x1x128x64xbf16> to vector<128x64xbf16>
    %cst_28 = arith.constant dense<0.000000e+00> : vector<16x64xf32>
    %27 = tpu.matmul %9, %26, %cst_28 {dimension_numbers = #tpu.dot_dimension_numbers<[1], [0], [0], [1], [0, 0, 1, 1], [], []>} : vector<16x128xbf16>, vector<128x64xbf16>, vector<16x64xf32> -> vector<16x64xf32>
    %c0_29 = arith.constant 0 : index
    %c0_30 = arith.constant 0 : index
    %c0_31 = arith.constant 0 : index
    %c0_32 = arith.constant 0 : index
    %28 = vector.load %arg13[%c0_29, %c0_30, %c0_31, %c0_32] : memref<1x2x1x64xf32, #tpu.memory_space<vmem>>, vector<1x1x1x64xf32>
    %29 = vector.shape_cast %28 : vector<1x1x1x64xf32> to vector<1x64xf32>
    %30 = vector.broadcast %29 : vector<1x64xf32> to vector<16x64xf32>
    %31 = arith.addf %27, %30 : vector<16x64xf32>
    %32 = vector.shape_cast %17 : vector<16x64xf32> to vector<2x8x64xf32>
    %33 = vector.shape_cast %24 : vector<16x64xf32> to vector<2x8x64xf32>
    %34 = vector.shape_cast %31 : vector<16x64xf32> to vector<2x8x64xf32>
    %35 = arith.truncf %32 : vector<2x8x64xf32> to vector<2x8x64xbf16>
    %36 = arith.truncf %33 : vector<2x8x64xf32> to vector<2x8x64xbf16>
    "tpu.trace_start"() <{level = 10 : i32, message = "bqd,bkd->bqk"}> : () -> ()
    %cst_33 = arith.constant dense<0.000000e+00> : vector<2x8x8xf32>
    %37 = tpu.matmul %35, %36, %cst_33 {dimension_numbers = #tpu.dot_dimension_numbers<[2], [2], [1], [1], [0, 0, 0, 1, 1, 1], [0], [0]>} : vector<2x8x64xbf16>, vector<2x8x64xbf16>, vector<2x8x8xf32> -> vector<2x8x8xf32>
    "tpu.trace_stop"() : () -> ()
    %cst_34 = arith.constant 1.250000e-01 : f32
    %38 = vector.broadcast %cst_34 : f32 to vector<2x8x8xf32>
    %39 = arith.mulf %37, %38 : vector<2x8x8xf32>
    %40 = vector.shape_cast %7 : vector<2x8xf32> to vector<2x1x8xf32>
    %41 = vector.broadcast %40 : vector<2x1x8xf32> to vector<2x8x8xf32>
    %42 = arith.addf %39, %41 : vector<2x8x8xf32>
    %cst_35 = arith.constant dense<0xFF800000> : vector<2x8xf32>
    %43 = vector.multi_reduction <maximumf>, %42, %cst_35 [2] : vector<2x8x8xf32> to vector<2x8xf32>
    %44 = vector.shape_cast %43 : vector<2x8xf32> to vector<2x8x1xf32>
    %45 = vector.broadcast %44 : vector<2x8x1xf32> to vector<2x8x8xf32>
    %46 = arith.subf %42, %45 : vector<2x8x8xf32>
    %47 = math.exp %46 : vector<2x8x8xf32>
    %cst_36 = arith.constant dense<0.000000e+00> : vector<2x8xf32>
    %48 = vector.multi_reduction <add>, %47, %cst_36 [2] : vector<2x8x8xf32> to vector<2x8xf32>
    %49 = vector.shape_cast %48 : vector<2x8xf32> to vector<2x8x1xf32>
    %50 = tpu.reciprocal %49 {approx = true} : vector<2x8x1xf32> -> vector<2x8x1xf32>
    %51 = vector.broadcast %50 : vector<2x8x1xf32> to vector<2x8x8xf32>
    %52 = arith.mulf %47, %51 : vector<2x8x8xf32>
    %53 = arith.truncf %52 : vector<2x8x8xf32> to vector<2x8x8xbf16>
    %54 = arith.truncf %34 : vector<2x8x64xf32> to vector<2x8x64xbf16>
    "tpu.trace_start"() <{level = 10 : i32, message = "bqk,bkd->bqd"}> : () -> ()
    %cst_37 = arith.constant dense<0.000000e+00> : vector<2x8x64xf32>
    %55 = tpu.matmul %53, %54, %cst_37 {dimension_numbers = #tpu.dot_dimension_numbers<[2], [1], [1], [2], [0, 0, 0, 1, 1, 2], [0], [0]>} : vector<2x8x8xbf16>, vector<2x8x64xbf16>, vector<2x8x64xf32> -> vector<2x8x64xf32>
    "tpu.trace_stop"() : () -> ()
    %56 = vector.shape_cast %55 : vector<2x8x64xf32> to vector<16x64xf32>
    %57 = arith.truncf %56 : vector<16x64xf32> to vector<16x64xbf16>
    %c0_38 = arith.constant 0 : index
    %c0_39 = arith.constant 0 : index
    %c0_40 = arith.constant 0 : index
    %c0_41 = arith.constant 0 : index
    %58 = vector.load %arg14[%c0_38, %c0_39, %c0_40, %c0_41] : memref<1x2x64x128xbf16, #tpu.memory_space<vmem>>, vector<1x1x64x128xbf16>
    %59 = vector.shape_cast %58 : vector<1x1x64x128xbf16> to vector<64x128xbf16>
    %cst_42 = arith.constant dense<0.000000e+00> : vector<16x128xf32>
    %60 = tpu.matmul %57, %59, %cst_42 {dimension_numbers = #tpu.dot_dimension_numbers<[1], [0], [0], [1], [0, 0, 1, 1], [], []>} : vector<16x64xbf16>, vector<64x128xbf16>, vector<16x128xf32> -> vector<16x128xf32>
    %61 = arith.addf %10, %60 : vector<16x128xf32>
    %c0_43 = arith.constant 0 : index
    %c1 = arith.constant 1 : index
    %c0_44 = arith.constant 0 : index
    %c0_45 = arith.constant 0 : index
    %62 = vector.load %arg8[%c0_43, %c1, %c0_44, %c0_45] : memref<1x2x128x64xbf16, #tpu.memory_space<vmem>>, vector<1x1x128x64xbf16>
    %63 = vector.shape_cast %62 : vector<1x1x128x64xbf16> to vector<128x64xbf16>
    %cst_46 = arith.constant dense<0.000000e+00> : vector<16x64xf32>
    %64 = tpu.matmul %9, %63, %cst_46 {dimension_numbers = #tpu.dot_dimension_numbers<[1], [0], [0], [1], [0, 0, 1, 1], [], []>} : vector<16x128xbf16>, vector<128x64xbf16>, vector<16x64xf32> -> vector<16x64xf32>
    %c0_47 = arith.constant 0 : index
    %c1_48 = arith.constant 1 : index
    %c0_49 = arith.constant 0 : index
    %c0_50 = arith.constant 0 : index
    %65 = vector.load %arg9[%c0_47, %c1_48, %c0_49, %c0_50] : memref<1x2x1x64xf32, #tpu.memory_space<vmem>>, vector<1x1x1x64xf32>
    %66 = vector.shape_cast %65 : vector<1x1x1x64xf32> to vector<1x64xf32>
    %67 = vector.broadcast %66 : vector<1x64xf32> to vector<16x64xf32>
    %68 = arith.addf %64, %67 : vector<16x64xf32>
    %c0_51 = arith.constant 0 : index
    %c1_52 = arith.constant 1 : index
    %c0_53 = arith.constant 0 : index
    %c0_54 = arith.constant 0 : index
    %69 = vector.load %arg10[%c0_51, %c1_52, %c0_53, %c0_54] : memref<1x2x128x64xbf16, #tpu.memory_space<vmem>>, vector<1x1x128x64xbf16>
    %70 = vector.shape_cast %69 : vector<1x1x128x64xbf16> to vector<128x64xbf16>
    %cst_55 = arith.constant dense<0.000000e+00> : vector<16x64xf32>
    %71 = tpu.matmul %9, %70, %cst_55 {dimension_numbers = #tpu.dot_dimension_numbers<[1], [0], [0], [1], [0, 0, 1, 1], [], []>} : vector<16x128xbf16>, vector<128x64xbf16>, vector<16x64xf32> -> vector<16x64xf32>
    %c0_56 = arith.constant 0 : index
    %c1_57 = arith.constant 1 : index
    %c0_58 = arith.constant 0 : index
    %c0_59 = arith.constant 0 : index
    %72 = vector.load %arg11[%c0_56, %c1_57, %c0_58, %c0_59] : memref<1x2x1x64xf32, #tpu.memory_space<vmem>>, vector<1x1x1x64xf32>
    %73 = vector.shape_cast %72 : vector<1x1x1x64xf32> to vector<1x64xf32>
    %74 = vector.broadcast %73 : vector<1x64xf32> to vector<16x64xf32>
    %75 = arith.addf %71, %74 : vector<16x64xf32>
    %c0_60 = arith.constant 0 : index
    %c1_61 = arith.constant 1 : index
    %c0_62 = arith.constant 0 : index
    %c0_63 = arith.constant 0 : index
    %76 = vector.load %arg12[%c0_60, %c1_61, %c0_62, %c0_63] : memref<1x2x128x64xbf16, #tpu.memory_space<vmem>>, vector<1x1x128x64xbf16>
    %77 = vector.shape_cast %76 : vector<1x1x128x64xbf16> to vector<128x64xbf16>
    %cst_64 = arith.constant dense<0.000000e+00> : vector<16x64xf32>
    %78 = tpu.matmul %9, %77, %cst_64 {dimension_numbers = #tpu.dot_dimension_numbers<[1], [0], [0], [1], [0, 0, 1, 1], [], []>} : vector<16x128xbf16>, vector<128x64xbf16>, vector<16x64xf32> -> vector<16x64xf32>
    %c0_65 = arith.constant 0 : index
    %c1_66 = arith.constant 1 : index
    %c0_67 = arith.constant 0 : index
    %c0_68 = arith.constant 0 : index
    %79 = vector.load %arg13[%c0_65, %c1_66, %c0_67, %c0_68] : memref<1x2x1x64xf32, #tpu.memory_space<vmem>>, vector<1x1x1x64xf32>
    %80 = vector.shape_cast %79 : vector<1x1x1x64xf32> to vector<1x64xf32>
    %81 = vector.broadcast %80 : vector<1x64xf32> to vector<16x64xf32>
    %82 = arith.addf %78, %81 : vector<16x64xf32>
    %83 = vector.shape_cast %68 : vector<16x64xf32> to vector<2x8x64xf32>
    %84 = vector.shape_cast %75 : vector<16x64xf32> to vector<2x8x64xf32>
    %85 = vector.shape_cast %82 : vector<16x64xf32> to vector<2x8x64xf32>
    %86 = arith.truncf %83 : vector<2x8x64xf32> to vector<2x8x64xbf16>
    %87 = arith.truncf %84 : vector<2x8x64xf32> to vector<2x8x64xbf16>
    "tpu.trace_start"() <{level = 10 : i32, message = "bqd,bkd->bqk"}> : () -> ()
    %cst_69 = arith.constant dense<0.000000e+00> : vector<2x8x8xf32>
    %88 = tpu.matmul %86, %87, %cst_69 {dimension_numbers = #tpu.dot_dimension_numbers<[2], [2], [1], [1], [0, 0, 0, 1, 1, 1], [0], [0]>} : vector<2x8x64xbf16>, vector<2x8x64xbf16>, vector<2x8x8xf32> -> vector<2x8x8xf32>
    "tpu.trace_stop"() : () -> ()
    %cst_70 = arith.constant 1.250000e-01 : f32
    %89 = vector.broadcast %cst_70 : f32 to vector<2x8x8xf32>
    %90 = arith.mulf %88, %89 : vector<2x8x8xf32>
    %91 = vector.shape_cast %7 : vector<2x8xf32> to vector<2x1x8xf32>
    %92 = vector.broadcast %91 : vector<2x1x8xf32> to vector<2x8x8xf32>
    %93 = arith.addf %90, %92 : vector<2x8x8xf32>
    %cst_71 = arith.constant dense<0xFF800000> : vector<2x8xf32>
    %94 = vector.multi_reduction <maximumf>, %93, %cst_71 [2] : vector<2x8x8xf32> to vector<2x8xf32>
    %95 = vector.shape_cast %94 : vector<2x8xf32> to vector<2x8x1xf32>
    %96 = vector.broadcast %95 : vector<2x8x1xf32> to vector<2x8x8xf32>
    %97 = arith.subf %93, %96 : vector<2x8x8xf32>
    %98 = math.exp %97 : vector<2x8x8xf32>
    %cst_72 = arith.constant dense<0.000000e+00> : vector<2x8xf32>
    %99 = vector.multi_reduction <add>, %98, %cst_72 [2] : vector<2x8x8xf32> to vector<2x8xf32>
    %100 = vector.shape_cast %99 : vector<2x8xf32> to vector<2x8x1xf32>
    %101 = tpu.reciprocal %100 {approx = true} : vector<2x8x1xf32> -> vector<2x8x1xf32>
    %102 = vector.broadcast %101 : vector<2x8x1xf32> to vector<2x8x8xf32>
    %103 = arith.mulf %98, %102 : vector<2x8x8xf32>
    %104 = arith.truncf %103 : vector<2x8x8xf32> to vector<2x8x8xbf16>
    %105 = arith.truncf %85 : vector<2x8x64xf32> to vector<2x8x64xbf16>
    "tpu.trace_start"() <{level = 10 : i32, message = "bqk,bkd->bqd"}> : () -> ()
    %cst_73 = arith.constant dense<0.000000e+00> : vector<2x8x64xf32>
    %106 = tpu.matmul %104, %105, %cst_73 {dimension_numbers = #tpu.dot_dimension_numbers<[2], [1], [1], [2], [0, 0, 0, 1, 1, 2], [0], [0]>} : vector<2x8x8xbf16>, vector<2x8x64xbf16>, vector<2x8x64xf32> -> vector<2x8x64xf32>
    "tpu.trace_stop"() : () -> ()
    %107 = vector.shape_cast %106 : vector<2x8x64xf32> to vector<16x64xf32>
    %108 = arith.truncf %107 : vector<16x64xf32> to vector<16x64xbf16>
    %c0_74 = arith.constant 0 : index
    %c1_75 = arith.constant 1 : index
    %c0_76 = arith.constant 0 : index
    %c0_77 = arith.constant 0 : index
    %109 = vector.load %arg14[%c0_74, %c1_75, %c0_76, %c0_77] : memref<1x2x64x128xbf16, #tpu.memory_space<vmem>>, vector<1x1x64x128xbf16>
    %110 = vector.shape_cast %109 : vector<1x1x64x128xbf16> to vector<64x128xbf16>
    %cst_78 = arith.constant dense<0.000000e+00> : vector<16x128xf32>
    %111 = tpu.matmul %108, %110, %cst_78 {dimension_numbers = #tpu.dot_dimension_numbers<[1], [0], [0], [1], [0, 0, 1, 1], [], []>} : vector<16x64xbf16>, vector<64x128xbf16>, vector<16x128xf32> -> vector<16x128xf32>
    %112 = arith.addf %61, %111 : vector<16x128xf32>
    %c0_79 = arith.constant 0 : index
    %c0_80 = arith.constant 0 : index
    %c0_81 = arith.constant 0 : index
    %113 = vector.load %arg15[%c0_79, %c0_80, %c0_81] : memref<1x1x128xf32, #tpu.memory_space<vmem>>, vector<1x1x128xf32>
    %114 = vector.shape_cast %113 : vector<1x1x128xf32> to vector<1x128xf32>
    %115 = vector.broadcast %114 : vector<1x128xf32> to vector<16x128xf32>
    %116 = arith.addf %112, %115 : vector<16x128xf32>
    %117 = arith.addf %8, %116 : vector<16x128xf32>
    %c0_82 = arith.constant 0 : index
    %c0_83 = arith.constant 0 : index
    %c0_84 = arith.constant 0 : index
    %118 = vector.load %arg16[%c0_82, %c0_83, %c0_84] : memref<1x1x128xf32, #tpu.memory_space<vmem>>, vector<1x1x128xf32>
    %119 = vector.shape_cast %118 : vector<1x1x128xf32> to vector<1x128xf32>
    %c0_85 = arith.constant 0 : index
    %c0_86 = arith.constant 0 : index
    %c0_87 = arith.constant 0 : index
    %120 = vector.load %arg17[%c0_85, %c0_86, %c0_87] : memref<1x1x128xf32, #tpu.memory_space<vmem>>, vector<1x1x128xf32>
    %121 = vector.shape_cast %120 : vector<1x1x128xf32> to vector<1x128xf32>
    %cst_88 = arith.constant dense<0.000000e+00> : vector<16xf32>
    %122 = vector.multi_reduction <add>, %117, %cst_88 [1] : vector<16x128xf32> to vector<16xf32>
    %123 = vector.shape_cast %122 : vector<16xf32> to vector<16x1xf32>
    %cst_89 = arith.constant 1.280000e+02 : f32
    %124 = vector.broadcast %cst_89 : f32 to vector<16x1xf32>
    %125 = arith.divf %123, %124 : vector<16x1xf32>
    %126 = vector.broadcast %125 : vector<16x1xf32> to vector<16x128xf32>
    %127 = arith.subf %117, %126 : vector<16x128xf32>
    %128 = arith.mulf %127, %127 : vector<16x128xf32>
    %cst_90 = arith.constant dense<0.000000e+00> : vector<16xf32>
    %129 = vector.multi_reduction <add>, %128, %cst_90 [1] : vector<16x128xf32> to vector<16xf32>
    %130 = vector.shape_cast %129 : vector<16xf32> to vector<16x1xf32>
    %cst_91 = arith.constant 1.280000e+02 : f32
    %131 = vector.broadcast %cst_91 : f32 to vector<16x1xf32>
    %132 = arith.divf %130, %131 : vector<16x1xf32>
    %cst_92 = arith.constant 9.99999996E-13 : f32
    %133 = vector.broadcast %cst_92 : f32 to vector<16x1xf32>
    %134 = arith.addf %132, %133 : vector<16x1xf32>
    %135 = math.rsqrt %134 : vector<16x1xf32>
    %136 = vector.broadcast %135 : vector<16x1xf32> to vector<16x128xf32>
    %137 = arith.mulf %127, %136 : vector<16x128xf32>
    %138 = vector.broadcast %119 : vector<1x128xf32> to vector<16x128xf32>
    %139 = arith.mulf %137, %138 : vector<16x128xf32>
    %140 = vector.broadcast %121 : vector<1x128xf32> to vector<16x128xf32>
    %141 = arith.addf %139, %140 : vector<16x128xf32>
    %142 = arith.truncf %141 : vector<16x128xf32> to vector<16x128xbf16>
    %c0_93 = arith.constant 0 : index
    %c0_94 = arith.constant 0 : index
    %c0_95 = arith.constant 0 : index
    %143 = vector.load %arg18[%c0_93, %c0_94, %c0_95] : memref<1x128x512xbf16, #tpu.memory_space<vmem>>, vector<1x128x512xbf16>
    %144 = vector.shape_cast %143 : vector<1x128x512xbf16> to vector<128x512xbf16>
    %cst_96 = arith.constant dense<0.000000e+00> : vector<16x512xf32>
    %145 = tpu.matmul %142, %144, %cst_96 {dimension_numbers = #tpu.dot_dimension_numbers<[1], [0], [0], [1], [0, 0, 1, 1], [], []>} : vector<16x128xbf16>, vector<128x512xbf16>, vector<16x512xf32> -> vector<16x512xf32>
    %c0_97 = arith.constant 0 : index
    %c0_98 = arith.constant 0 : index
    %c0_99 = arith.constant 0 : index
    %146 = vector.load %arg19[%c0_97, %c0_98, %c0_99] : memref<1x1x512xf32, #tpu.memory_space<vmem>>, vector<1x1x512xf32>
    %147 = vector.shape_cast %146 : vector<1x1x512xf32> to vector<1x512xf32>
    %148 = vector.broadcast %147 : vector<1x512xf32> to vector<16x512xf32>
    %149 = arith.addf %145, %148 : vector<16x512xf32>
    %cst_100 = arith.constant 5.000000e-01 : f32
    %150 = vector.broadcast %cst_100 : f32 to vector<16x512xf32>
    %151 = arith.mulf %150, %149 : vector<16x512xf32>
    %cst_101 = arith.constant 4.471500e-02 : f32
    %152 = vector.broadcast %cst_101 : f32 to vector<16x512xf32>
    %153 = arith.mulf %152, %149 : vector<16x512xf32>
    %154 = arith.mulf %153, %149 : vector<16x512xf32>
    %155 = arith.mulf %154, %149 : vector<16x512xf32>
    %156 = arith.addf %149, %155 : vector<16x512xf32>
    %cst_102 = arith.constant 0.797884583 : f32
    %157 = vector.broadcast %cst_102 : f32 to vector<16x512xf32>
    %158 = arith.mulf %157, %156 : vector<16x512xf32>
    %159 = math.tanh %158 : vector<16x512xf32>
    %cst_103 = arith.constant 1.000000e+00 : f32
    %160 = vector.broadcast %cst_103 : f32 to vector<16x512xf32>
    %161 = arith.addf %160, %159 : vector<16x512xf32>
    %162 = arith.mulf %151, %161 : vector<16x512xf32>
    %163 = arith.truncf %162 : vector<16x512xf32> to vector<16x512xbf16>
    %c0_104 = arith.constant 0 : index
    %c0_105 = arith.constant 0 : index
    %c0_106 = arith.constant 0 : index
    %164 = vector.load %arg20[%c0_104, %c0_105, %c0_106] : memref<1x512x128xbf16, #tpu.memory_space<vmem>>, vector<1x512x128xbf16>
    %165 = vector.shape_cast %164 : vector<1x512x128xbf16> to vector<512x128xbf16>
    %cst_107 = arith.constant dense<0.000000e+00> : vector<16x128xf32>
    %166 = tpu.matmul %163, %165, %cst_107 {dimension_numbers = #tpu.dot_dimension_numbers<[1], [0], [0], [1], [0, 0, 1, 1], [], []>} : vector<16x512xbf16>, vector<512x128xbf16>, vector<16x128xf32> -> vector<16x128xf32>
    %c0_108 = arith.constant 0 : index
    %c0_109 = arith.constant 0 : index
    %c0_110 = arith.constant 0 : index
    %167 = vector.load %arg21[%c0_108, %c0_109, %c0_110] : memref<1x1x128xf32, #tpu.memory_space<vmem>>, vector<1x1x128xf32>
    %168 = vector.shape_cast %167 : vector<1x1x128xf32> to vector<1x128xf32>
    %169 = vector.broadcast %168 : vector<1x128xf32> to vector<16x128xf32>
    %170 = arith.addf %166, %169 : vector<16x128xf32>
    %171 = arith.addf %141, %170 : vector<16x128xf32>
    %c0_111 = arith.constant 0 : index
    %c0_112 = arith.constant 0 : index
    %c0_113 = arith.constant 0 : index
    %172 = vector.load %arg22[%c0_111, %c0_112, %c0_113] : memref<1x1x128xf32, #tpu.memory_space<vmem>>, vector<1x1x128xf32>
    %173 = vector.shape_cast %172 : vector<1x1x128xf32> to vector<1x128xf32>
    %c0_114 = arith.constant 0 : index
    %c0_115 = arith.constant 0 : index
    %c0_116 = arith.constant 0 : index
    %174 = vector.load %arg23[%c0_114, %c0_115, %c0_116] : memref<1x1x128xf32, #tpu.memory_space<vmem>>, vector<1x1x128xf32>
    %175 = vector.shape_cast %174 : vector<1x1x128xf32> to vector<1x128xf32>
    %cst_117 = arith.constant dense<0.000000e+00> : vector<16xf32>
    %176 = vector.multi_reduction <add>, %171, %cst_117 [1] : vector<16x128xf32> to vector<16xf32>
    %177 = vector.shape_cast %176 : vector<16xf32> to vector<16x1xf32>
    %cst_118 = arith.constant 1.280000e+02 : f32
    %178 = vector.broadcast %cst_118 : f32 to vector<16x1xf32>
    %179 = arith.divf %177, %178 : vector<16x1xf32>
    %180 = vector.broadcast %179 : vector<16x1xf32> to vector<16x128xf32>
    %181 = arith.subf %171, %180 : vector<16x128xf32>
    %182 = arith.mulf %181, %181 : vector<16x128xf32>
    %cst_119 = arith.constant dense<0.000000e+00> : vector<16xf32>
    %183 = vector.multi_reduction <add>, %182, %cst_119 [1] : vector<16x128xf32> to vector<16xf32>
    %184 = vector.shape_cast %183 : vector<16xf32> to vector<16x1xf32>
    %cst_120 = arith.constant 1.280000e+02 : f32
    %185 = vector.broadcast %cst_120 : f32 to vector<16x1xf32>
    %186 = arith.divf %184, %185 : vector<16x1xf32>
    %cst_121 = arith.constant 9.99999996E-13 : f32
    %187 = vector.broadcast %cst_121 : f32 to vector<16x1xf32>
    %188 = arith.addf %186, %187 : vector<16x1xf32>
    %189 = math.rsqrt %188 : vector<16x1xf32>
    %190 = vector.broadcast %189 : vector<16x1xf32> to vector<16x128xf32>
    %191 = arith.mulf %181, %190 : vector<16x128xf32>
    %192 = vector.broadcast %173 : vector<1x128xf32> to vector<16x128xf32>
    %193 = arith.mulf %191, %192 : vector<16x128xf32>
    %194 = vector.broadcast %175 : vector<1x128xf32> to vector<16x128xf32>
    %195 = arith.addf %193, %194 : vector<16x128xf32>
    %c0_122 = arith.constant 0 : index
    %c0_123 = arith.constant 0 : index
    %196 = vector.load %arg29[%c0_122, %c0_123] : memref<16x128xf32, #tpu.memory_space<vmem>>, vector<16x128xf32>
    tpu.vector_store %arg29[%c0_122, %c0_123], %195 {strides = array<i32>} : memref<16x128xf32, #tpu.memory_space<vmem>>, vector<16x128xf32>,
    %c1_i32 = arith.constant 1 : i32
    %197 = arith.cmpi eq, %arg0, %c1_i32 : i32
    %198 = arith.extui %197 : i1 to i32
    %c0_i32_124 = arith.constant 0 : i32
    %199 = arith.cmpi ne, %198, %c0_i32_124 : i32
    scf.if %199 {
      %200 = vector.shape_cast %195 : vector<16x128xf32> to vector<2x8x128xf32>
      %201 = vector.extract_strided_slice %200 {offsets = [0, 0, 0], sizes = [2, 1, 128], strides = [1, 1, 1]} : vector<2x8x128xf32> to vector<2x1x128xf32>
      %202 = vector.shape_cast %201 : vector<2x1x128xf32> to vector<2x128xf32>
      %203 = arith.truncf %202 : vector<2x128xf32> to vector<2x128xbf16>
      %c0_125 = arith.constant 0 : index
      %c0_126 = arith.constant 0 : index
      %204 = vector.load %arg24[%c0_125, %c0_126] : memref<128x128xbf16, #tpu.memory_space<vmem>>, vector<128x128xbf16>
      %cst_127 = arith.constant dense<0.000000e+00> : vector<2x128xf32>
      %205 = tpu.matmul %203, %204, %cst_127 {dimension_numbers = #tpu.dot_dimension_numbers<[1], [0], [0], [1], [0, 0, 1, 1], [], []>} : vector<2x128xbf16>, vector<128x128xbf16>, vector<2x128xf32> -> vector<2x128xf32>
      %c0_128 = arith.constant 0 : index
      %c0_129 = arith.constant 0 : index
      %206 = vector.load %arg25[%c0_128, %c0_129] : memref<1x128xf32, #tpu.memory_space<vmem>>, vector<1x128xf32>
      %207 = vector.broadcast %206 : vector<1x128xf32> to vector<2x128xf32>
      %208 = arith.addf %205, %207 : vector<2x128xf32>
      %209 = math.tanh %208 : vector<2x128xf32>
      %210 = arith.truncf %209 : vector<2x128xf32> to vector<2x128xbf16>
      %c0_130 = arith.constant 0 : index
      %c0_131 = arith.constant 0 : index
      %211 = vector.load %arg26[%c0_130, %c0_131] : memref<128x4xbf16, #tpu.memory_space<vmem>>, vector<128x4xbf16>
      %cst_132 = arith.constant dense<0.000000e+00> : vector<2x4xf32>
      %212 = tpu.matmul %210, %211, %cst_132 {dimension_numbers = #tpu.dot_dimension_numbers<[1], [0], [0], [1], [0, 0, 1, 1], [], []>} : vector<2x128xbf16>, vector<128x4xbf16>, vector<2x4xf32> -> vector<2x4xf32>
      %c0_133 = arith.constant 0 : index
      %c0_134 = arith.constant 0 : index
      %213 = vector.load %arg27[%c0_133, %c0_134] : memref<1x4xf32, #tpu.memory_space<vmem>>, vector<1x4xf32>
      %214 = vector.broadcast %213 : vector<1x4xf32> to vector<2x4xf32>
      %215 = arith.addf %212, %214 : vector<2x4xf32>
      %c0_135 = arith.constant 0 : index
      %c0_136 = arith.constant 0 : index
      %216 = vector.load %arg28[%c0_135, %c0_136] : memref<2x4xf32, #tpu.memory_space<vmem>>, vector<2x4xf32>
      tpu.vector_store %arg28[%c0_135, %c0_136], %215 {strides = array<i32>} : memref<2x4xf32, #tpu.memory_space<vmem>>, vector<2x4xf32>,
    } else {
    }
    return
  }
  func.func @transform_0(%arg0: i32, %arg1: memref<16xi32, #tpu.memory_space<smem>>) -> (i32, i32) {
    %c0_i32 = arith.constant 0 : i32
    %c0_i32_0 = arith.constant 0 : i32
    %c0_i32_1 = arith.constant 0 : i32
    return %c0_i32, %c0_i32_0 : i32, i32
  }
  func.func @transform_1(%arg0: i32, %arg1: memref<16xi32, #tpu.memory_space<smem>>) -> (i32, i32) {
    %c0_i32 = arith.constant 0 : i32
    %c0_i32_0 = arith.constant 0 : i32
    %c0_i32_1 = arith.constant 0 : i32
    return %c0_i32, %c0_i32_0 : i32, i32
  }
  func.func @transform_2(%arg0: i32, %arg1: memref<16xi32, #tpu.memory_space<smem>>) -> (i32, i32) {
    %c0_i32 = arith.constant 0 : i32
    %c0_i32_0 = arith.constant 0 : i32
    %c0_i32_1 = arith.constant 0 : i32
    return %c0_i32, %c0_i32_0 : i32, i32
  }
  func.func @transform_3(%arg0: i32, %arg1: memref<16xi32, #tpu.memory_space<smem>>) -> (i32, i32) {
    %c0_i32 = arith.constant 0 : i32
    %c0_i32_0 = arith.constant 0 : i32
    %c0_i32_1 = arith.constant 0 : i32
    return %c0_i32, %c0_i32_0 : i32, i32
  }
  func.func @transform_4(%arg0: i32, %arg1: memref<16xi32, #tpu.memory_space<smem>>) -> (i32, i32) {
    %c0_i32 = arith.constant 0 : i32
    %c0_i32_0 = arith.constant 0 : i32
    %c0_i32_1 = arith.constant 0 : i32
    return %c0_i32, %c0_i32_0 : i32, i32
  }
  func.func @transform_5(%arg0: i32, %arg1: memref<16xi32, #tpu.memory_space<smem>>) -> (i32, i32) {
    %c0_i32 = arith.constant 0 : i32
    %c0_i32_0 = arith.constant 0 : i32
    %c0_i32_1 = arith.constant 0 : i32
    return %c0_i32, %c0_i32_0 : i32, i32
  }
  func.func @transform_6(%arg0: i32, %arg1: memref<16xi32, #tpu.memory_space<smem>>) -> (i32, i32, i32, i32) {
    %c0_i32 = arith.constant 0 : i32
    %c0_i32_0 = arith.constant 0 : i32
    %c0_i32_1 = arith.constant 0 : i32
    %c0_i32_2 = arith.constant 0 : i32
    return %arg0, %c0_i32, %c0_i32_0, %c0_i32_1 : i32, i32, i32, i32
  }
  func.func @transform_7(%arg0: i32, %arg1: memref<16xi32, #tpu.memory_space<smem>>) -> (i32, i32, i32, i32) {
    %c0_i32 = arith.constant 0 : i32
    %c0_i32_0 = arith.constant 0 : i32
    %c0_i32_1 = arith.constant 0 : i32
    %c0_i32_2 = arith.constant 0 : i32
    return %arg0, %c0_i32, %c0_i32_0, %c0_i32_1 : i32, i32, i32, i32
  }
  func.func @transform_8(%arg0: i32, %arg1: memref<16xi32, #tpu.memory_space<smem>>) -> (i32, i32, i32, i32) {
    %c0_i32 = arith.constant 0 : i32
    %c0_i32_0 = arith.constant 0 : i32
    %c0_i32_1 = arith.constant 0 : i32
    %c0_i32_2 = arith.constant 0 : i32
    return %arg0, %c0_i32, %c0_i32_0, %c0_i32_1 : i32, i32, i32, i32
  }
  func.func @transform_9(%arg0: i32, %arg1: memref<16xi32, #tpu.memory_space<smem>>) -> (i32, i32, i32, i32) {
    %c0_i32 = arith.constant 0 : i32
    %c0_i32_0 = arith.constant 0 : i32
    %c0_i32_1 = arith.constant 0 : i32
    %c0_i32_2 = arith.constant 0 : i32
    return %arg0, %c0_i32, %c0_i32_0, %c0_i32_1 : i32, i32, i32, i32
  }
  func.func @transform_10(%arg0: i32, %arg1: memref<16xi32, #tpu.memory_space<smem>>) -> (i32, i32, i32, i32) {
    %c0_i32 = arith.constant 0 : i32
    %c0_i32_0 = arith.constant 0 : i32
    %c0_i32_1 = arith.constant 0 : i32
    %c0_i32_2 = arith.constant 0 : i32
    return %arg0, %c0_i32, %c0_i32_0, %c0_i32_1 : i32, i32, i32, i32
  }
  func.func @transform_11(%arg0: i32, %arg1: memref<16xi32, #tpu.memory_space<smem>>) -> (i32, i32, i32, i32) {
    %c0_i32 = arith.constant 0 : i32
    %c0_i32_0 = arith.constant 0 : i32
    %c0_i32_1 = arith.constant 0 : i32
    %c0_i32_2 = arith.constant 0 : i32
    return %arg0, %c0_i32, %c0_i32_0, %c0_i32_1 : i32, i32, i32, i32
  }
  func.func @transform_12(%arg0: i32, %arg1: memref<16xi32, #tpu.memory_space<smem>>) -> (i32, i32, i32, i32) {
    %c0_i32 = arith.constant 0 : i32
    %c0_i32_0 = arith.constant 0 : i32
    %c0_i32_1 = arith.constant 0 : i32
    %c0_i32_2 = arith.constant 0 : i32
    return %arg0, %c0_i32, %c0_i32_0, %c0_i32_1 : i32, i32, i32, i32
  }
  func.func @transform_13(%arg0: i32, %arg1: memref<16xi32, #tpu.memory_space<smem>>) -> (i32, i32, i32) {
    %c0_i32 = arith.constant 0 : i32
    %c0_i32_0 = arith.constant 0 : i32
    %c0_i32_1 = arith.constant 0 : i32
    return %arg0, %c0_i32, %c0_i32_0 : i32, i32, i32
  }
  func.func @transform_14(%arg0: i32, %arg1: memref<16xi32, #tpu.memory_space<smem>>) -> (i32, i32, i32) {
    %c0_i32 = arith.constant 0 : i32
    %c0_i32_0 = arith.constant 0 : i32
    %c0_i32_1 = arith.constant 0 : i32
    return %arg0, %c0_i32, %c0_i32_0 : i32, i32, i32
  }
  func.func @transform_15(%arg0: i32, %arg1: memref<16xi32, #tpu.memory_space<smem>>) -> (i32, i32, i32) {
    %c0_i32 = arith.constant 0 : i32
    %c0_i32_0 = arith.constant 0 : i32
    %c0_i32_1 = arith.constant 0 : i32
    return %arg0, %c0_i32, %c0_i32_0 : i32, i32, i32
  }
  func.func @transform_16(%arg0: i32, %arg1: memref<16xi32, #tpu.memory_space<smem>>) -> (i32, i32, i32) {
    %c0_i32 = arith.constant 0 : i32
    %c0_i32_0 = arith.constant 0 : i32
    %c0_i32_1 = arith.constant 0 : i32
    return %arg0, %c0_i32, %c0_i32_0 : i32, i32, i32
  }
  func.func @transform_17(%arg0: i32, %arg1: memref<16xi32, #tpu.memory_space<smem>>) -> (i32, i32, i32) {
    %c0_i32 = arith.constant 0 : i32
    %c0_i32_0 = arith.constant 0 : i32
    %c0_i32_1 = arith.constant 0 : i32
    return %arg0, %c0_i32, %c0_i32_0 : i32, i32, i32
  }
  func.func @transform_18(%arg0: i32, %arg1: memref<16xi32, #tpu.memory_space<smem>>) -> (i32, i32, i32) {
    %c0_i32 = arith.constant 0 : i32
    %c0_i32_0 = arith.constant 0 : i32
    %c0_i32_1 = arith.constant 0 : i32
    return %arg0, %c0_i32, %c0_i32_0 : i32, i32, i32
  }
  func.func @transform_19(%arg0: i32, %arg1: memref<16xi32, #tpu.memory_space<smem>>) -> (i32, i32, i32) {
    %c0_i32 = arith.constant 0 : i32
    %c0_i32_0 = arith.constant 0 : i32
    %c0_i32_1 = arith.constant 0 : i32
    return %arg0, %c0_i32, %c0_i32_0 : i32, i32, i32
  }
  func.func @transform_20(%arg0: i32, %arg1: memref<16xi32, #tpu.memory_space<smem>>) -> (i32, i32, i32) {
    %c0_i32 = arith.constant 0 : i32
    %c0_i32_0 = arith.constant 0 : i32
    %c0_i32_1 = arith.constant 0 : i32
    return %arg0, %c0_i32, %c0_i32_0 : i32, i32, i32
  }
  func.func @transform_21(%arg0: i32, %arg1: memref<16xi32, #tpu.memory_space<smem>>) -> (i32, i32, i32) {
    %c0_i32 = arith.constant 0 : i32
    %c0_i32_0 = arith.constant 0 : i32
    %c0_i32_1 = arith.constant 0 : i32
    return %arg0, %c0_i32, %c0_i32_0 : i32, i32, i32
  }
  func.func @transform_22(%arg0: i32, %arg1: memref<16xi32, #tpu.memory_space<smem>>) -> (i32, i32) {
    %c0_i32 = arith.constant 0 : i32
    %c0_i32_0 = arith.constant 0 : i32
    %c0_i32_1 = arith.constant 0 : i32
    return %c0_i32, %c0_i32_0 : i32, i32
  }
  func.func @transform_23(%arg0: i32, %arg1: memref<16xi32, #tpu.memory_space<smem>>) -> (i32, i32) {
    %c0_i32 = arith.constant 0 : i32
    %c0_i32_0 = arith.constant 0 : i32
    %c0_i32_1 = arith.constant 0 : i32
    return %c0_i32, %c0_i32_0 : i32, i32
  }
  func.func @transform_24(%arg0: i32, %arg1: memref<16xi32, #tpu.memory_space<smem>>) -> (i32, i32) {
    %c0_i32 = arith.constant 0 : i32
    %c0_i32_0 = arith.constant 0 : i32
    %c0_i32_1 = arith.constant 0 : i32
    return %c0_i32, %c0_i32_0 : i32, i32
  }
  func.func @transform_25(%arg0: i32, %arg1: memref<16xi32, #tpu.memory_space<smem>>) -> (i32, i32) {
    %c0_i32 = arith.constant 0 : i32
    %c0_i32_0 = arith.constant 0 : i32
    %c0_i32_1 = arith.constant 0 : i32
    return %c0_i32, %c0_i32_0 : i32, i32
  }
  func.func @transform_26(%arg0: i32, %arg1: memref<16xi32, #tpu.memory_space<smem>>) -> (i32, i32) {
    %c0_i32 = arith.constant 0 : i32
    %c0_i32_0 = arith.constant 0 : i32
    %c0_i32_1 = arith.constant 0 : i32
    return %c0_i32, %c0_i32_0 : i32, i32
  }
}

</mosaic_0001>

<bundles_post_ra>
// kernel: tpu_custom_call.1
= control target key start
LH: loop header
LB: loop body
LE: loop exit
PB: predicated region body
PF: predicated region fallthrough
CT: control target
= control target key end

     0   :  { %s6179_s0 = inlined_call_operand.hbm [shape: s32[16], index: 0, kind: input, shape index: {}]   ;;  %s6180_s1 = inlined_call_operand.vmem [shape: f32[2,8], index: 1, kind: input, shape index: {}]   ;;  %s6181_s2 = inlined_call_operand.hbm [shape: f32[128,128], index: 2, kind: input, shape index: {}]   ;;  %s6182_s3 = inlined_call_operand.hbm [shape: f32[16,128], index: 3, kind: input, shape index: {}]   ;;  %s6183_s4 = inlined_call_operand.hbm [shape: f32[2,128], index: 4, kind: input, shape index: {}]   ;;  %s6184_s5 = inlined_call_operand.hbm [shape: f32[1,128], index: 5, kind: input, shape index: {}]   ;;  %s6185_s6 = inlined_call_operand.hbm [shape: f32[1,128], index: 6, kind: input, shape index: {}]   ;;  %s6186_s7 = inlined_call_operand.vmem [shape: bf16[2,2,128,64], index: 7, kind: input, shape index: {}]   ;;  %s6187_s8 = inlined_call_operand.vmem [shape: f32[2,2,1,64], index: 8, kind: input, shape index: {}]   ;;  %s6188_s9 = inlined_call_operand.vmem [shape: bf16[2,2,128,64], index: 9, kind: input, shape index: {}]   ;;  %s6189_s10 = inlined_call_operand.hbm [shape: f32[2,2,1,64], index: 10, kind: input, shape index: {}]   ;;  %s6190_s11 = inlined_call_operand.vmem [shape: bf16[2,2,128,64], index: 11, kind: input, shape index: {}]   ;;  %s6191_s12 = inlined_call_operand.hbm [shape: f32[2,2,1,64], index: 12, kind: input, shape index: {}]   ;;  %s6192_s13 = inlined_call_operand.hbm [shape: bf16[2,2,64,128], index: 13, kind: input, shape index: {}]   ;;  %s6193_s14 = inlined_call_operand.vmem [shape: f32[2,1,128], index: 14, kind: input, shape index: {}]   ;;  %s6194_s15 = inlined_call_operand.vmem [shape: f32[2,1,128], index: 15, kind: input, shape index: {}]   ;;  %s6195_s16 = inlined_call_operand.vmem [shape: f32[2,1,128], index: 16, kind: input, shape index: {}]   ;;  %s6196_s17 = inlined_call_operand.vmem [shape: bf16[2,128,512], index: 17, kind: input, shape index: {}]   ;;  %s6197_s18 = inlined_call_operand.vmem [shape: f32[2,1,512], index: 18, kind: input, shape index: {}]   ;;  %s6198_s19 = inlined_call_operand.vmem [shape: bf16[2,512,128], index: 19, kind: input, shape index: {}]   ;;  %s6199_s20 = inlined_call_operand.vmem [shape: f32[2,1,128], index: 20, kind: input, shape index: {}]   ;;  %s6200_s21 = inlined_call_operand.vmem [shape: f32[2,1,128], index: 21, kind: input, shape index: {}]   ;;  %s6201_s22 = inlined_call_operand.vmem [shape: f32[2,1,128], index: 22, kind: input, shape index: {}]   ;;  %s6202_s23 = inlined_call_operand.vmem [shape: bf16[128,128], index: 23, kind: input, shape index: {}]   ;;  %s6203_s24 = inlined_call_operand.vmem [shape: f32[1,128], index: 24, kind: input, shape index: {}]   ;;  %s6204_s25 = inlined_call_operand.vmem [shape: bf16[128,4], index: 25, kind: input, shape index: {}]   ;;  %s6205_s26 = inlined_call_operand.vmem [shape: f32[1,4], index: 26, kind: input, shape index: {}]   ;;  %s6206_s27 = inlined_call_operand.hbm [shape: f32[2,4], index: 27, kind: output, shape index: {}]  }
   0x1   :  { %6231 = sst [smem:[#allocation32_spill]] %s6179_s0 }
   0x2   :  { %6232 = sst [smem:[#allocation33_spill]] %s6180_s1 }
   0x3   :  { %6233 = sst [smem:[#allocation34_spill]] %s6181_s2 }
   0x4   :  { %6234 = sst [smem:[#allocation35_spill]] %s6182_s3 }
   0x5   :  { %6235 = sst [smem:[#allocation36_spill]] %s6183_s4 }
   0x6   :  { %6236 = sst [smem:[#allocation37_spill]] %s6184_s5 }
   0x7   :  { %6237 = sst [smem:[#allocation38_spill]] %s6185_s6 }
   0x8   :  { %6238 = sst [smem:[#allocation39_spill]] %s6186_s7  ;;  %s5249_s7 = smov [#allocation4]  }
   0x9   :  { %6239 = sst [smem:[#allocation40_spill]] %s6187_s8 }
   0xa   :  { %6240 = sst [smem:[#allocation41_spill]] %s6188_s9 }
   0xb   :  { %6241 = sst [smem:[#allocation42_spill]] %s6189_s10 }
   0xc   :  { %6242 = sst [smem:[#allocation43_spill]] %s6190_s11 }
   0xd   :  { %6243 = sst [smem:[#allocation44_spill]] %s6191_s12 }
   0xe   :  { %6244 = sst [smem:[#allocation45_spill]] %s6192_s13 }
   0xf   :  { %6245 = sst [smem:[#allocation46_spill]] %s6193_s14 }
  0x10   :  { %6246 = sst [smem:[#allocation47_spill]] %s6194_s15 }
  0x11   :  { %6247 = sst [smem:[#allocation48_spill]] %s6195_s16 }
  0x12   :  { %6248 = sst [smem:[#allocation49_spill]] %s6196_s17 }
  0x13   :  { %6249 = sst [smem:[#allocation50_spill]] %s6197_s18 }
  0x14   :  { %6250 = sst [smem:[#allocation51_spill]] %s6198_s19 }
  0x15   :  { %6251 = sst [smem:[#allocation52_spill]] %s6199_s20 }
  0x16   :  { %6252 = sst [smem:[#allocation53_spill]] %s6200_s21 }
  0x17   :  { %6253 = sst [smem:[#allocation54_spill]] %s6201_s22 }
  0x18   :  { %6254 = sst [smem:[#allocation55_spill]] %s6202_s23 }
  0x19   :  { %6255 = sst [smem:[#allocation56_spill]] %s6203_s24 }
  0x1a   :  { %6256 = sst [smem:[#allocation57_spill]] %s6204_s25 }
  0x1b   :  { %6257 = sst [smem:[#allocation58_spill]] %s6205_s26 }
  0x1c   :  { %6258 = sst [smem:[#allocation59_spill]] %s6206_s27 }
  0x1d   :  { %s6259_s21 = sld [smem:[#allocation32_spill]] }
  0x23   :  { %33 = dma.hbm_to_smem %s6259_s21, 16, %s5249_s7, [#allocation3] }
  0x24   :  { %5207 = dma.done.wait [#allocation3], 16 }
  0x25   :  { %5208 = vsyncadd [#allocation3], 4294967280 }
  0x26   :  { %35 = sfence }
  0x27   :  { %36 = vsyncpa [#allocation6], 0 }
  0x28   :  { %37 = vsyncpa [#allocation9], 0 }
  0x29   :  { %38 = vsyncpa [#allocation12], 0 }
  0x2a   :  { %39 = vsyncpa [#allocation15], 0 }
  0x2b   :  { %41 = vsyncpa [#allocation15 + $0x1], 0 }
  0x2c   :  { %42 = vsyncpa [#allocation18], 0 }
  0x2d   :  { %44 = vsyncpa [#allocation18 + $0x1], 0 }
  0x2e   :  { %45 = vsyncpa [#allocation7], 0  ;;  %s5414_s30 = smov 0   ;;  %s5416_s9 = smov 0  }
  0x2f   :  { %s5418_s5 = smov 0   ;;  %s5420_s28 = smov 0  }
  0x30 LB: > { %6260 = sst [smem:[#allocation27_spill]] %s5239_s9  ;;  %s5250_s21 = smov [#allocation8]   ;;  %s5247_s28 = sphi %s5420_s28, %s6327_s28   ;;  %s5243_s5 = sphi %s5418_s5, %s6330_s5   ;;  %s5239_s9 = sphi %s5416_s9, %s6329_s9   ;;  %s5235_s30 = sphi %s5414_s30, %s6328_s30  }
  0x31   : > { %6261 = sst [smem:[#allocation28_spill]] %s5243_s5  ;;  %s732_s0 = sshll.u32 %s5250_s21, 4  ;;  %s733_s0 = int_to_ptr.vmem [resolvable:$true] %s732_s0 }
  0x32   : > { %s5435_s10 = sadd.s32 4294967295, %s5247_s28   ;;  %p3962_p0 = scmp.ge.s32.totalorder %s5247_s28, 1 }
  0x33   : > { %p6208_p1 = scmp.eq.s32.totalorder %s5435_s10, 0  ;;  %p703_p2 = scmp.lt.s32.totalorder %s5247_s28, 3 }
  0x34   : > { %s5251_s1 = smov [#allocation11]   ;;  %s4964_s3 = scalar_lea.vmem %s733_s0, 128 }
  0x35   : > { %p5441_p4 = pnand %p3962_p0, %p703_p2  ;;  %s754_s6 = sshll.u32 %s5251_s1, 4  ;;  %s755_s6 = int_to_ptr.vmem [resolvable:$true] %s754_s6 }
  0x36   : > { %p4965_p8 = scmp.ne.s32.totalorder %s733_s0, %s4964_s3  ;;  %p4972_p11 = scmp.lt.s32.totalorder %s733_s0, %s733_s0 }
  0x37   : > { %s6262_s29 = scalar_select %p5441_p4, 1, 0 }
  0x38   : > { %p4655_p5 = pneg %p5441_p4  ;;  %p4973_p12 = scmp.lt.s32.totalorder %s4964_s3, %s4964_s3 }
  0x3a   : > { %p5449_p6 = pnand %p4655_p5, %p6208_p1  ;;  %p4974_p13 = por %p4973_p12, %p4972_p11 }
  0x3c   : > { %s6263_s11 = scalar_select %p5449_p6, 1, 0 }
  0x3d   : > { %p5455_p7 = pneg %p5449_p6 }
  0x3f   : > { %s6264_s2 = scalar_select %p5455_p7, 1, 0 }
  0x40   : > { %p4967_p9 = pnand %p4965_p8, %p5455_p7 }
  0x42   : > { %p4968_p10 = pneg %p4967_p9 }
  0x44   : > { %p4975_p0 = pnand %p4974_p13, %p4968_p10 }
  0x46   : > { %4978 = shalt.err (!%p4975_p0)
}
  0x47   : > { %s6265_s8 = sld [smem:[#allocation35_spill]]  ;;  %s4990_s21 = scalar_lea.vmem %s755_s6, 16 }
  0x48   : > { %p4991_p2 = scmp.ne.s32.totalorder %s755_s6, %s4990_s21  ;;  %s4997_s1 = scalar_lea.vmem %s755_s6, 32 }
  0x49   : > { %p4998_p8 = scmp.lt.s32.totalorder %s755_s6, %s755_s6  ;;  %p4999_p9 = scmp.lt.s32.totalorder %s4997_s1, %s4990_s21 }
  0x4a   : > { %p4993_p5 = pnand %p4991_p2, %p5455_p7 }
  0x4b   : > { %p5000_p1 = por %p4999_p9, %p4998_p8 }
  0x4c   : > { %p4994_p3 = pneg %p4993_p5 }
  0x4d   : > { %4661 = dma.hbm_to_vmem [thread:$0]  (!%p5449_p6), %s6265_s8, 128, %s733_s0, [#allocation9]  }
  0x4e   : > { %p5001_p4 = pnand %p5000_p1, %p4994_p3 }
  0x50   : > { %5004 = shalt.err (!%p5001_p4)
}
  0x51   : > { %s6266_s26 = sld [smem:[#allocation37_spill]]  ;;  %s5474_s0 = sadd.s32 1, %s5247_s28  }
  0x52   : > { %6267 = sst [smem:[#allocation29_spill]] %s5474_s0  ;;  %s262_s27 = sadd.s32 1, %s5243_s5 }
  0x53   : > { %s259_s7 = ssub.s32 %s5247_s28, %s5474_s0  ;;  %p269_p1 = scmp.ne.s32.totalorder %s5243_s5, %s5239_s9 }
  0x54   : > { %p260_p3 = scmp.eq.s32.totalorder %s259_s7, 0  ;;  %p270_p4 = scmp.eq.s32.totalorder %s5247_s28, 0 }
  0x55   : > { %p275_p10 = scmp.ne.s32.totalorder %s5239_s9, %s5235_s30  ;;  %p4686_p11 = scmp.lt.s32.totalorder %s5247_s28, 2 }
  0x56   : > { %s5486_s4 = scalar_select %p260_p3, %s5243_s5, %s262_s27  }
  0x57   : > { %4667 = dma.hbm_to_vmem [thread:$0]  (!%p5449_p6), %s6266_s26, 16, %s755_s6, [#allocation12]  }
  0x58   : > { %6268 = sst [smem:[#allocation30_spill]] %s5486_s4  ;;  %p271_p12 = por %p270_p4, %p269_p1 }
  0x59   : > { %p6269_p13 = scmp.eq.s32.totalorder %s5435_s10, 0  ;;  %s811_s26 = sand.u32 1, %s5247_s28  }
  0x5a   : > { %s5496_s6 = sand.u32 1, %s5243_s5   ;;  %s6216_s1 = sshll.u32 %s5247_s28, 5 }
  0x5b   : > { %p5490_p0 = por %p6269_p13, %p275_p10  ;;  %s6215_s21 = sshll.u32 %s5496_s6, 1 }
  0x5c   : > { %s6271_s30 = sld [smem:[#allocation42_spill]]  ;;  %s815_s27 = scalar_lea.vmem [#allocation14], %s6215_s21 }
  0x5d   : > { %s6270_s8 = scalar_select %p5490_p0, 1, 0 }
  0x5e   : > { %s822_s4 = sshll.u32 %s815_s27, 4  ;;  %p5511_p2 = pnand %p4686_p11, %p271_p12  ;;  %s5509_s4 = int_to_ptr.vmem [resolvable:$true] %s822_s4 }
  0x5f   : > { %s5515_s25 = scalar_lea.sflag [#allocation15], %s811_s26 }
  0x60   : > { %s6273_s5 = scalar_select %p5511_p2, 1, 0 }
  0x61   : > { %p5521_p8 = pneg %p5511_p2 }
  0x62   : > { %s6272_s0 = smov %s6271_s30  ;;  %s5505_s24 = scalar_lea.hbm %s6271_s30, %s6216_s1 }
  0x63   : > { %s5005_s23 = scalar_lea.hbm %s5505_s24, 32  ;;  %s5010_s27 = scalar_lea.hbm %s6272_s0, 64 }
  0x64   : > { %p5006_p5 = scmp.ne.s32.totalorder %s5505_s24, %s5005_s23  ;;  %p5011_p3 = scmp.lt.s32.totalorder %s5505_s24, %s6272_s0 }
  0x65   : > { %s6274_s3 = scalar_select %p5521_p8, 1, 0 }
  0x66   : > { %p5008_p9 = pnand %p5521_p8, %p5006_p5  ;;  %p5012_p4 = scmp.lt.s32.totalorder %s5010_s27, %s5005_s23 }
  0x68   : > { %p5009_p1 = pneg %p5008_p9  ;;  %p5013_p10 = por %p5012_p4, %p5011_p3 }
  0x6a   : > { %p5014_p11 = pnand %p5013_p10, %p5009_p1 }
  0x6c   : > { %5017 = shalt.err (!%p5014_p11)
}
  0x6d   : > { %s5018_s26 = scalar_lea.vmem %s5509_s4, 32  ;;  %s5252_s22 = smov [#allocation14]  }
  0x6e   : > { %p5019_p12 = scmp.ne.s32.totalorder %s5509_s4, %s5018_s26  ;;  %s5023_s7 = sshll.u32 %s5252_s22, 4  ;;  %s5024_s7 = int_to_ptr.vmem [resolvable:$false] %s5023_s7 }
  0x6f   : > { %s5025_s30 = scalar_lea.vmem %s5024_s7, 64  ;;  %p5026_p9 = scmp.lt.s32.totalorder %s5509_s4, %s5024_s7 }
  0x70   : > { %p5021_p13 = pnand %p5019_p12, %p5521_p8  ;;  %p5027_p0 = scmp.lt.s32.totalorder %s5025_s30, %s5018_s26 }
  0x72   : > { %p5022_p5 = pneg %p5021_p13  ;;  %p5028_p6 = por %p5027_p0, %p5026_p9 }
  0x74   : > { %p5029_p7 = pnand %p5028_p6, %p5022_p5 }
  0x76   : > { %5032 = shalt.err (!%p5029_p7)
}
  0x77   : > { %s6223_s23 = smov 16   ;;  %s6224_s21 = smov 1  }
  0x78   : > { %4674 = dma.hbm_to_vmem [thread:$0]  (!%p5511_p2), %s5505_s24, 32, %s5509_s4, %s5515_s25, %s6223_s23, %s6223_s23, %s6224_s21  }
  0x79   : > { %s6275_s22 = sshll.u32 %s5247_s28, 5  ;;  %s6276_s12 = sld [smem:[#allocation44_spill]] }
  0x7a   : > { %s6277_s7 = sshll.u32 %s5496_s6, 1  ;;  %s5255_s20 = smov [#allocation5]  }
  0x7b   : > { %s844_s30 = scalar_lea.vmem [#allocation16], %s6277_s7  ;;  %s718_s19 = sshll.u32 %s5255_s20, 4  ;;  %s719_s19 = int_to_ptr.vmem [resolvable:$true] %s718_s19 }
  0x7c   : > { %s851_s0 = sshll.u32 %s844_s30, 4  ;;  %s5044_s18 = scalar_lea.vmem %s719_s19, 2048  ;;  %s5556_s0 = int_to_ptr.vmem [resolvable:$true] %s851_s0 }
  0x7d   : > { %p5045_p6 = scmp.ne.s32.totalorder %s719_s19, %s5044_s18  ;;  %p6278_p7 = scmp.ne.s32.totalorder %s6264_s2, 0 }
  0x7e   : > { %p5052_p3 = scmp.lt.s32.totalorder %s719_s19, %s719_s19  ;;  %p5053_p4 = scmp.lt.s32.totalorder %s5044_s18, %s5044_s18 }
  0x7f   : > { %s5552_s26 = scalar_lea.hbm %s6276_s12, %s6275_s22  ;;  %p5047_p0 = pnand %p5045_p6, %p6278_p7 }
  0x80   : > { %p5054_p10 = por %p5053_p4, %p5052_p3 }
  0x81   : > { %p5048_p1 = pneg %p5047_p0 }
  0x83   : > { %p5055_p11 = pnand %p5054_p10, %p5048_p1 }
  0x85   : > { %5058 = shalt.err (!%p5055_p11)
}
  0x86   : > { %s5256_s24 = smov 128   ;;  %s5257_s4 = smov 8  }
  0x87   : > { %p6279_p12 = scmp.ne.s32.totalorder %s6263_s11, 0  ;;  %s6280_s27 = sld [smem:[#allocation34_spill]] }
  0x88   : > { %s5258_s20 = smov [#allocation10]   ;;  %s5259_s30 = smov [#allocation13]  }
  0x89   : > { %s743_s7 = sshll.u32 %s5258_s20, 4  ;;  %s765_s23 = sshll.u32 %s5259_s30, 4  ;;  %s744_s7 = int_to_ptr.vmem [resolvable:$true] %s743_s7  ;;  %s766_s23 = int_to_ptr.vmem [resolvable:$true] %s765_s23 }
  0x8a   : > { %s5070_s21 = scalar_lea.vmem %s744_s7, 32  ;;  %p5078_p6 = scmp.lt.s32.totalorder %s744_s7, %s744_s7 }
  0x8b   : > { %p5071_p13 = scmp.ne.s32.totalorder %s744_s7, %s5070_s21  ;;  %p5079_p0 = scmp.lt.s32.totalorder %s5070_s21, %s5070_s21 }
  0x8d   : > { %4658 = dma.hbm_to_vmem [thread:$0]  (!%p6279_p12), %s6280_s27, 2048, %s719_s19, [#allocation6], %s5256_s24, %s5256_s24, %s5257_s4  }
  0x8e   : > { %p5073_p5 = pnand %p5071_p13, %p6278_p7  ;;  %p5080_p1 = por %p5079_p0, %p5078_p6 }
  0x90   : > { %p5074_p9 = pneg %p5073_p5 }
  0x92   : > { %p5081_p3 = pnand %p5080_p1, %p5074_p9 }
  0x94   : > { %5084 = shalt.err (!%p5081_p3)
}
  0x95   : > { %s6281_s24 = sld [smem:[#allocation36_spill]]  ;;  %s5096_s4 = scalar_lea.vmem %s766_s23, 16 }
  0x96   : > { %p5097_p4 = scmp.ne.s32.totalorder %s766_s23, %s5096_s4  ;;  %s5103_s22 = scalar_lea.vmem %s766_s23, 32 }
  0x97   : > { %p5104_p13 = scmp.lt.s32.totalorder %s766_s23, %s766_s23  ;;  %p5105_p5 = scmp.lt.s32.totalorder %s5103_s22, %s5096_s4 }
  0x98   : > { %p5099_p10 = pnand %p5097_p4, %p6278_p7 }
  0x99   : > { %p5106_p2 = por %p5105_p5, %p5104_p13 }
  0x9a   : > { %p5100_p11 = pneg %p5099_p10 }
  0x9b   : > { %4664 = dma.hbm_to_vmem [thread:$0]  (!%p6279_p12), %s6281_s24, 32, %s744_s7, [#allocation9]  }
  0x9c   : > { %p5107_p8 = pnand %p5106_p2, %p5100_p11 }
  0x9e   : > { %5110 = shalt.err (!%p5107_p8)
}
  0x9f   : > { %s6282_s27 = sld [smem:[#allocation38_spill]]  ;;  %s5111_s20 = scalar_lea.hbm %s5552_s26, 32 }
  0xa0   : > { %p5112_p9 = scmp.ne.s32.totalorder %s5552_s26, %s5111_s20  ;;  %p6283_p7 = scmp.ne.s32.totalorder %s6274_s3, 0 }
  0xa1   : > { %s5116_s30 = scalar_lea.hbm %s6276_s12, 64  ;;  %p5117_p2 = scmp.lt.s32.totalorder %s5552_s26, %s6276_s12 }
  0xa2   : > { %p5114_p6 = pnand %p5112_p9, %p6283_p7  ;;  %p5118_p8 = scmp.lt.s32.totalorder %s5116_s30, %s5111_s20 }
  0xa4   : > { %p5115_p0 = pneg %p5114_p6  ;;  %p5119_p1 = por %p5118_p8, %p5117_p2 }
  0xa5   : > { %4670 = dma.hbm_to_vmem [thread:$0]  (!%p6279_p12), %s6282_s27, 16, %s766_s23, [#allocation12]  }
  0xa6   : > { %p5120_p3 = pnand %p5119_p1, %p5115_p0 }
  0xa8   : > { %5123 = shalt.err (!%p5120_p3)
}
  0xa9   : > { %s5124_s11 = scalar_lea.vmem %s5556_s0, 32  ;;  %s5260_s23 = smov [#allocation16]  }
  0xaa   : > { %p5125_p12 = scmp.ne.s32.totalorder %s5556_s0, %s5124_s11  ;;  %s5129_s24 = sshll.u32 %s5260_s23, 4  ;;  %s5130_s24 = int_to_ptr.vmem [resolvable:$false] %s5129_s24 }
  0xab   : > { %s5131_s4 = scalar_lea.vmem %s5130_s24, 64  ;;  %p5132_p11 = scmp.lt.s32.totalorder %s5556_s0, %s5130_s24 }
  0xac   : > { %p5127_p4 = pnand %p5125_p12, %p6283_p7  ;;  %p5133_p13 = scmp.lt.s32.totalorder %s5131_s4, %s5124_s11 }
  0xae   : > { %p5128_p10 = pneg %p5127_p4  ;;  %p5134_p5 = por %p5133_p13, %p5132_p11 }
  0xb0   : > { %p5135_p9 = pnand %p5134_p5, %p5128_p10 }
  0xb2   : > { %5138 = shalt.err (!%p5135_p9)
}
  0xb3   : > { %p6284_p6 = scmp.ne.s32.totalorder %s6273_s5, 0  ;;  %s6285_s22 = smov 1  }
  0xb4   : > { %s6286_s21 = smov 16   ;;  %s3975_s1 = sshll.u32 %s5496_s6, 6 }
  0xb5   : > { %4677 = dma.hbm_to_vmem [thread:$0]  (!%p6284_p6), %s5552_s26, 32, %s5556_s0, %s5515_s25, %s6286_s21, %s6286_s21, %s6285_s22  }
  0xb6   : > { %s4245_s27 = sshll.u32 %s5247_s28, 10  ;;  %s6287_s13 = sld [smem:[#allocation45_spill]] }
  0xb7   : > { %s865_s30 = scalar_lea.vmem [#allocation17], %s3975_s1  ;;  %s862_s19 = scalar_lea.sflag [#allocation18], %s5496_s6 }
  0xb8   : > { %s872_s18 = sshll.u32 %s865_s30, 4  ;;  %s5610_s18 = int_to_ptr.vmem [resolvable:$true] %s872_s18 }
  0xbc   : > { %s5608_s7 = scalar_lea.hbm %s6287_s13, %s4245_s27  ;;  %s5144_s0 = scalar_lea.hbm %s6287_s13, 2048 }
  0xbd   : > { %s5139_s11 = scalar_lea.hbm %s5608_s7, 1024  ;;  %p5145_p1 = scmp.lt.s32.totalorder %s5608_s7, %s6287_s13 }
  0xbe   : > { %p5140_p0 = scmp.ne.s32.totalorder %s5608_s7, %s5139_s11  ;;  %p5146_p3 = scmp.lt.s32.totalorder %s5144_s0, %s5139_s11 }
  0xc0   : > { %p5142_p2 = pnand %p5140_p0, %p6283_p7  ;;  %p5147_p12 = por %p5146_p3, %p5145_p1 }
  0xc2   : > { %p5143_p8 = pneg %p5142_p2 }
  0xc4   : > { %p5148_p4 = pnand %p5147_p12, %p5143_p8 }
  0xc6   : > { %5151 = shalt.err (!%p5148_p4)
}
  0xc7   : > { %s5152_s24 = scalar_lea.vmem %s5610_s18, 1024  ;;  %s5261_s4 = smov [#allocation17]  }
  0xc8   : > { %p5153_p10 = scmp.ne.s32.totalorder %s5610_s18, %s5152_s24  ;;  %s5157_s22 = sshll.u32 %s5261_s4, 4  ;;  %s5158_s22 = int_to_ptr.vmem [resolvable:$false] %s5157_s22 }
  0xc9   : > { %s5159_s21 = scalar_lea.vmem %s5158_s22, 2048  ;;  %p5160_p5 = scmp.lt.s32.totalorder %s5610_s18, %s5158_s22 }
  0xca   : > { %p5155_p11 = pnand %p5153_p10, %p6283_p7  ;;  %p5161_p9 = scmp.lt.s32.totalorder %s5159_s21, %s5152_s24 }
  0xcc   : > { %p5156_p13 = pneg %p5155_p11  ;;  %p5162_p0 = por %p5161_p9, %p5160_p5 }
  0xce   : > { %p5163_p2 = pnand %p5162_p0, %p5156_p13 }
  0xd0   : > { %5166 = shalt.err (!%p5163_p2)
}
  0xd1   : > { %s5262_s1 = smov 64   ;;  %s5263_s27 = smov 4  }
  0xd2   : > { %4680 = dma.hbm_to_vmem [thread:$0]  (!%p6284_p6), %s5608_s7, 1024, %s5610_s18, %s862_s19, %s5262_s1, %s5262_s1, %s5263_s27  }
  0xd3   : > { %p6288_p7 = scmp.ne.s32.totalorder %s6262_s29, 0 }
  0xd5   : > { %943 = sbr.rel (%p6288_p7) target bundleno = 4024 (0xfb8), region = 124 }
  0xda   : > { %p6289_p8 = scmp.eq.s32.totalorder %s5435_s10, 0 }
  0xdc   : > { %5210 = dma.done.wait (%p6289_p8), [#allocation6], 2048   ;;  %p6290_p1 = pmov %p6289_p8 }
  0xde   : > { %5212 = vsyncadd (%p6290_p1), [#allocation6], 4294965248  ;;  %p6291_p3 = pmov %p6290_p1 }
  0xdf   : > { %p6292_p12 = pmov %p6290_p1 }
  0xe0   : > { %5214 = dma.done.wait (%p6291_p3), [#allocation9], 160  }
  0xe1   : > { %5216 = vsyncadd (%p6292_p12), [#allocation9], 4294967136  ;;  %p6293_p4 = pmov %p6290_p1 }
  0xe2   : > { %p6294_p6 = pmov %p6290_p1 }
  0xe3   : > { %5218 = dma.done.wait (%p6293_p4), [#allocation12], 32  }
  0xe4   : > { %5220 = vsyncadd (%p6294_p6), [#allocation12], 4294967264  ;;  %s965_s5 = sand.u32 1, %s5435_s10   ;;  %s967_s29 = sand.u32 1, %s5239_s9  }
  0xe5   : > { %s3984_s6 = sshll.u32 %s967_s29, 1  ;;  %s966_s3 = scalar_lea.sflag [#allocation15], %s965_s5 }
  0xe6   : > { %s5651_s20 = scalar_lea.vmem [#allocation14], %s3984_s6  ;;  %p6295_p10 = scmp.ne.s32.totalorder %s6270_s8, 0 }
  0xe8   : > { %5222 = dma.done.wait (%p6295_p10), %s966_s3, 64  }
  0xe9   : > { %5224 = vsyncadd (%p6295_p10), %s966_s3, 4294967232  ;;  %s3986_s2 = sshll.u32 %s967_s29, 6  ;;  %s5657_s7 = scalar_lea.vmem [#allocation16], %s3984_s6 }
  0xea   : > { %s984_s30 = scalar_lea.sflag [#allocation18], %s967_s29  ;;  %s5659_s18 = scalar_lea.vmem [#allocation17], %s3986_s2 }
  0xeb   : > { %5226 = dma.done.wait (%p6295_p10), %s984_s30, 1024  }
  0xec   : > { %5228 = vsyncadd (%p6295_p10), %s984_s30, 4294966272  ;;  %p1112_p11 = scmp.lt.s32.totalorder %s5435_s10, 1  ;;  %s6296_s0 = sld [smem:[#allocation39_spill]] }
  0xed   : > { %s6297_s4 = sld [smem:[#allocation40_spill]]  ;;  %p6310_p13 = scmp.ne.s32.totalorder %s5435_s10, 0 }
  0xee   : > { %s5667_s19 = scalar_select %p1112_p11, %s5435_s10, 1 }
  0xef   : > { %s6298_s27 = sld [smem:[#allocation41_spill]] }
  0xf0   : > { %s4246_s11 = sshll.u32 %s5667_s19, 7  ;;  %s3989_s25 = sshll.u32 %s5667_s19, 1 }
  0xf1   : > { %s6299_s3 = sld [smem:[#allocation43_spill]]  ;;  %s4249_s21 = sshll.u32 %s5667_s19, 8 }
  0xf2   : > { %s5674_s26 = scalar_lea.vmem %s6296_s0, %s4246_s11  ;;  %s6303_s17 = sld [smem:[#allocation49_spill]] }
  0xf3   : > { %s5679_s22 = scalar_lea.vmem %s6297_s4, %s3989_s25  ;;  %s6306_s8 = sld [smem:[#allocation51_spill]] }
  0xf4   : > { %s6307_s24 = sld [smem:[#allocation52_spill]] }
  0xf5   : > { %s5684_s5 = scalar_lea.vmem %s6298_s27, %s4246_s11  ;;  %s6308_s1 = sld [smem:[#allocation53_spill]] }
  0xf6   : > { %s6309_s14 = sld [smem:[#allocation54_spill]] }
  0xf7   : > { %s5689_s2 = scalar_lea.vmem %s6299_s3, %s4246_s11  ;;  %s3996_s11 = sshll.u32 %s5667_s19, 2 }
  0xf8   : > { %s5707_s13 = scalar_lea.vmem %s6303_s17, %s4249_s21  ;;  %s6305_s3 = sld [smem:[#allocation50_spill]] }
  0xf9   : > { %6304 = sst [smem:[#allocation31_spill]] %s5707_s13  ;;  %s5718_s0 = scalar_lea.vmem %s6306_s8, %s4249_s21 }
  0xfa   : > { %s1156_s4 = scalar_lea.vmem %s6307_s24, %s5667_s19  ;;  %1167 = sbr.rel (%p6310_p13) target bundleno = 594 (0x252), region = 160 }
  0xfb   : > { %s1159_s27 = scalar_lea.vmem %s6308_s1, %s5667_s19  ;;  %s4000_s29 = sld [smem:[#allocation4 + $0x1]] (!%p6310_p13) }
  0xfc   : > { %s1162_s13 = scalar_lea.vmem %s6309_s14, %s5667_s19  ;;  %s4001_s28 = sld [smem:[#allocation4 + $0x2]] (!%p6310_p13) }
  0xfd   : > { %s4002_s21 = sld [smem:[#allocation4 + $0x3]] (!%p6310_p13) }
  0xfe   : > { %s5713_s12 = scalar_lea.vmem %s6305_s3, %s3996_s11  ;;  %s1168_s11 = sld [smem:[#allocation4]] (!%p6310_p13) }
  0xff   : > { %s4003_s6 = sld [smem:[#allocation4 + $0x4]]  ;;  %v1234_v13 = vld [vmem:[#allocation8] sm:$0xff]  ;;  %v4015_v17 = vld [vmem:[#allocation10] ss:$0 sm:$0xff]  ;;  %v4016_v39 = vld [vmem:[#allocation11] ss:$0 sm:$0xff] }
 0x100   : > { %s4004_s3 = sld [smem:[#allocation4 + $0x5]]  ;;  %v4017_v41 = vld [vmem:[#allocation13] ss:$0 sm:$0xff] }
 0x101   : > { %s4005_s30 = sld [smem:[#allocation4 + $0x6]]  ;;  %s1173_s16 = scalar_lea.vmem [#allocation5], %s4000_s29 }
 0x102   : > { %s4006_s8 = sld [smem:[#allocation4 + $0x7]]  ;;  %v1174_v1 = vld [vmem:[%s1173_s16] sm:$0x1]  ;;  %s1177_s15 = scalar_lea.vmem [#allocation5], %s4001_s28 }
 0x103   : > { %s4007_s9 = sld [smem:[#allocation4 + $0x8]]  ;;  %1175 = vst [vmem:[#allocation2 + $0x1] sm:$0x1] %v1174_v1  ;;  %v1178_v2 = vld [vmem:[%s1177_s15] sm:$0x1]  ;;  %s1181_s17 = scalar_lea.vmem [#allocation5], %s4002_s21 }
 0x104   : > { %s1169_s23 = scalar_lea.vmem [#allocation5], %s1168_s11  ;;  %s4008_s14 = sld [smem:[#allocation4 + $0x9]]  ;;  %1179 = vst [vmem:[#allocation2 + $0x2] sm:$0x1] %v1178_v2  ;;  %v1182_v3 = vld [vmem:[%s1181_s17] sm:$0x1] }
 0x105   : > { %v1170_v0 = vld [vmem:[%s1169_s23] sm:$0x1]  ;;  %s4009_s25 = sld [smem:[#allocation4 + $0xa]]  ;;  %1183 = vst [vmem:[#allocation2 + $0x3] sm:$0x1] %v1182_v3  ;;  %s1185_s24 = scalar_lea.vmem [#allocation5], %s4003_s6 }
 0x106   : > { %1171 = vst [vmem:[#allocation2] sm:$0x1] %v1170_v0  ;;  %v1186_v4 = vld [vmem:[%s1185_s24] sm:$0x1]  ;;  %s4010_s1 = sld [smem:[#allocation4 + $0xb]]  ;;  %s1189_s11 = scalar_lea.vmem [#allocation5], %s4004_s3 }
 0x107   : > { %1187 = vst [vmem:[#allocation2 + $0x4] sm:$0x1] %v1186_v4  ;;  %v1190_v5 = vld [vmem:[%s1189_s11] sm:$0x1]  ;;  %s4011_s23 = sld [smem:[#allocation4 + $0xc]]  ;;  %s1193_s29 = scalar_lea.vmem [#allocation5], %s4005_s30 }
 0x108   : > { %1191 = vst [vmem:[#allocation2 + $0x5] sm:$0x1] %v1190_v5  ;;  %v1194_v6 = vld [vmem:[%s1193_s29] sm:$0x1]  ;;  %s4012_s16 = sld [smem:[#allocation4 + $0xd]]  ;;  %s1197_s28 = scalar_lea.vmem [#allocation5], %s4006_s8 }
 0x109   : > { %1195 = vst [vmem:[#allocation2 + $0x6] sm:$0x1] %v1194_v6  ;;  %v1198_v7 = vld [vmem:[%s1197_s28] sm:$0x1]  ;;  %s4013_s15 = sld [smem:[#allocation4 + $0xe]]  ;;  %s1201_s21 = scalar_lea.vmem [#allocation5], %s4007_s9 }
 0x10a   : > { %1199 = vst [vmem:[#allocation2 + $0x7] sm:$0x1] %v1198_v7  ;;  %v1202_v8 = vld [vmem:[%s1201_s21] sm:$0x1]  ;;  %s4014_s17 = sld [smem:[#allocation4 + $0xf]]  ;;  %s1205_s6 = scalar_lea.vmem [#allocation5], %s4008_s14 }
 0x10b   : > { %1203 = vst [vmem:[#allocation2 + $0x8] sm:$0x1] %v1202_v8  ;;  %v1206_v9 = vld [vmem:[%s1205_s6] sm:$0x1]  ;;  %s1209_s24 = scalar_lea.vmem [#allocation5], %s4009_s25 }
 0x10c   : > { %1207 = vst [vmem:[#allocation2 + $0x9] sm:$0x1] %v1206_v9  ;;  %v1210_v10 = vld [vmem:[%s1209_s24] sm:$0x1]  ;;  %s1213_s3 = scalar_lea.vmem [#allocation5], %s4010_s1 }
 0x10d   : > { %1211 = vst [vmem:[#allocation2 + $0xa] sm:$0x1] %v1210_v10  ;;  %v1214_v11 = vld [vmem:[%s1213_s3] sm:$0x1]  ;;  %s1217_s30 = scalar_lea.vmem [#allocation5], %s4011_s23 }
 0x10e   : > { %1215 = vst [vmem:[#allocation2 + $0xb] sm:$0x1] %v1214_v11  ;;  %v1218_v12 = vld [vmem:[%s1217_s30] sm:$0x1]  ;;  %s1221_s8 = scalar_lea.vmem [#allocation5], %s4012_s16 }
 0x10f   : > { %1219 = vst [vmem:[#allocation2 + $0xc] sm:$0x1] %v1218_v12  ;;  %v1222_v14 = vld [vmem:[%s1221_s8] sm:$0x1]  ;;  %s1225_s9 = scalar_lea.vmem [#allocation5], %s4013_s15 }
 0x110   : > { %1223 = vst [vmem:[#allocation2 + $0xd] sm:$0x1] %v1222_v14  ;;  %v1226_v15 = vld [vmem:[%s1225_s9] sm:$0x1]  ;;  %s1229_s14 = scalar_lea.vmem [#allocation5], %s4014_s17 }
 0x111   : > { %v1232_v16 = vld [vmem:[#allocation2] sm:$0xff]  ;;  %1227 = vst [vmem:[#allocation2 + $0xe] sm:$0x1] %v1226_v15 }
 0x112   : > { %v1230_v18 = vld [vmem:[%s1229_s14] sm:$0x1]  ;;  %v1235_v19 = vadd.f32 %v1234_v13, %v1232_v16 }
 0x113   : > { %1231 = vst [vmem:[#allocation2 + $0xf] sm:$0x1] %v1230_v18 }
 0x114   : > { %v1242_v20 = vadd.f32 %v4015_v17, %v1235_v19 }
 0x116   : > { %1246 = vadd.xlane.f32.xlu0 %v1242_v20 }
 0x11a   : > { %v1233_v21 = vld [vmem:[#allocation2 + $0x8] sm:$0xff] }
 0x11b   : > { %v1236_v22 = vadd.f32 %v1234_v13, %v1233_v21 }
 0x11d   : > { %v1243_v23 = vadd.f32 %v4015_v17, %v1236_v22 }
 0x11f   : > { %1248 = vadd.xlane.f32.xlu0 %v1243_v23 }
 0x19f   : > { %v1247_v24 = vpop.xlane.xlu0 %1246 }
 0x1a0   : > { %v1251_v25 = vmul.f32 0.0078125, %v1247_v24 }
 0x1a2   : > { %v1253_v26 = vsub.f32 %v1242_v20, %v1251_v25 }
 0x1a4   : > { %v1255_v27 = vmul.f32 %v1253_v26, %v1253_v26 }
 0x1a6   : > { %1257 = vadd.xlane.f32.xlu1 %v1255_v27 }
 0x1a8   : > { %v1249_v28 = vpop.xlane.xlu0 %1248 }
 0x1a9   : > { %v1252_v29 = vmul.f32 0.0078125, %v1249_v28 }
 0x1ab   : > { %v1254_v30 = vsub.f32 %v1243_v23, %v1252_v29 }
 0x1ad   : > { %v1256_v31 = vmul.f32 %v1254_v30, %v1254_v30 }
 0x1af   : > { %1259 = vadd.xlane.f32.xlu1 %v1256_v31 }
 0x22f   : > { %v1258_v32 = vpop.xlane.xlu1 %1257 }
 0x230   : > { %v1261_v33 = vmul.f32 0.0078125, %v1258_v32 }
 0x232   : > { %v1263_v34 = vadd.f32 1e-12, %v1261_v33 }
 0x234   : > { %4745 = vrsqrt.f32 %v1263_v34 }
 0x238   : > { %v1260_v35 = vpop.xlane.xlu1 %1259 }
 0x239   : > { %v1262_v36 = vmul.f32 0.0078125, %v1260_v35 }
 0x23b   : > { %v1264_v37 = vadd.f32 1e-12, %v1262_v36 }
 0x23d   : > { %4747 = vrsqrt.f32 %v1264_v37 }
 0x241   : > { %v4746_v38 = vpop.eup %4745 }
 0x242   : > { %v1267_v40 = vmul.f32 %v4746_v38, %v1253_v26 }
 0x244   : > { %v1275_v42 = vmul.f32 %v4016_v39, %v1267_v40 }
 0x246   : > { %v1283_v43 = vadd.f32 %v4017_v41, %v1275_v42 }
 0x248   : > { %1285 = vst [vmem:[#allocation2] sm:$0xff] %v1283_v43 }
 0x24a   : > { %v4748_v44 = vpop.eup %4747 }
 0x24b   : > { %v1268_v45 = vmul.f32 %v4748_v44, %v1254_v30 }
 0x24d   : > { %v1276_v46 = vmul.f32 %v4016_v39, %v1268_v45 }
 0x24f   : > { %v1284_v47 = vadd.f32 %v4017_v41, %v1276_v46 }
 0x251   : > { %1286 = vst [vmem:[#allocation2 + $0x8] sm:$0xff] %v1284_v47 }
 0x252 PF: > { %v4749_v48 = vld [vmem:[%s5684_s5 + $0x38] sm:$0xff]   ;;  %v5264_v49 = vmov 0.0   ;;  %v4751_v51 = vld [vmem:[%s5684_s5 + $0x30] sm:$0xff]   ;;  %vm5265_vm0 = vmmov 0   ;;  %v4753_v53 = vld [vmem:[%s5684_s5 + $0x28] sm:$0xff]   ;;  %vm1633_vm1 = vcmask 523264   ;;  %v1732_v34 = vlaneseq }
 0x253   : > { %4413 = vmatprep.subr.bf16.mxu1 %v5264_v49  ;;  %4393 = vmatprep.subr.bf16.mxu0 %v5264_v49  ;;  %v4750_v50 = vld [vmem:[%s5674_s26 + $0x38] sm:$0xff]   ;;  %v4752_v52 = vld [vmem:[%s5674_s26 + $0x30] sm:$0xff]   ;;  %v4754_v54 = vld [vmem:[%s5674_s26 + $0x28] sm:$0xff]   ;;  %v5266_v32 = vmov 1966171168   ;;  %s6311_s11 = sld [smem:[#allocation33_spill]] }
 0x254   : > { %4414 = vmatpush3.bf16.msra.mxu1 %v4749_v48  ;;  %4429 = vmatprep.mubr.msk.bf16.mxu1 %vm5265_vm0, %v5264_v49  ;;  %v4755_v55 = vld [vmem:[%s5684_s5 + $0x20] sm:$0xff]   ;;  %v4757_v57 = vld [vmem:[%s5684_s5 + $0x18] sm:$0xff]   ;;  %v4759_v59 = vld [vmem:[%s5684_s5 + $0x10] sm:$0xff]   ;;  %v1730_v33 = vunpack.c.l.s4 %v5266_v32  ;;  %v5814_v38 = vshrl.u32 %v1732_v34, 7  ;;  %vm1763_vm2 = vcmask 64512   ;;  %vm1793_vm3 = vcmask 1043456  }
 0x255   : > { %4394 = vmatpush3.bf16.msra.mxu0 %v4750_v50  ;;  %4415 = vmatprep.subr.bf16.mxu1 %v5264_v49  ;;  %v4756_v56 = vld [vmem:[%s5674_s26 + $0x20] sm:$0xff]   ;;  %v4758_v58 = vld [vmem:[%s5674_s26 + $0x18] sm:$0xff]   ;;  %v4760_v60 = vld [vmem:[%s5674_s26 + $0x10] sm:$0xff]   ;;  %s6315_s23 = sld [smem:[#allocation47_spill]]  ;;  %p4220_p5 = scmp.ne.s32.totalorder %s5435_s10, 1 }
 0x256   : > { %4395 = vmatprep.subr.bf16.mxu0 %v5264_v49  ;;  %4409 = vmatprep.mubr.msk.bf16.mxu0 %vm5265_vm0, %v5264_v49  ;;  %v4761_v61 = vld [vmem:[%s5684_s5 + $0x8] sm:$0xff]   ;;  %v4763_v63 = vld [vmem:[%s5684_s5] sm:$0xff]   ;;  %v4765_v24 = vld [vmem:[%s5689_s2 + $0x38] sm:$0xff]   ;;  %v1731_v37 = vunpack.c.0.s8 %v1730_v33  ;;  %v5818_v43 = vsub.s32 0, %v5814_v38  ;;  %s6317_s15 = sld [smem:[#allocation48_spill]] }
 0x257   : > { %v4762_v62 = vld [vmem:[%s5674_s26 + $0x8] sm:$0xff]   ;;  %v1290_v0 = vld [vmem:[#allocation2] sm:$0xff]  ;;  %v4766_v25 = vld [vmem:[%s5689_s2 + $0x30] sm:$0xff]  }
 0x258   : > { %4416 = vmatpush3.bf16.msra.mxu1 %v4751_v51  ;;  %v1291_v1 = vld [vmem:[#allocation2 + $0x8] sm:$0xff]  ;;  %v4764_v2 = vld [vmem:[%s5674_s26] sm:$0xff]   ;;  %v4769_v28 = vld [vmem:[%s5689_s2 + $0x18] sm:$0xff]   ;;  %v1734_v40 = vsub.s32 %v1731_v37, %v5814_v38 }
 0x259   : > { %4396 = vmatpush3.bf16.msra.mxu0 %v4752_v52  ;;  %4417 = vmatprep.subr.bf16.mxu1 %v5264_v49  ;;  %v5770_v3 = vpack.c.bf16 %v1291_v1, %v1290_v0  ;;  %v4028_v4 = vld [vmem:[%s5651_s20] ss:$0 sm:$0xff]  ;;  %v4767_v26 = vld [vmem:[%s5689_s2 + $0x28] sm:$0xff]   ;;  %v4770_v29 = vld [vmem:[%s5689_s2 + $0x10] sm:$0xff]  }
 0x25a   : > { %4397 = vmatprep.subr.bf16.mxu0 %v5264_v49  ;;  %v4019_v8 = vld [vmem:[%s5679_s22] ss:$0 sm:$0xff]  ;;  %v4771_v30 = vld [vmem:[%s5689_s2 + $0x8] sm:$0xff]  }
 0x25b   : > { %v4768_v27 = vld [vmem:[%s5689_s2 + $0x20] sm:$0xff]   ;;  %s6316_s29 = scalar_lea.vmem %s6315_s23, %s5667_s19 }
 0x25c   : > { %4418 = vmatpush3.bf16.msra.mxu1 %v4753_v53  ;;  %v4772_v31 = vld [vmem:[%s5689_s2] sm:$0xff]   ;;  %s6318_s21 = scalar_lea.vmem %s6317_s15, %s5667_s19 }
 0x25d   : > { %4398 = vmatpush3.bf16.msra.mxu0 %v4754_v54  ;;  %4419 = vmatprep.subr.bf16.mxu1 %v5264_v49  ;;  %v1287_v35 = vld [vmem:[%s6311_s11] sm:$0x3]  ;;  %s6324_s11 = sld [smem:[#allocation56_spill]] (!%p4220_p5) }
 0x25e   : > { %4399 = vmatprep.subr.bf16.mxu0 %v5264_v49  ;;  %v4018_v36 = vadd.f32 -1.0, %v1287_v35 }
 0x260   : > { %4420 = vmatpush3.bf16.msra.mxu1 %v4755_v55  ;;  %v1289_v39 = vmul.f32 1e+09, %v4018_v36  ;;  %v4773_v36 = vld [vmem:[%s5684_s5 + $0x78] sm:$0xff]  }
 0x261   : > { %4400 = vmatpush3.bf16.msra.mxu0 %v4756_v56  ;;  %4421 = vmatprep.subr.bf16.mxu1 %v5264_v49 }
 0x262   : > { %4401 = vmatprep.subr.bf16.mxu0 %v5264_v49  ;;  %v1735_v41 = vrot.slane %v1289_v39, %v1734_v40  ;;  %v4775_v39 = vld [vmem:[%s5684_s5 + $0x70] sm:$0xff]  }
 0x264   : > { %4422 = vmatpush3.bf16.msra.mxu1 %v4757_v57  ;;  %v1743_v42 = vrot.slane %v1735_v41, %v1734_v40  ;;  %v1736_v45 = vcombine.high %v1735_v41, %v1735_v41  ;;  %v4779_v41 = vld [vmem:[%s5684_s5 + $0x60] sm:$0xff]  }
 0x265   : > { %4402 = vmatpush3.bf16.msra.mxu0 %v4758_v58  ;;  %4423 = vmatprep.subr.bf16.mxu1 %v5264_v49 }
 0x266   : > { %4403 = vmatprep.subr.bf16.mxu0 %v5264_v49  ;;  %v5821_v44 = vrot.slane %v1743_v42, %v5818_v43  ;;  %v1750_v51 = vrot.slane %v1736_v45, %v1734_v40  ;;  %v4777_v40 = vld [vmem:[%s5684_s5 + $0x68] sm:$0xff]   ;;  %v4781_v42 = vld [vmem:[%s5684_s5 + $0x58] sm:$0xff]   ;;  %v4783_v45 = vld [vmem:[%s5684_s5 + $0x50] sm:$0xff]  }
 0x268   : > { %4424 = vmatpush3.bf16.msra.mxu1 %v4759_v59  ;;  %v5826_v55 = vrot.slane %v1750_v51, %v5818_v43 }
 0x269   : > { %4404 = vmatpush3.bf16.msra.mxu0 %v4760_v60  ;;  %4425 = vmatprep.subr.bf16.mxu1 %v5264_v49 }
 0x26a   : > { %4405 = vmatprep.subr.bf16.mxu0 %v5264_v49 }
 0x26c   : > { %4426 = vmatpush3.bf16.msra.mxu1 %v4761_v61 }
 0x26d   : > { %4406 = vmatpush3.bf16.msra.mxu0 %v4762_v62  ;;  %4427 = vmatprep.subr.bf16.mxu1 %v5264_v49 }
 0x26e   : > { %4407 = vmatprep.subr.bf16.mxu0 %v5264_v49 }
 0x270   : > { %4428 = vmatpush3.bf16.msra.mxu1 %v4763_v63  ;;  %v4037_v63 = vld [vmem:[%s5657_s7] ss:$0 sm:$0xff] }
 0x271   : > { %4408 = vmatpush3.bf16.msra.mxu0 %v4764_v2  ;;  %4453 = vmatprep.subr.bf16.mxu1 %v5264_v49 }
 0x272   : > { %4433 = vmatprep.subr.bf16.mxu0 %v5264_v49 }
 0x273   : > { %4430 = vmatmul.mubr.bf16.vlgmr.msra.gmra.mxu1 %v5770_v3 }
 0x274   : > { %4410 = vmatmul.mubr.bf16.vlgmr.msra.gmra.mxu0 %v5770_v3  ;;  %4455 = vmatprep.mubr.msk.bf16.mxu1 %vm5265_vm0, %v5264_v49 }
 0x275   : > { %4449 = vmatprep.mubr.msk.bf16.mxu0 %vm5265_vm0, %v5264_v49  ;;  %4434 = vmatpush3.bf16.msra.mxu0 %v4765_v24  ;;  %v4784_v24 = vld [vmem:[%s5674_s26 + $0x50] sm:$0xff]  }
 0x276   : > { %4435 = vmatprep.subr.bf16.mxu0 %v5264_v49 }
 0x279   : > { %4436 = vmatpush3.bf16.msra.mxu0 %v4766_v25  ;;  %v4786_v25 = vld [vmem:[%s5674_s26 + $0x48] sm:$0xff]  }
 0x27a   : > { %4437 = vmatprep.subr.bf16.mxu0 %v5264_v49 }
 0x27d   : > { %4438 = vmatpush3.bf16.msra.mxu0 %v4767_v26  ;;  %v4788_v26 = vld [vmem:[%s5674_s26 + $0x40] sm:$0xff]  }
 0x27e   : > { %4439 = vmatprep.subr.bf16.mxu0 %v5264_v49 }
 0x281   : > { %4440 = vmatpush3.bf16.msra.mxu0 %v4768_v27 }
 0x282   : > { %4441 = vmatprep.subr.bf16.mxu0 %v5264_v49 }
 0x285   : > { %4442 = vmatpush3.bf16.msra.mxu0 %v4769_v28 }
 0x286   : > { %4443 = vmatprep.subr.bf16.mxu0 %v5264_v49 }
 0x289   : > { %4444 = vmatpush3.bf16.msra.mxu0 %v4770_v29 }
 0x28a   : > { %4445 = vmatprep.subr.bf16.mxu0 %v5264_v49 }
 0x28d   : > { %4446 = vmatpush3.bf16.msra.mxu0 %v4771_v30 }
 0x28e   : > { %4447 = vmatprep.subr.bf16.mxu0 %v5264_v49 }
 0x291   : > { %4448 = vmatpush3.bf16.msra.mxu0 %v4772_v31 }
 0x292   : > { %4477 = vmatprep.subr.bf16.mxu0 %v5264_v49 }
 0x294   : > { %4450 = vmatmul.mubr.bf16.vlgmr.msra.gmra.mxu0 %v5770_v3 }
 0x295   : > { %4493 = vmatprep.mubr.msk.bf16.mxu0 %vm5265_vm0, %v5264_v49 }
 0x333   : > { %v1510_v5 = vpop.f32.mrf.mxu1 }
 0x334   : > { %v1511_v6 = vadd.f32 %v4028_v4, %v1510_v5  ;;  %v1398_v7 = vpop.f32.mrf.mxu0 }
 0x335   : > { %v4431_v9 = vpop.f32.mrf.mxu1  ;;  %v1399_v14 = vadd.f32 %v4019_v8, %v1398_v7 }
 0x336   : > { %v1631_v10 = vpack.c.bf16 %v1511_v6, %v1511_v6  ;;  %v4411_v11 = vpop.f32.mrf.mxu0 }
 0x337   : > { %v1513_v12 = vpop.f32.mrf.mxu1  ;;  %v1629_v19 = vpack.c.bf16 %v1399_v14, %v1399_v14 }
 0x338   : > { %v1638_v13 = vsel %vm1633_vm1, %v1631_v10, 0  ;;  %v1514_v15 = vadd.f32 %v4028_v4, %v1513_v12  ;;  %v1401_v16 = vpop.f32.mrf.mxu0 }
 0x339   : > { %v4432_v17 = vpop.f32.mrf.mxu1  ;;  %4454 = vmatpush3.bf16.xpose.msra.mxu1 %v1638_v13  ;;  %v1402_v22 = vadd.f32 %v4019_v8, %v1401_v16 }
 0x33a   : > { %v4412_v18 = vpop.f32.mrf.mxu0  ;;  %4459 = vmatprep.subr.bf16.mxu1 %v5264_v49  ;;  %v1632_v20 = vpack.c.bf16 %v1514_v15, %v1514_v15 }
 0x33b   : > { %v1630_v23 = vpack.c.bf16 %v1402_v22, %v1402_v22  ;;  %v4780_v22 = vld [vmem:[%s5674_s26 + $0x60] sm:$0xff]  }
 0x33c   : > { %v1684_v21 = vsel %vm1633_vm1, %v1632_v20, 0  ;;  %v4776_v20 = vld [vmem:[%s5674_s26 + $0x70] sm:$0xff]  }
 0x340   : > { %4456 = vmatmul.mubr.msk.bf16.vlgmr.msra.gmra.mxu1 %vm1633_vm1, %v1629_v19  ;;  %v4774_v19 = vld [vmem:[%s5674_s26 + $0x78] sm:$0xff]  }
 0x341   : > { %4460 = vmatpush3.bf16.xpose.msra.mxu1 %v1684_v21  ;;  %4461 = vmatprep.mubr.msk.bf16.mxu1 %vm5265_vm0, %v5264_v49  ;;  %v4778_v21 = vld [vmem:[%s5674_s26 + $0x68] sm:$0xff]  }
 0x342   : > { %4465 = vmatprep.subr.bf16.mxu1 %v5264_v49  ;;  %4478 = vmatpush3.bf16.msra.mxu0 %v4774_v19  ;;  %v4792_v19 = vld [vmem:[%s5689_s2 + $0x60] sm:$0xff]  }
 0x343   : > { %4479 = vmatprep.subr.bf16.mxu0 %v5264_v49 }
 0x346   : > { %4480 = vmatpush3.bf16.msra.mxu0 %v4776_v20  ;;  %v4793_v20 = vld [vmem:[%s5689_s2 + $0x58] sm:$0xff]  }
 0x347   : > { %4481 = vmatprep.subr.bf16.mxu0 %v5264_v49 }
 0x348   : > { %4462 = vmatmul.mubr.msk.bf16.vlgmr.msra.gmra.mxu1 %vm1633_vm1, %v1630_v23  ;;  %v4782_v23 = vld [vmem:[%s5674_s26 + $0x58] sm:$0xff]   ;;  %s6313_s26 = sld [smem:[#allocation46_spill]] }
 0x349   : > { %4467 = vmatprep.mubr.msk.bf16.mxu1 %vm5265_vm0, %v5264_v49 }
 0x34a   : > { %4482 = vmatpush3.bf16.msra.mxu0 %v4778_v21  ;;  %v4794_v21 = vld [vmem:[%s5689_s2 + $0x50] sm:$0xff]  }
 0x34b   : > { %4483 = vmatprep.subr.bf16.mxu0 %v5264_v49 }
 0x34e   : > { %4484 = vmatpush3.bf16.msra.mxu0 %v4780_v22  ;;  %v4795_v22 = vld [vmem:[%s5689_s2 + $0x48] sm:$0xff]  }
 0x34f   : > { %4485 = vmatprep.subr.bf16.mxu0 %v5264_v49 }
 0x352   : > { %4486 = vmatpush3.bf16.msra.mxu0 %v4782_v23  ;;  %v4796_v23 = vld [vmem:[%s5689_s2 + $0x40] sm:$0xff]  }
 0x353   : > { %4487 = vmatprep.subr.bf16.mxu0 %v5264_v49 }
 0x354   : > { %v1622_v0 = vpop.f32.mrf.mxu0 }
 0x355   : > { %v1623_v1 = vadd.f32 %v4037_v63, %v1622_v0 }
 0x356   : > { %v4451_v2 = vpop.f32.mrf.mxu0  ;;  %4488 = vmatpush3.bf16.msra.mxu0 %v4784_v24 }
 0x357   : > { %v1788_v4 = vpack.c.bf16 %v1623_v1, %v1623_v1  ;;  %4489 = vmatprep.subr.bf16.mxu0 %v5264_v49 }
 0x358   : > { %v1625_v16 = vpop.f32.mrf.mxu0 }
 0x359   : > { %v1795_v5 = vsel %vm1793_vm3, %v1788_v4, 0  ;;  %v1626_v17 = vadd.f32 %v4037_v63, %v1625_v16  ;;  %v4093_v63 = vld [vmem:[%s5651_s20 + $0x1] ss:$0 sm:$0xff]  ;;  %s6312_s20 = sld [smem:[#allocation31_spill]] }
 0x35a   : > { %4466 = vmatpush3.bf16.msra.mxu1 %v1795_v5  ;;  %v4452_v18 = vpop.f32.mrf.mxu0  ;;  %4490 = vmatpush3.bf16.msra.mxu0 %v4786_v25  ;;  %v4067_v4 = vld [vmem:[%s5679_s22 + $0x1] ss:$0 sm:$0xff]  ;;  %v4789_v16 = vld [vmem:[%s5689_s2 + $0x78] sm:$0xff]   ;;  %s6314_s22 = scalar_lea.vmem %s6313_s26, %s5667_s19  ;;  %s6325_s26 = sld [smem:[#allocation58_spill]] (!%p4220_p5) }
 0x35b   : > { %4471 = vmatprep.subr.bf16.mxu1 %v5264_v49  ;;  %4491 = vmatprep.subr.bf16.mxu0 %v5264_v49  ;;  %v1789_v30 = vpack.c.bf16 %v1626_v17, %v1626_v17  ;;  %v4790_v17 = vld [vmem:[%s5689_s2 + $0x70] sm:$0xff]   ;;  %v4791_v18 = vld [vmem:[%s5689_s2 + $0x68] sm:$0xff]  }
 0x35d   : > { %v1841_v33 = vsel %vm1793_vm3, %v1789_v30, 0 }
 0x35e   : > { %4492 = vmatpush3.bf16.msra.mxu0 %v4788_v26 }
 0x35f   : > { %4517 = vmatprep.subr.bf16.mxu0 %v5264_v49 }
 0x361   : > { %4494 = vmatmul.mubr.bf16.vlgmr.msra.gmra.mxu0 %v5770_v3 }
 0x362   : > { %4533 = vmatprep.mubr.msk.bf16.mxu0 %vm5265_vm0, %v5264_v49  ;;  %4518 = vmatpush3.bf16.msra.mxu0 %v4789_v16  ;;  %v4804_v16 = vld [vmem:[%s5659_s18 + $0x20] sm:$0xff]  }
 0x363   : > { %4519 = vmatprep.subr.bf16.mxu0 %v5264_v49 }
 0x366   : > { %4520 = vmatpush3.bf16.msra.mxu0 %v4790_v17 }
 0x367   : > { %4521 = vmatprep.subr.bf16.mxu0 %v5264_v49 }
 0x36a   : > { %4522 = vmatpush3.bf16.msra.mxu0 %v4791_v18 }
 0x36b   : > { %4523 = vmatprep.subr.bf16.mxu0 %v5264_v49 }
 0x36e   : > { %4524 = vmatpush3.bf16.msra.mxu0 %v4792_v19 }
 0x36f   : > { %4525 = vmatprep.subr.bf16.mxu0 %v5264_v49 }
 0x372   : > { %4526 = vmatpush3.bf16.msra.mxu0 %v4793_v20 }
 0x373   : > { %4527 = vmatprep.subr.bf16.mxu0 %v5264_v49 }
 0x376   : > { %4528 = vmatpush3.bf16.msra.mxu0 %v4794_v21 }
 0x377   : > { %4529 = vmatprep.subr.bf16.mxu0 %v5264_v49 }
 0x37a   : > { %4530 = vmatpush3.bf16.msra.mxu0 %v4795_v22 }
 0x37b   : > { %4531 = vmatprep.subr.bf16.mxu0 %v5264_v49 }
 0x37e   : > { %4532 = vmatpush3.bf16.msra.mxu0 %v4796_v23 }
 0x37f   : > { %4561 = vmatprep.subr.bf16.mxu0 %v5264_v49 }
 0x381   : > { %4534 = vmatmul.mubr.bf16.vlgmr.msra.gmra.mxu0 %v5770_v3 }
 0x382   : > { %4569 = vmatprep.mubr.msk.bf16.mxu0 %vm5265_vm0, %v5264_v49 }
 0x400   : > { %v1674_v46 = vpop.f32.mrf.mxu1 }
 0x401   : > { %v1726_v47 = vmul.f32 0.125, %v1674_v46  ;;  %v4785_v46 = vld [vmem:[%s5684_s5 + $0x48] sm:$0xff]  }
 0x402   : > { %v4457_v48 = vpop.f32.mrf.mxu1 }
 0x403   : > { %v1761_v50 = vadd.f32 %v5821_v44, %v1726_v47  ;;  %v4787_v47 = vld [vmem:[%s5684_s5 + $0x40] sm:$0xff]  }
 0x404   : > { %v1677_v52 = vpop.f32.mrf.mxu1 }
 0x405   : > { %v1764_v53 = vsel %vm1763_vm2, %v1761_v50, -inf }
 0x406   : > { %v4458_v54 = vpop.f32.mrf.mxu1  ;;  %1765 = vmax.xlane.f32.xlu0 %v1764_v53 }
 0x408   : > { %v1720_v56 = vpop.f32.mrf.mxu1 }
 0x409   : > { %v1727_v57 = vmul.f32 0.125, %v1720_v56 }
 0x40a   : > { %v4463_v58 = vpop.f32.mrf.mxu1 }
 0x40b   : > { %v1762_v59 = vadd.f32 %v5826_v55, %v1727_v57 }
 0x40c   : > { %v1723_v60 = vpop.f32.mrf.mxu1 }
 0x40d   : > { %v1767_v61 = vsel %vm1763_vm2, %v1762_v59, -inf }
 0x40e   : > { %v4464_v62 = vpop.f32.mrf.mxu1  ;;  %1768 = vmax.xlane.f32.xlu0 %v1767_v61 }
 0x421   : > { %v1999_v48 = vpop.f32.mrf.mxu0 }
 0x48f   : > { %v1766_v6 = vpop.xlane.xlu0 %1765 }
 0x490   : > { %v1770_v7 = vsub.f32 %v1761_v50, %v1766_v6  ;;  %v4495_v50 = vpop.f32.mrf.mxu0 }
 0x492   : > { %v1772_v8 = vmul.f32 1.442695, %v1770_v7  ;;  %v2002_v51 = vpop.f32.mrf.mxu0 }
 0x494   : > { %4885 = vpow2.f32 %v1772_v8  ;;  %v4496_v52 = vpop.f32.mrf.mxu0  ;;  %v2000_v8 = vadd.f32 %v4067_v4, %v1999_v48 }
 0x497   : > { %v1769_v9 = vpop.xlane.xlu0 %1768 }
 0x498   : > { %v1771_v10 = vsub.f32 %v1762_v59, %v1769_v9 }
 0x49a   : > { %v1774_v11 = vmul.f32 1.442695, %v1771_v10 }
 0x49c   : > { %4887 = vpow2.f32 %v1774_v11  ;;  %v2234_v11 = vpack.c.bf16 %v2000_v8, %v2000_v8 }
 0x4a1   : > { %v4886_v12 = vpop.eup %4885 }
 0x4a2   : > { %v1776_v13 = vsel %vm1763_vm2, %v4886_v12, 0.0 }
 0x4a3   : > { %1777 = vadd.xlane.f32.xlu1 %v1776_v13 }
 0x4a9   : > { %v4888_v14 = vpop.eup %4887 }
 0x4aa   : > { %v1779_v15 = vsel %vm1763_vm2, %v4888_v14, 0.0 }
 0x4ab   : > { %1780 = vadd.xlane.f32.xlu1 %v1779_v15 }
 0x52c   : > { %v1778_v27 = vpop.xlane.xlu1 %1777 }
 0x52d   : > { %4889 = vrcp.f32 %v1778_v27 }
 0x534   : > { %v1781_v28 = vpop.xlane.xlu1 %1780 }
 0x535   : > { %4891 = vrcp.f32 %v1781_v28 }
 0x53a   : > { %v4890_v29 = vpop.eup %4889 }
 0x53b   : > { %v1784_v31 = vmul.f32 %v4890_v29, %v4886_v12 }
 0x53d   : > { %v1786_v32 = vpack.c.bf16 %v1784_v31, %v1784_v31 }
 0x53f   : > { %4468 = vmatmul.mubr.msk.bf16.vlgmr.msra.gmra.mxu1 %vm1763_vm2, %v1786_v32 }
 0x540   : > { %4472 = vmatpush3.bf16.msra.mxu1 %v1841_v33  ;;  %4473 = vmatprep.mubr.msk.bf16.mxu1 %vm5265_vm0, %v5264_v49 }
 0x541   : > { %4497 = vmatprep.subr.bf16.mxu1 %v5264_v49 }
 0x542   : > { %v4892_v34 = vpop.eup %4891 }
 0x543   : > { %v1785_v35 = vmul.f32 %v4892_v34, %v4888_v14  ;;  %v2003_v14 = vadd.f32 %v4067_v4, %v2002_v51 }
 0x545   : > { %v1787_v37 = vpack.c.bf16 %v1785_v35, %v1785_v35  ;;  %v2235_v15 = vpack.c.bf16 %v2003_v14, %v2003_v14  ;;  %v4802_v14 = vld [vmem:[%s5659_s18 + $0x30] sm:$0xff]  }
 0x547   : > { %4474 = vmatmul.mubr.msk.bf16.vlgmr.msra.gmra.mxu1 %vm1763_vm2, %v1787_v37  ;;  %v4119_v37 = vld [vmem:[%s5657_s7 + $0x1] ss:$0 sm:$0xff]  ;;  %s6323_s7 = sld [smem:[#allocation57_spill]] (!%p4220_p5) }
 0x548   : > { %4498 = vmatpush3.bf16.msra.mxu1 %v4773_v36  ;;  %4513 = vmatprep.mubr.msk.bf16.mxu1 %vm5265_vm0, %v5264_v49 }
 0x549   : > { %4499 = vmatprep.subr.bf16.mxu1 %v5264_v49 }
 0x54c   : > { %4500 = vmatpush3.bf16.msra.mxu1 %v4775_v39  ;;  %v2227_v39 = vpop.f32.mrf.mxu0 }
 0x54d   : > { %4501 = vmatprep.subr.bf16.mxu1 %v5264_v49 }
 0x550   : > { %4502 = vmatpush3.bf16.msra.mxu1 %v4777_v40  ;;  %v2228_v40 = vadd.f32 %v4119_v37, %v2227_v39  ;;  %v4805_v39 = vld [vmem:[%s6312_s20 + $0xe0] ss:$16 sps:$4 sm:$0xff]  }
 0x551   : > { %4503 = vmatprep.subr.bf16.mxu1 %v5264_v49 }
 0x554   : > { %4504 = vmatpush3.bf16.msra.mxu1 %v4779_v41  ;;  %v4535_v41 = vpop.f32.mrf.mxu0 }
 0x555   : > { %4505 = vmatprep.subr.bf16.mxu1 %v5264_v49  ;;  %v4808_v41 = vld [vmem:[%s6312_s20 + $0xe8] ss:$16 sps:$4 sm:$0xff]  }
 0x558   : > { %4506 = vmatpush3.bf16.msra.mxu1 %v4781_v42 }
 0x559   : > { %4507 = vmatprep.subr.bf16.mxu1 %v5264_v49 }
 0x55c   : > { %4508 = vmatpush3.bf16.msra.mxu1 %v4783_v45 }
 0x55d   : > { %4509 = vmatprep.subr.bf16.mxu1 %v5264_v49 }
 0x560   : > { %4510 = vmatpush3.bf16.msra.mxu1 %v4785_v46 }
 0x561   : > { %4511 = vmatprep.subr.bf16.mxu1 %v5264_v49 }
 0x564   : > { %4512 = vmatpush3.bf16.msra.mxu1 %v4787_v47 }
 0x565   : > { %4537 = vmatprep.subr.bf16.mxu1 %v5264_v49 }
 0x567   : > { %4514 = vmatmul.mubr.bf16.vlgmr.msra.gmra.mxu1 %v5770_v3 }
 0x568   : > { %4539 = vmatprep.mubr.msk.bf16.mxu1 %vm5265_vm0, %v5264_v49 }
 0x5ff   : > { %v5881_v53 = vpop.f32.mrf.mxu1 }
 0x601   : > { %v4469_v54 = vpop.f32.mrf.mxu1 }
 0x603   : > { %v1834_v56 = vpop.f32.mrf.mxu1 }
 0x605   : > { %v4470_v57 = vpop.f32.mrf.mxu1 }
 0x606   : > { %v2230_v57 = vpop.f32.mrf.mxu0 }
 0x607   : > { %v5883_v58 = vpop.f32.mrf.mxu1 }
 0x608   : > { %v1883_v59 = vpack.c.bf16 %v5883_v58, %v5881_v53 }
 0x609   : > { %v4475_v60 = vpop.f32.mrf.mxu1 }
 0x60a   : > { %v2231_v60 = vadd.f32 %v4119_v37, %v2230_v57  ;;  %v4814_v57 = vld [vmem:[%s6312_s20 + $0xc8] ss:$16 sps:$4 sm:$0xff]  }
 0x60b   : > { %v1880_v61 = vpop.f32.mrf.mxu1 }
 0x60c   : > { %v4536_v61 = vpop.f32.mrf.mxu0 }
 0x60d   : > { %v4476_v62 = vpop.f32.mrf.mxu1  ;;  %v4822_v61 = vld [vmem:[%s6312_s20 + $0xac] ss:$16 sps:$4 sm:$0xff]  }
 0x60e   : > { %v4801_v62 = vld [vmem:[%s5659_s18 + $0x38] sm:$0xff]  }
 0x60f   : > { %4562 = vmatpush3.bf16.msra.mxu0 %v4801_v62  ;;  %v4817_v62 = vld [vmem:[%s6312_s20 + $0xa0] ss:$16 sps:$4 sm:$0xff]  }
 0x610   : > { %4563 = vmatprep.subr.bf16.mxu0 %v5264_v49 }
 0x613   : > { %4564 = vmatpush3.bf16.msra.mxu0 %v4802_v14  ;;  %v4843_v14 = vld [vmem:[%s6312_s20 + $0x24] ss:$16 sps:$4 sm:$0xff]  }
 0x614   : > { %4565 = vmatprep.subr.bf16.mxu0 %v5264_v49 }
 0x627   : > { %v2113_v0 = vpop.f32.mrf.mxu1 }
 0x628   : > { %v2114_v1 = vadd.f32 %v4093_v63, %v2113_v0 }
 0x629   : > { %v4515_v2 = vpop.f32.mrf.mxu1 }
 0x62a   : > { %v2236_v5 = vpack.c.bf16 %v2114_v1, %v2114_v1  ;;  %v2359_v2 = vpack.c.bf16 %v2231_v60, %v2231_v60  ;;  %v4819_v60 = vld [vmem:[%s6312_s20 + $0xa4] ss:$16 sps:$4 sm:$0xff]  }
 0x62b   : > { %v2116_v6 = vpop.f32.mrf.mxu1 }
 0x62c   : > { %v2242_v7 = vsel %vm1633_vm1, %v2236_v5, 0  ;;  %v2117_v9 = vadd.f32 %v4093_v63, %v2116_v6  ;;  %v2410_v6 = vsel %vm1793_vm3, %v2359_v2, 0  ;;  %v4826_v2 = vld [vmem:[%s6312_s20 + $0x88] ss:$16 sps:$4 sm:$0xff]  }
 0x62d   : > { %v4516_v10 = vpop.f32.mrf.mxu1  ;;  %4538 = vmatpush3.bf16.xpose.msra.mxu1 %v2242_v7 }
 0x62e   : > { %4543 = vmatprep.subr.bf16.mxu1 %v5264_v49  ;;  %v2237_v12 = vpack.c.bf16 %v2117_v9, %v2117_v9  ;;  %v4797_v9 = vld [vmem:[%s5659_s18 + $0x18] sm:$0xff]  }
 0x630   : > { %v2288_v13 = vsel %vm1633_vm1, %v2237_v12, 0  ;;  %v4799_v12 = vld [vmem:[%s5659_s18 + $0x8] sm:$0xff]  }
 0x634   : > { %4540 = vmatmul.mubr.msk.bf16.vlgmr.msra.gmra.mxu1 %vm1633_vm1, %v2234_v11  ;;  %v4798_v11 = vld [vmem:[%s5659_s18 + $0x10] sm:$0xff]  }
 0x635   : > { %4544 = vmatpush3.bf16.xpose.msra.mxu1 %v2288_v13  ;;  %4545 = vmatprep.mubr.msk.bf16.mxu1 %vm5265_vm0, %v5264_v49  ;;  %v4800_v13 = vld [vmem:[%s5659_s18] sm:$0xff]  }
 0x636   : > { %4549 = vmatprep.subr.bf16.mxu1 %v5264_v49 }
 0x63c   : > { %4546 = vmatmul.mubr.msk.bf16.vlgmr.msra.gmra.mxu1 %vm1633_vm1, %v2235_v15  ;;  %v4803_v15 = vld [vmem:[%s5659_s18 + $0x28] sm:$0xff]  }
 0x63d   : > { %4551 = vmatprep.mubr.msk.bf16.mxu1 %vm5265_vm0, %v5264_v49  ;;  %4566 = vmatpush3.bf16.msra.mxu0 %v4803_v15  ;;  %v4846_v15 = vld [vmem:[%s6312_s20 + $0x2c] ss:$16 sps:$4 sm:$0xff]  }
 0x63e   : > { %4567 = vmatprep.subr.bf16.mxu0 %v5264_v49 }
 0x641   : > { %4568 = vmatpush3.bf16.msra.mxu0 %v4804_v16  ;;  %v4841_v16 = vld [vmem:[%s6312_s20 + $0x20] ss:$16 sps:$4 sm:$0xff]  }
 0x6f4   : > { %v2278_v24 = vpop.f32.mrf.mxu1 }
 0x6f5   : > { %v2330_v25 = vmul.f32 0.125, %v2278_v24 }
 0x6f6   : > { %v4541_v26 = vpop.f32.mrf.mxu1 }
 0x6f7   : > { %v2332_v27 = vadd.f32 %v2330_v25, %v5821_v44  ;;  %v2358_v44 = vpack.c.bf16 %v2228_v40, %v2228_v40  ;;  %v4807_v40 = vld [vmem:[%s6312_s20 + $0xe4] ss:$16 sps:$4 sm:$0xff]  }
 0x6f8   : > { %v2281_v28 = vpop.f32.mrf.mxu1  ;;  %2865 = vmatprep.subr.bf16.mxu0 %v4807_v40  ;;  %v4858_v40 = vld [vmem:[%s5718_s0 + $0xf0] sm:$0xff]  }
 0x6f9   : > { %v2334_v29 = vsel %vm1763_vm2, %v2332_v27, -inf  ;;  %v2364_v42 = vsel %vm1793_vm3, %v2358_v44, 0  ;;  %v4810_v44 = vld [vmem:[%s6312_s20 + $0xec] ss:$16 sps:$4 sm:$0xff]  }
 0x6fa   : > { %2335 = vmax.xlane.f32.xlu0 %v2334_v29  ;;  %v4542_v30 = vpop.f32.mrf.mxu1  ;;  %4550 = vmatpush3.bf16.msra.mxu1 %v2364_v42 }
 0x6fb   : > { %4555 = vmatprep.subr.bf16.mxu1 %v5264_v49 }
 0x6fc   : > { %v2324_v31 = vpop.f32.mrf.mxu1 }
 0x6fd   : > { %v2331_v32 = vmul.f32 0.125, %v2324_v31 }
 0x6fe   : > { %v4547_v33 = vpop.f32.mrf.mxu1 }
 0x6ff   : > { %v2333_v34 = vadd.f32 %v2331_v32, %v5826_v55  ;;  %v4925_v33 = vld [vmem:[#allocation2] sm:$0xff] }
 0x700   : > { %v2327_v3 = vpop.f32.mrf.mxu1 }
 0x701   : > { %v2337_v35 = vsel %vm1763_vm2, %v2333_v34, -inf }
 0x702   : > { %2338 = vmax.xlane.f32.xlu1 %v2337_v35  ;;  %v4548_v36 = vpop.f32.mrf.mxu1 }
 0x703   : > { %v4926_v36 = vld [vmem:[#allocation2 + $0x8] sm:$0xff] }
 0x783   : > { %v2336_v45 = vpop.xlane.xlu0 %2335 }
 0x784   : > { %v2340_v46 = vsub.f32 %v2332_v27, %v2336_v45  ;;  %v4150_v27 = vld [vmem:[%s6314_s22] ss:$0 sm:$0xff] }
 0x786   : > { %v2342_v47 = vmul.f32 1.442695, %v2340_v46 }
 0x788   : > { %4893 = vpow2.f32 %v2342_v47 }
 0x78b   : > { %v2339_v55 = vpop.xlane.xlu1 %2338 }
 0x78c   : > { %v2341_v48 = vsub.f32 %v2333_v34, %v2339_v55 }
 0x78e   : > { %v2344_v50 = vmul.f32 1.442695, %v2341_v48 }
 0x790   : > { %4895 = vpow2.f32 %v2344_v50 }
 0x795   : > { %v4894_v51 = vpop.eup %4893 }
 0x796   : > { %v2346_v52 = vsel %vm1763_vm2, %v4894_v51, 0.0 }
 0x797   : > { %2347 = vadd.xlane.f32.xlu0 %v2346_v52  ;;  %v4813_v52 = vld [vmem:[%s6312_s20 + $0xc4] ss:$16 sps:$4 sm:$0xff]  }
 0x79d   : > { %v4896_v54 = vpop.eup %4895 }
 0x79e   : > { %v2349_v56 = vsel %vm1763_vm2, %v4896_v54, 0.0 }
 0x79f   : > { %2350 = vadd.xlane.f32.xlu1 %v2349_v56  ;;  %v4811_v56 = vld [vmem:[%s6312_s20 + $0xc0] ss:$16 sps:$4 sm:$0xff]  }
 0x820   : > { %v2348_v63 = vpop.xlane.xlu0 %2347 }
 0x821   : > { %4897 = vrcp.f32 %v2348_v63  ;;  %v4820_v63 = vld [vmem:[%s6312_s20 + $0xa8] ss:$16 sps:$4 sm:$0xff]  }
 0x828   : > { %v2351_v0 = vpop.xlane.xlu1 %2350 }
 0x829   : > { %4899 = vrcp.f32 %v2351_v0  ;;  %v4823_v0 = vld [vmem:[%s6312_s20 + $0x80] ss:$16 sps:$4 sm:$0xff]  }
 0x82e   : > { %v4898_v1 = vpop.eup %4897 }
 0x82f   : > { %v2354_v4 = vmul.f32 %v4898_v1, %v4894_v51  ;;  %v4825_v1 = vld [vmem:[%s6312_s20 + $0x84] ss:$16 sps:$4 sm:$0xff]  }
 0x831   : > { %v2356_v5 = vpack.c.bf16 %v2354_v4, %v2354_v4  ;;  %v4828_v4 = vld [vmem:[%s6312_s20 + $0x8c] ss:$16 sps:$4 sm:$0xff]  }
 0x833   : > { %4552 = vmatmul.mubr.msk.bf16.vlgmr.msra.gmra.mxu1 %vm1763_vm2, %v2356_v5  ;;  %v4831_v5 = vld [vmem:[%s6312_s20 + $0x64] ss:$16 sps:$4 sm:$0xff]  }
 0x834   : > { %4556 = vmatpush3.bf16.msra.mxu1 %v2410_v6  ;;  %4557 = vmatprep.mubr.msk.bf16.mxu1 %vm5265_vm0, %v5264_v49  ;;  %v4834_v6 = vld [vmem:[%s6312_s20 + $0x6c] ss:$16 sps:$4 sm:$0xff]  }
 0x835   : > { %4573 = vmatprep.subr.bf16.mxu1 %v5264_v49 }
 0x836   : > { %v4900_v7 = vpop.eup %4899 }
 0x837   : > { %v2355_v8 = vmul.f32 %v4900_v7, %v4896_v54  ;;  %v4816_v54 = vld [vmem:[%s6312_s20 + $0xcc] ss:$16 sps:$4 sm:$0xff]   ;;  %v4829_v7 = vld [vmem:[%s6312_s20 + $0x60] ss:$16 sps:$4 sm:$0xff]  }
 0x839   : > { %v2357_v10 = vpack.c.bf16 %v2355_v8, %v2355_v8  ;;  %v4832_v8 = vld [vmem:[%s6312_s20 + $0x68] ss:$16 sps:$4 sm:$0xff]  }
 0x83b   : > { %4558 = vmatmul.mubr.msk.bf16.vlgmr.msra.gmra.mxu1 %vm1763_vm2, %v2357_v10  ;;  %v4840_v10 = vld [vmem:[%s6312_s20 + $0x4c] ss:$16 sps:$4 sm:$0xff]  }
 0x83c   : > { %4574 = vmatpush3.bf16.msra.mxu1 %v4797_v9  ;;  %4581 = vmatprep.mubr.msk.bf16.mxu1 %vm5265_vm0, %v5264_v49  ;;  %v4837_v9 = vld [vmem:[%s6312_s20 + $0x44] ss:$16 sps:$4 sm:$0xff]  }
 0x83d   : > { %4575 = vmatprep.subr.bf16.mxu1 %v5264_v49 }
 0x840   : > { %4576 = vmatpush3.bf16.msra.mxu1 %v4798_v11  ;;  %v5267_v11 = vmov 0  }
 0x841   : > { %4577 = vmatprep.subr.bf16.mxu1 %v5264_v49 }
 0x844   : > { %4578 = vmatpush3.bf16.msra.mxu1 %v4799_v12  ;;  %v4835_v12 = vld [vmem:[%s6312_s20 + $0x40] ss:$16 sps:$4 sm:$0xff]  }
 0x845   : > { %4579 = vmatprep.subr.bf16.mxu1 %v5264_v49 }
 0x848   : > { %4580 = vmatpush3.bf16.msra.mxu1 %v4800_v13  ;;  %v4838_v13 = vld [vmem:[%s6312_s20 + $0x48] ss:$16 sps:$4 sm:$0xff]  }
 0x849   : > { %2908 = vmatprep.subr.bf16.mxu1 %v4810_v44  ;;  %v4860_v44 = vld [vmem:[%s5718_s0 + $0xb0] sm:$0xff]  }
 0x84b   : > { %4582 = vmatmul.mubr.msk.bf16.vlgmr.msra.gmra.mxu1 %vm1633_vm1, %v1883_v59 }
 0x84c   : > { %2909 = vmatpush1.bf16.msra.mxu1 %v4808_v41  ;;  %2940 = vmatprep.mubr.bf16.mxu1 %v5267_v11  ;;  %v4859_v41 = vld [vmem:[%s5718_s0 + $0x30] sm:$0xff]  }
 0x84d   : > { %2910 = vmatprep.subr.bf16.mxu1 %v4816_v54  ;;  %v4870_v54 = vld [vmem:[%s5718_s0 + $0xd8] sm:$0xff]  }
 0x850   : > { %2911 = vmatpush1.bf16.msra.mxu1 %v4814_v57  ;;  %v4872_v57 = vld [vmem:[%s5718_s0 + $0x98] sm:$0xff]  }
 0x851   : > { %2912 = vmatprep.subr.bf16.mxu1 %v4822_v61  ;;  %v4874_v61 = vld [vmem:[%s5718_s0 + $0xd0] sm:$0xff]  }
 0x854   : > { %2913 = vmatpush1.bf16.msra.mxu1 %v4820_v63  ;;  %v4876_v63 = vld [vmem:[%s5718_s0 + $0x90] sm:$0xff]  }
 0x855   : > { %2914 = vmatprep.subr.bf16.mxu1 %v4828_v4  ;;  %v4880_v4 = vld [vmem:[%s5718_s0 + $0x88] sm:$0xff]  }
 0x858   : > { %2915 = vmatpush1.bf16.msra.mxu1 %v4826_v2  ;;  %v4879_v2 = vld [vmem:[%s5718_s0 + $0x8] sm:$0xff]  }
 0x859   : > { %2916 = vmatprep.subr.bf16.mxu1 %v4834_v6  ;;  %v4882_v6 = vld [vmem:[%s5718_s0 + $0xc0] sm:$0xff]  }
 0x85c   : > { %2917 = vmatpush1.bf16.msra.mxu1 %v4832_v8  ;;  %v4884_v8 = vld [vmem:[%s5718_s0 + $0x80] sm:$0xff]  }
 0x85d   : > { %2918 = vmatprep.subr.bf16.mxu1 %v4840_v10  ;;  %v2683_v10 = vld [vmem:[%s5713_s12] sm:$0xf] }
 0x860   : > { %2919 = vmatpush1.bf16.msra.mxu1 %v4838_v13  ;;  %v2688_v13 = vrot.slane %v2683_v10, %v5818_v43 }
 0x861   : > { %2920 = vmatprep.subr.bf16.mxu1 %v4846_v15 }
 0x8f3   : > { %v2400_v17 = vpop.f32.mrf.mxu1 }
 0x8f5   : > { %v4553_v18 = vpop.f32.mrf.mxu1 }
 0x8f6   : > { %v4849_v18 = vld [vmem:[%s6312_s20 + $0x4] ss:$16 sps:$4 sm:$0xff]  }
 0x8f7   : > { %v2403_v19 = vpop.f32.mrf.mxu1 }
 0x8f8   : > { %v4852_v19 = vld [vmem:[%s6312_s20 + $0xc] ss:$16 sps:$4 sm:$0xff]  }
 0x8f9   : > { %v4554_v20 = vpop.f32.mrf.mxu1 }
 0x8fa   : > { %v4847_v20 = vld [vmem:[%s6312_s20] ss:$16 sps:$4 sm:$0xff]  }
 0x8fb   : > { %v2446_v21 = vpop.f32.mrf.mxu1 }
 0x8fc   : > { %v2452_v22 = vpack.c.bf16 %v2446_v21, %v2400_v17  ;;  %v4844_v17 = vld [vmem:[%s6312_s20 + $0x28] ss:$16 sps:$4 sm:$0xff]  }
 0x8fd   : > { %v4559_v53 = vpop.f32.mrf.mxu1  ;;  %2921 = vmatpush1.bf16.msra.mxu1 %v4844_v17  ;;  %v4850_v21 = vld [vmem:[%s6312_s20 + $0x8] ss:$16 sps:$4 sm:$0xff]  }
 0x8fe   : > { %4570 = vmatmul.mubr.msk.bf16.vlgmr.msra.gmra.mxu0 %vm1633_vm1, %v2452_v22  ;;  %2922 = vmatprep.subr.bf16.mxu1 %v4852_v19 }
 0x8ff   : > { %v2449_v58 = vpop.f32.mrf.mxu1  ;;  %2866 = vmatpush1.bf16.msra.mxu0 %v4805_v39  ;;  %2897 = vmatprep.mubr.bf16.mxu0 %v5267_v11  ;;  %v4857_v39 = vld [vmem:[%s5718_s0 + $0x70] sm:$0xff]   ;;  %v2691_v11 = vsub.s32 1, %v5814_v38 }
 0x900   : > { %2867 = vmatprep.subr.bf16.mxu0 %v4813_v52  ;;  %v4869_v52 = vld [vmem:[%s5718_s0 + $0x58] sm:$0xff]  }
 0x901   : > { %v4560_v59 = vpop.f32.mrf.mxu1  ;;  %2923 = vmatpush1.bf16.msra.mxu1 %v4850_v21  ;;  %v2692_v15 = vrot.slane %v2683_v10, %v2691_v11 }
 0x903   : > { %2868 = vmatpush1.bf16.msra.mxu0 %v4811_v56  ;;  %v4871_v56 = vld [vmem:[%s5718_s0 + $0x18] sm:$0xff]  }
 0x904   : > { %2869 = vmatprep.subr.bf16.mxu0 %v4819_v60  ;;  %v4873_v60 = vld [vmem:[%s5718_s0 + $0x50] sm:$0xff]  }
 0x907   : > { %2870 = vmatpush1.bf16.msra.mxu0 %v4817_v62  ;;  %v4875_v62 = vld [vmem:[%s5718_s0 + $0x10] sm:$0xff]  }
 0x908   : > { %2871 = vmatprep.subr.bf16.mxu0 %v4825_v1  ;;  %v4878_v1 = vld [vmem:[%s5718_s0 + $0xc8] sm:$0xff]  }
 0x90b   : > { %v2591_v23 = vpop.f32.mrf.mxu1  ;;  %2872 = vmatpush1.bf16.msra.mxu0 %v4823_v0  ;;  %v4877_v0 = vld [vmem:[%s5718_s0 + $0x48] sm:$0xff]  }
 0x90c   : > { %2873 = vmatprep.subr.bf16.mxu0 %v4831_v5  ;;  %v4881_v5 = vld [vmem:[%s5718_s0 + $0x40] sm:$0xff]  }
 0x90d   : > { %v4583_v24 = vpop.f32.mrf.mxu1 }
 0x90f   : > { %v2594_v25 = vpop.f32.mrf.mxu1  ;;  %2874 = vmatpush1.bf16.msra.mxu0 %v4829_v7  ;;  %v4883_v7 = vld [vmem:[%s5718_s0] sm:$0xff]  }
 0x910   : > { %2875 = vmatprep.subr.bf16.mxu0 %v4837_v9  ;;  %v2695_v9 = vsub.s32 2, %v5814_v38 }
 0x911   : > { %v4584_v26 = vpop.f32.mrf.mxu1 }
 0x913   : > { %2876 = vmatpush1.bf16.msra.mxu0 %v4835_v12  ;;  %v2699_v12 = vsub.s32 3, %v5814_v38 }
 0x914   : > { %2877 = vmatprep.subr.bf16.mxu0 %v4843_v14  ;;  %v2696_v14 = vrot.slane %v2683_v10, %v2695_v9 }
 0x917   : > { %2878 = vmatpush1.bf16.msra.mxu0 %v4841_v16  ;;  %v2700_v16 = vrot.slane %v2683_v10, %v2699_v12 }
 0x918   : > { %2879 = vmatprep.subr.bf16.mxu0 %v4849_v18 }
 0x91b   : > { %2880 = vmatpush1.bf16.msra.mxu0 %v4847_v20 }
 0x9be   : > { %v2523_v49 = vpop.f32.mrf.mxu0 }
 0x9bf   : > { %v2592_v28 = vadd.f32 %v2591_v23, %v2523_v49  ;;  %v4151_v49 = vld [vmem:[%s6316_s29] ss:$0 sm:$0xff] }
 0x9c0   : > { %v4571_v29 = vpop.f32.mrf.mxu0 }
 0x9c1   : > { %v2605_v30 = vadd.f32 %v4150_v27, %v2592_v28 }
 0x9c2   : > { %v2526_v31 = vpop.f32.mrf.mxu0 }
 0x9c3   : > { %v2595_v32 = vadd.f32 %v2594_v25, %v2526_v31  ;;  %v2607_v34 = vadd.f32 %v4925_v33, %v2605_v30  ;;  %v4152_v30 = vld [vmem:[%s6318_s21] ss:$0 sm:$0xff] }
 0x9c4   : > { %v4572_v3 = vpop.f32.mrf.mxu0 }
 0x9c5   : > { %v2606_v35 = vadd.f32 %v4150_v27, %v2595_v32  ;;  %2611 = vadd.xlane.f32.xlu0 %v2607_v34  ;;  %v4853_v3 = vld [vmem:[%s5718_s0 + $0x78] sm:$0xff]  }
 0x9c6   : > { %4331 = vmatprep.subr.bf16.mxu0 %v4853_v3 }
 0x9c7   : > { %v2608_v37 = vadd.f32 %v4926_v36, %v2606_v35  ;;  %v4854_v35 = vld [vmem:[%s5718_s0 + $0xf8] sm:$0xff]  }
 0x9c8   : > { %v4855_v36 = vld [vmem:[%s5718_s0 + $0x38] sm:$0xff]   ;;  %4353 = vmatprep.subr.bf16.mxu1 %v4854_v35 }
 0x9c9   : > { %2613 = vadd.xlane.f32.xlu1 %v2608_v37 }
 0xa4e   : > { %v2612_v42 = vpop.xlane.xlu0 %2611 }
 0xa4f   : > { %v2616_v45 = vmul.f32 0.0078125, %v2612_v42  ;;  %v4861_v42 = vld [vmem:[%s5718_s0 + $0x68] sm:$0xff]  }
 0xa51   : > { %v5963_v46 = vsub.f32 %v2607_v34, %v2616_v45  ;;  %v4862_v45 = vld [vmem:[%s5718_s0 + $0xe8] sm:$0xff]  }
 0xa52   : > { %v2614_v47 = vpop.xlane.xlu1 %2613 }
 0xa53   : > { %v2617_v55 = vmul.f32 0.0078125, %v2614_v47  ;;  %v2620_v48 = vmul.f32 %v5963_v46, %v5963_v46  ;;  %v4864_v47 = vld [vmem:[%s5718_s0 + $0xa8] sm:$0xff]  }
 0xa55   : > { %v5967_v50 = vsub.f32 %v2608_v37, %v2617_v55  ;;  %2622 = vadd.xlane.f32.xlu0 %v2620_v48  ;;  %v4856_v37 = vld [vmem:[%s5718_s0 + $0xb8] sm:$0xff]   ;;  %v4865_v55 = vld [vmem:[%s5718_s0 + $0x60] sm:$0xff]  }
 0xa56   : > { %v4866_v48 = vld [vmem:[%s5718_s0 + $0xe0] sm:$0xff]  }
 0xa57   : > { %v2621_v51 = vmul.f32 %v5967_v50, %v5967_v50 }
 0xa59   : > { %2624 = vadd.xlane.f32.xlu1 %v2621_v51  ;;  %v4868_v51 = vld [vmem:[%s5718_s0 + $0xa0] sm:$0xff]  }
 0xade   : > { %v2623_v22 = vpop.xlane.xlu0 %2622 }
 0xadf   : > { %v2626_v53 = vmul.f32 0.0078125, %v2623_v22 }
 0xae1   : > { %v2628_v58 = vadd.f32 1e-12, %v2626_v53 }
 0xae2   : > { %v2625_v59 = vpop.xlane.xlu1 %2624 }
 0xae3   : > { %4901 = vrsqrt.f32 %v2628_v58  ;;  %v2627_v23 = vmul.f32 0.0078125, %v2625_v59 }
 0xae5   : > { %v2629_v24 = vadd.f32 1e-12, %v2627_v23 }
 0xae7   : > { %4903 = vrsqrt.f32 %v2629_v24 }
 0xaf0   : > { %v4902_v25 = vpop.eup %4901 }
 0xaf1   : > { %v2632_v26 = vmul.f32 %v4902_v25, %v5963_v46  ;;  %v4863_v46 = vld [vmem:[%s5718_s0 + $0x28] sm:$0xff]  }
 0xaf3   : > { %v2640_v29 = vmul.f32 %v4151_v49, %v2632_v26 }
 0xaf4   : > { %v4904_v27 = vpop.eup %4903 }
 0xaf5   : > { %v2633_v28 = vmul.f32 %v4904_v27, %v5967_v50  ;;  %v6011_v32 = vadd.f32 %v4152_v30, %v2640_v29  ;;  %v4867_v50 = vld [vmem:[%s5718_s0 + $0x20] sm:$0xff]  }
 0xaf7   : > { %v2641_v31 = vmul.f32 %v4151_v49, %v2633_v28 }
 0xaf9   : > { %v6013_v33 = vadd.f32 %v4152_v30, %v2641_v31 }
 0xafb   : > { %v2650_v34 = vpack.c.bf16 %v6013_v33, %v6011_v32 }
 0xafd   : > { %2898 = vmatmul.mubr.bf16.vlgmr.msra.gmra.mxu0 %v2650_v34  ;;  %2941 = vmatmul.mubr.bf16.vlgmr.msra.gmra.mxu1 %v2650_v34 }
 0xafe   : > { %4332 = vmatpush3.bf16.msra.mxu0 %v4855_v36  ;;  %4354 = vmatpush3.bf16.msra.mxu1 %v4856_v37 }
 0xaff   : > { %4333 = vmatprep.subr.bf16.mxu0 %v4857_v39  ;;  %4355 = vmatprep.subr.bf16.mxu1 %v4858_v40 }
 0xb02   : > { %4334 = vmatpush3.bf16.msra.mxu0 %v4859_v41  ;;  %4356 = vmatpush3.bf16.msra.mxu1 %v4860_v44 }
 0xb03   : > { %4335 = vmatprep.subr.bf16.mxu0 %v4861_v42  ;;  %4357 = vmatprep.subr.bf16.mxu1 %v4862_v45 }
 0xb06   : > { %4336 = vmatpush3.bf16.msra.mxu0 %v4863_v46  ;;  %4358 = vmatpush3.bf16.msra.mxu1 %v4864_v47 }
 0xb07   : > { %4337 = vmatprep.subr.bf16.mxu0 %v4865_v55  ;;  %4359 = vmatprep.subr.bf16.mxu1 %v4866_v48 }
 0xb0a   : > { %4338 = vmatpush3.bf16.msra.mxu0 %v4867_v50  ;;  %4360 = vmatpush3.bf16.msra.mxu1 %v4868_v51 }
 0xb0b   : > { %4339 = vmatprep.subr.bf16.mxu0 %v4869_v52  ;;  %4361 = vmatprep.subr.bf16.mxu1 %v4870_v54 }
 0xb0e   : > { %4340 = vmatpush3.bf16.msra.mxu0 %v4871_v56  ;;  %4362 = vmatpush3.bf16.msra.mxu1 %v4872_v57 }
 0xb0f   : > { %4341 = vmatprep.subr.bf16.mxu0 %v4873_v60  ;;  %4363 = vmatprep.subr.bf16.mxu1 %v4874_v61 }
 0xb12   : > { %4342 = vmatpush3.bf16.msra.mxu0 %v4875_v62  ;;  %4364 = vmatpush3.bf16.msra.mxu1 %v4876_v63 }
 0xb13   : > { %4343 = vmatprep.subr.bf16.mxu0 %v4877_v0  ;;  %4365 = vmatprep.subr.bf16.mxu1 %v4878_v1 }
 0xb16   : > { %4344 = vmatpush3.bf16.msra.mxu0 %v4879_v2  ;;  %4366 = vmatpush3.bf16.msra.mxu1 %v4880_v4 }
 0xb17   : > { %4345 = vmatprep.subr.bf16.mxu0 %v4881_v5  ;;  %4367 = vmatprep.subr.bf16.mxu1 %v4882_v6 }
 0xb1a   : > { %4346 = vmatpush3.bf16.msra.mxu0 %v4883_v7  ;;  %4368 = vmatpush3.bf16.msra.mxu1 %v4884_v8 }
 0xbbd   : > { %v2899_v17 = vpop.f32.mrf.mxu0  ;;  %v2942_v18 = vpop.f32.mrf.mxu1 }
 0xbbe   : > { %v6054_v19 = vadd.f32 %v2899_v17, %v2688_v13  ;;  %v6056_v20 = vadd.f32 %v2942_v18, %v2696_v14 }
 0xbbf   : > { %v2901_v21 = vpop.f32.mrf.mxu0  ;;  %v2944_v22 = vpop.f32.mrf.mxu1 }
 0xbc0   : > { %v2959_v53 = vmul.f32 0.044715, %v6054_v19  ;;  %v2961_v58 = vmul.f32 0.044715, %v6056_v20  ;;  %v2902_v59 = vadd.f32 %v2901_v21, %v2692_v15  ;;  %v6060_v23 = vadd.f32 %v2944_v22, %v2700_v16 }
 0xbc1   : > { %v2903_v38 = vpop.f32.mrf.mxu0  ;;  %v2946_v43 = vpop.f32.mrf.mxu1  ;;  %v2951_v21 = vmul.f32 0.5, %v6054_v19 }
 0xbc2   : > { %v2967_v24 = vmul.f32 %v2959_v53, %v6054_v19  ;;  %v2969_v25 = vmul.f32 %v2961_v58, %v6056_v20  ;;  %v2960_v26 = vmul.f32 0.044715, %v2902_v59  ;;  %v2962_v49 = vmul.f32 0.044715, %v6060_v23 }
 0xbc3   : > { %v2904_v27 = vadd.f32 %v2903_v38, %v2688_v13  ;;  %v6065_v28 = vadd.f32 %v2946_v43, %v2696_v14  ;;  %v2905_v29 = vpop.f32.mrf.mxu0  ;;  %v2948_v30 = vpop.f32.mrf.mxu1  ;;  %v2952_v17 = vmul.f32 0.5, %v2902_v59 }
 0xbc4   : > { %v2975_v31 = vmul.f32 %v2967_v24, %v6054_v19  ;;  %v2977_v34 = vmul.f32 %v2969_v25, %v6056_v20  ;;  %v2968_v3 = vmul.f32 %v2960_v26, %v2902_v59  ;;  %v2970_v35 = vmul.f32 %v2962_v49, %v6060_v23 }
 0xbc5   : > { %v2963_v36 = vmul.f32 0.044715, %v2904_v27  ;;  %v2965_v37 = vmul.f32 0.044715, %v6065_v28  ;;  %v2906_v39 = vadd.f32 %v2905_v29, %v2692_v15  ;;  %v2949_v40 = vadd.f32 %v2948_v30, %v2700_v16 }
 0xbc6   : > { %v2983_v41 = vadd.f32 %v2975_v31, %v6054_v19  ;;  %v2985_v44 = vadd.f32 %v2977_v34, %v6056_v20  ;;  %v2976_v42 = vmul.f32 %v2968_v3, %v2902_v59  ;;  %v2978_v45 = vmul.f32 %v2970_v35, %v6060_v23 }
 0xbc7   : > { %v2971_v46 = vmul.f32 %v2963_v36, %v2904_v27  ;;  %v2973_v47 = vmul.f32 %v2965_v37, %v6065_v28  ;;  %v2964_v55 = vmul.f32 0.044715, %v2906_v39  ;;  %v2966_v48 = vmul.f32 0.044715, %v2949_v40 }
 0xbc8   : > { %v2991_v50 = vmul.f32 0.7978846, %v2983_v41  ;;  %v2993_v51 = vmul.f32 0.7978846, %v2985_v44  ;;  %v2984_v52 = vadd.f32 %v2976_v42, %v2902_v59  ;;  %v2986_v62 = vadd.f32 %v2978_v45, %v6060_v23 }
 0xbc9   : > { %v2979_v54 = vmul.f32 %v2971_v46, %v2904_v27  ;;  %v2981_v56 = vmul.f32 %v2973_v47, %v6065_v28  ;;  %v2972_v57 = vmul.f32 %v2964_v55, %v2906_v39  ;;  %v2974_v60 = vmul.f32 %v2966_v48, %v2949_v40 }
 0xbca   : > { %v2992_v61 = vmul.f32 0.7978846, %v2984_v52  ;;  %4905 = vtanh.f32 %v2991_v50  ;;  %v2994_v4 = vmul.f32 0.7978846, %v2986_v62  ;;  %v2955_v38 = vmul.f32 0.5, %v2904_v27 }
 0xbcb   : > { %v2987_v63 = vadd.f32 %v2979_v54, %v2904_v27  ;;  %v2989_v0 = vadd.f32 %v2981_v56, %v6065_v28  ;;  %v2980_v1 = vmul.f32 %v2972_v57, %v2906_v39  ;;  %4907 = vtanh.f32 %v2993_v51 }
 0xbcc   : > { %v2982_v2 = vmul.f32 %v2974_v60, %v2949_v40  ;;  %4909 = vtanh.f32 %v2992_v61  ;;  %v2956_v26 = vmul.f32 0.5, %v2906_v39  ;;  %v2957_v29 = vmul.f32 0.5, %v6065_v28 }
 0xbcd   : > { %v2995_v5 = vmul.f32 0.7978846, %v2987_v63  ;;  %v2997_v6 = vmul.f32 0.7978846, %v2989_v0  ;;  %v2988_v7 = vadd.f32 %v2980_v1, %v2906_v39  ;;  %4911 = vtanh.f32 %v2994_v4 }
 0xbce   : > { %v2990_v8 = vadd.f32 %v2982_v2, %v2949_v40  ;;  %v2954_v31 = vmul.f32 0.5, %v6060_v23  ;;  %v2958_v34 = vmul.f32 0.5, %v2949_v40  ;;  %v2953_v19 = vmul.f32 0.5, %v6056_v20  ;;  %v4185_v20 = vld [vmem:[%s1156_s4] ss:$0 sm:$0xff] }
 0xbcf   : > { %4913 = vtanh.f32 %v2995_v5  ;;  %v2996_v9 = vmul.f32 0.7978846, %v2988_v7 }
 0xbd0   : > { %4915 = vtanh.f32 %v2997_v6  ;;  %v2998_v10 = vmul.f32 0.7978846, %v2990_v8 }
 0xbd1   : > { %4917 = vtanh.f32 %v2996_v9 }
 0xbd2   : > { %4919 = vtanh.f32 %v2998_v10 }
 0xbd7   : > { %v4906_v11 = vpop.eup %4905 }
 0xbd8   : > { %v4908_v12 = vpop.eup %4907  ;;  %v3007_v43 = vadd.f32 1.0, %v4906_v11 }
 0xbd9   : > { %v4910_v13 = vpop.eup %4909  ;;  %v3009_v30 = vadd.f32 1.0, %v4908_v12 }
 0xbda   : > { %v4912_v14 = vpop.eup %4911  ;;  %v3008_v18 = vadd.f32 1.0, %v4910_v13  ;;  %v3015_v44 = vmul.f32 %v3007_v43, %v2951_v21  ;;  %v4219_v21 = vld [vmem:[%s1162_s13] ss:$0 sm:$0xff] }
 0xbdb   : > { %v3010_v58 = vadd.f32 1.0, %v4912_v14  ;;  %v3017_v39 = vmul.f32 %v3009_v30, %v2953_v19 }
 0xbdc   : > { %v4914_v15 = vpop.eup %4913  ;;  %v3016_v35 = vmul.f32 %v3008_v18, %v2952_v17  ;;  %v4218_v17 = vld [vmem:[%s1159_s27] ss:$0 sm:$0xff]  ;;  %s6322_s27 = sld [smem:[#allocation55_spill]] (!%p4220_p5) }
 0xbdd   : > { %v4916_v16 = vpop.eup %4915  ;;  %v3011_v22 = vadd.f32 1.0, %v4914_v15  ;;  %v3018_v27 = vmul.f32 %v3010_v58, %v2954_v31 }
 0xbde   : > { %v4918_v53 = vpop.eup %4917  ;;  %v3013_v24 = vadd.f32 1.0, %v4916_v16 }
 0xbdf   : > { %v4920_v25 = vpop.eup %4919  ;;  %v3012_v49 = vadd.f32 1.0, %v4918_v53  ;;  %v3019_v59 = vmul.f32 %v3011_v22, %v2955_v38 }
 0xbe0   : > { %v3014_v3 = vadd.f32 1.0, %v4920_v25  ;;  %v3021_v37 = vmul.f32 %v3013_v24, %v2957_v29 }
 0xbe1   : > { %v3020_v36 = vmul.f32 %v3012_v49, %v2956_v26  ;;  %v3023_v46 = vpack.c.bf16 %v3019_v59, %v3015_v44 }
 0xbe2   : > { %v3022_v41 = vmul.f32 %v3014_v3, %v2958_v34  ;;  %v3025_v28 = vpack.c.bf16 %v3021_v37, %v3017_v39 }
 0xbe3   : > { %v3024_v42 = vpack.c.bf16 %v3020_v36, %v3016_v35 }
 0xbe4   : > { %v3026_v45 = vpack.c.bf16 %v3022_v41, %v3018_v27 }
 0xbe5   : > { %3322 = vmatprep.mubr.bf16.mxu0 %v3024_v42 }
 0xbe6   : > { %3363 = vmatprep.mubr.bf16.mxu1 %v3026_v45  ;;  %3323 = vmatmul.mubr.bf16.vlgmr.msra.gmra.mxu0 %v3023_v46 }
 0xbe7   : > { %3364 = vmatmul.mubr.bf16.vlgmr.msra.gmra.mxu1 %v3025_v28 }
 0xca6   : > { %v4347_v23 = vpop.f32.mrf.mxu0 }
 0xca7   : > { %v4369_v40 = vpop.f32.mrf.mxu1 }
 0xca8   : > { %v4348_v47 = vpop.f32.mrf.mxu0 }
 0xca9   : > { %v4349_v55 = vadd.f32 %v4348_v47, %v4347_v23  ;;  %v4370_v48 = vpop.f32.mrf.mxu1 }
 0xcaa   : > { %v4350_v50 = vpop.f32.mrf.mxu0  ;;  %v4371_v52 = vadd.f32 %v4370_v48, %v4369_v40 }
 0xcab   : > { %v3325_v51 = vadd.f32 %v4349_v55, %v4185_v20  ;;  %v4372_v54 = vpop.f32.mrf.mxu1 }
 0xcac   : > { %v4351_v56 = vpop.f32.mrf.mxu0 }
 0xcad   : > { %v3366_v57 = vadd.f32 %v4371_v52, %v3325_v51  ;;  %v4352_v60 = vadd.f32 %v4351_v56, %v4350_v50  ;;  %v4373_v61 = vpop.f32.mrf.mxu1 }
 0xcae   : > { %v4374_v63 = vadd.f32 %v4373_v61, %v4372_v54 }
 0xcaf   : > { %v3328_v62 = vadd.f32 %v4352_v60, %v4185_v20  ;;  %v3372_v0 = vadd.f32 %v3366_v57, %v6011_v32 }
 0xcb1   : > { %v3369_v1 = vadd.f32 %v4374_v63, %v3328_v62  ;;  %3376 = vadd.xlane.f32.xlu0 %v3372_v0 }
 0xcb3   : > { %v3373_v2 = vadd.f32 %v3369_v1, %v6013_v33 }
 0xcb5   : > { %3378 = vadd.xlane.f32.xlu1 %v3373_v2 }
 0xd3a   : > { %v3377_v4 = vpop.xlane.xlu0 %3376 }
 0xd3b   : > { %v3380_v5 = vmul.f32 0.0078125, %v3377_v4 }
 0xd3d   : > { %v3382_v6 = vsub.f32 %v3372_v0, %v3380_v5 }
 0xd3e   : > { %v3379_v7 = vpop.xlane.xlu1 %3378 }
 0xd3f   : > { %v3381_v8 = vmul.f32 0.0078125, %v3379_v7  ;;  %v3384_v9 = vmul.f32 %v3382_v6, %v3382_v6 }
 0xd41   : > { %v3383_v10 = vsub.f32 %v3373_v2, %v3381_v8  ;;  %3386 = vadd.xlane.f32.xlu0 %v3384_v9 }
 0xd43   : > { %v3385_v11 = vmul.f32 %v3383_v10, %v3383_v10 }
 0xd45   : > { %3388 = vadd.xlane.f32.xlu1 %v3385_v11 }
 0xdca   : > { %v3387_v12 = vpop.xlane.xlu0 %3386 }
 0xdcb   : > { %v3390_v13 = vmul.f32 0.0078125, %v3387_v12 }
 0xdcd   : > { %v3392_v32 = vadd.f32 1e-12, %v3390_v13 }
 0xdce   : > { %v3389_v14 = vpop.xlane.xlu1 %3388 }
 0xdcf   : > { %4921 = vrsqrt.f32 %v3392_v32  ;;  %v3391_v15 = vmul.f32 0.0078125, %v3389_v14 }
 0xdd1   : > { %v3393_v33 = vadd.f32 1e-12, %v3391_v15 }
 0xdd3   : > { %4923 = vrsqrt.f32 %v3393_v33 }
 0xddc   : > { %v4922_v16 = vpop.eup %4921 }
 0xddd   : > { %v3396_v18 = vmul.f32 %v4922_v16, %v3382_v6 }
 0xddf   : > { %v3404_v22 = vmul.f32 %v4218_v17, %v3396_v18 }
 0xde0   : > { %v4924_v53 = vpop.eup %4923 }
 0xde1   : > { %v3412_v58 = vadd.f32 %v4219_v21, %v3404_v22  ;;  %v3397_v38 = vmul.f32 %v4924_v53, %v3383_v10 }
 0xde3   : > { %3414 = vst [vmem:[#allocation2] sm:$0xff] %v3412_v58  ;;  %v3405_v43 = vmul.f32 %v4218_v17, %v3397_v38  ;;  %3419 = sbr.rel (%p4220_p5) target bundleno = 4003 (0xfa3), region = 164 }
 0xde5   : > { %v3413_v24 = vadd.f32 %v4219_v21, %v3405_v43 }
 0xde7   : > { %3415 = vst [vmem:[#allocation2 + $0x8] sm:$0xff] %v3413_v24 }
 0xde8   : > { %v4927_v25 = vld [vmem:[%s6322_s27 + $0x38] sm:$0xff]   ;;  %v5268_v26 = vmov 0.0   ;;  %v4928_v49 = vld [vmem:[%s6322_s27 + $0x30] sm:$0xff]   ;;  %vm5269_vm4 = vmmov 0   ;;  %v4929_v29 = vld [vmem:[%s6322_s27 + $0x28] sm:$0xff]   ;;  %v3421_v59 = vpack.c.bf16 %v3413_v24, %v3413_v24  ;;  %v3420_v19 = vpack.c.bf16 %v3412_v58, %v3412_v58 }
 0xde9   : > { %4585 = vmatprep.subr.bf16.mxu0 %v5268_v26  ;;  %4605 = vmatprep.subr.bf16.mxu1 %v5268_v26  ;;  %v4935_v30 = vld [vmem:[%s6323_s7 + $0x38] sm:$0xff]   ;;  %v4930_v31 = vld [vmem:[%s6322_s27 + $0x20] sm:$0xff]   ;;  %v4936_v34 = vld [vmem:[%s6323_s7 + $0x30] sm:$0xff]   ;;  %vm3450_vm5 = vcmask 1041409   ;;  %vm3655_vm6 = vcmask 25600  }
 0xdea   : > { %4586 = vmatpush3.bf16.msra.mxu0 %v4927_v25  ;;  %4601 = vmatprep.mubr.msk.bf16.mxu0 %vm5269_vm4, %v5268_v26  ;;  %v4931_v3 = vld [vmem:[%s6322_s27 + $0x18] sm:$0xff]   ;;  %v4937_v35 = vld [vmem:[%s6323_s7 + $0x28] sm:$0xff]   ;;  %v4932_v36 = vld [vmem:[%s6322_s27 + $0x10] sm:$0xff]   ;;  %v3448_v37 = vunpack.c.l.b16 %v3421_v59  ;;  %v3447_v41 = vunpack.c.l.b16 %v3420_v19 }
 0xdeb   : > { %4587 = vmatprep.subr.bf16.mxu0 %v5268_v26  ;;  %4621 = vmatprep.mubr.msk.bf16.mxu1 %vm5269_vm4, %v5268_v26  ;;  %v4933_v27 = vld [vmem:[%s6322_s27 + $0x8] sm:$0xff]   ;;  %v4934_v42 = vld [vmem:[%s6322_s27] sm:$0xff]   ;;  %v4939_v28 = vld [vmem:[%s6323_s7 + $0x18] sm:$0xff]  }
 0xdec   : > { %4606 = vmatpush3.bf16.msra.mxu1 %v4935_v30  ;;  %v3449_v44 = vrot.slane %v3448_v37, 7  ;;  %v4938_v46 = vld [vmem:[%s6323_s7 + $0x20] sm:$0xff]   ;;  %v4940_v23 = vld [vmem:[%s6323_s7 + $0x10] sm:$0xff]   ;;  %v4941_v40 = vld [vmem:[%s6323_s7 + $0x8] sm:$0xff]  }
 0xded   : > { %4607 = vmatprep.subr.bf16.mxu1 %v5268_v26  ;;  %v4942_v20 = vld [vmem:[%s6323_s7] sm:$0xff]  }
 0xdee   : > { %4588 = vmatpush3.bf16.msra.mxu0 %v4928_v49  ;;  %v3451_v39 = vsel %vm3450_vm5, %v3449_v44, %v3447_v41  ;;  %v4221_v47 = vld [vmem:[%s6324_s11] ss:$0 sm:$0xff] }
 0xdef   : > { %4589 = vmatprep.subr.bf16.mxu0 %v5268_v26  ;;  %v3452_v45 = vpack.c.b16 %v3451_v39, %v3451_v39  ;;  %v4230_v57 = vld [vmem:[%s6325_s26] ss:$0 sm:$0xff] }
 0xdf0   : > { %4608 = vmatpush3.bf16.msra.mxu1 %v4936_v34 }
 0xdf1   : > { %4609 = vmatprep.subr.bf16.mxu1 %v5268_v26 }
 0xdf2   : > { %4590 = vmatpush3.bf16.msra.mxu0 %v4929_v29 }
 0xdf3   : > { %4591 = vmatprep.subr.bf16.mxu0 %v5268_v26 }
 0xdf4   : > { %4610 = vmatpush3.bf16.msra.mxu1 %v4937_v35 }
 0xdf5   : > { %4611 = vmatprep.subr.bf16.mxu1 %v5268_v26 }
 0xdf6   : > { %4592 = vmatpush3.bf16.msra.mxu0 %v4930_v31 }
 0xdf7   : > { %4593 = vmatprep.subr.bf16.mxu0 %v5268_v26 }
 0xdf8   : > { %4612 = vmatpush3.bf16.msra.mxu1 %v4938_v46 }
 0xdf9   : > { %4613 = vmatprep.subr.bf16.mxu1 %v5268_v26 }
 0xdfa   : > { %4594 = vmatpush3.bf16.msra.mxu0 %v4931_v3 }
 0xdfb   : > { %4595 = vmatprep.subr.bf16.mxu0 %v5268_v26 }
 0xdfc   : > { %4614 = vmatpush3.bf16.msra.mxu1 %v4939_v28 }
 0xdfd   : > { %4615 = vmatprep.subr.bf16.mxu1 %v5268_v26 }
 0xdfe   : > { %4596 = vmatpush3.bf16.msra.mxu0 %v4932_v36 }
 0xdff   : > { %4597 = vmatprep.subr.bf16.mxu0 %v5268_v26 }
 0xe00   : > { %4616 = vmatpush3.bf16.msra.mxu1 %v4940_v23 }
 0xe01   : > { %4617 = vmatprep.subr.bf16.mxu1 %v5268_v26 }
 0xe02   : > { %4598 = vmatpush3.bf16.msra.mxu0 %v4933_v27 }
 0xe03   : > { %4599 = vmatprep.subr.bf16.mxu0 %v5268_v26 }
 0xe04   : > { %4618 = vmatpush3.bf16.msra.mxu1 %v4941_v40 }
 0xe05   : > { %4619 = vmatprep.subr.bf16.mxu1 %v5268_v26 }
 0xe06   : > { %4600 = vmatpush3.bf16.msra.mxu0 %v4934_v42 }
 0xe08   : > { %4620 = vmatpush3.bf16.msra.mxu1 %v4942_v20 }
 0xe09   : > { %4602 = vmatmul.mubr.bf16.vlgmr.msra.gmra.mxu0 %v3452_v45 }
 0xec9   : > { %v3536_v55 = vpop.f32.mrf.mxu0 }
 0xeca   : > { %v3537_v48 = vadd.f32 %v4221_v47, %v3536_v55 }
 0xecb   : > { %v4603_v50 = vpop.f32.mrf.mxu0 }
 0xecc   : > { %4943 = vtanh.f32 %v3537_v48 }
 0xecd   : > { %v3539_v51 = vpop.f32.mrf.mxu0 }
 0xecf   : > { %v4604_v52 = vpop.f32.mrf.mxu0 }
 0xed9   : > { %v4944_v54 = vpop.eup %4943 }
 0xeda   : > { %v3543_v56 = vpack.c.bf16 %v4944_v54, %v4944_v54 }
 0xedc   : > { %4622 = vmatmul.mubr.bf16.vlgmr.msra.gmra.mxu1 %v3543_v56 }
 0xf9c   : > { %v3649_v60 = vpop.f32.mrf.mxu1 }
 0xf9d   : > { %v3650_v61 = vadd.f32 %v4230_v57, %v3649_v60 }
 0xf9e   : > { %v4623_v62 = vpop.f32.mrf.mxu1 }
 0xf9f   : > { %3656 = vst.msk [vmem:[#allocation19] sm:$0x3] %vm3655_vm6, %v3650_v61 }
 0xfa0   : > { %v3652_v63 = vpop.f32.mrf.mxu1 }
 0xfa2   : > { %v4624_v0 = vpop.f32.mrf.mxu1 }
 0xfa3 PF: > { %p4692_p9 = scmp.eq.s32.totalorder %s5435_s10, 1  ;;  %s5270_s22 = smov [#allocation19]  }
 0xfa4   : > { %s3664_s5 = sshll.u32 %s5270_s22, 4  ;;  %s3665_s5 = int_to_ptr.vmem [resolvable:$true] %s3664_s5 }
 0xfa5   : > { %s5167_s2 = scalar_lea.vmem %s3665_s5, 32  ;;  %p5174_p8 = scmp.lt.s32.totalorder %s3665_s5, %s3665_s5 }
 0xfa6   : > { %p5168_p0 = scmp.ne.s32.totalorder %s3665_s5, %s5167_s2  ;;  %p5175_p1 = scmp.lt.s32.totalorder %s5167_s2, %s5167_s2 }
 0xfa8   : > { %p5169_p2 = pnand %p5168_p0, %p4692_p9  ;;  %p5176_p3 = por %p5175_p1, %p5174_p8 }
 0xfaa   : > { %p5170_p7 = pneg %p5169_p2 }
 0xfac   : > { %p5177_p12 = pnand %p5176_p3, %p5170_p7 }
 0xfae   : > { %5180 = shalt.err (!%p5177_p12)
}
 0xfaf   : > { %s6326_s16 = sld [smem:[#allocation59_spill]] }
 0xfb5   : > { %4652 = dma.vmem_to_hbm [thread:$0]  (%p4692_p9), %s3665_s5, 32, %s6326_s16, [#allocation7]  }
 0xfb6   : > { %5230 = dma.done.wait (%p4692_p9), [#allocation7], 32  }
 0xfb7   : > { %5232 = vsyncadd (%p4692_p9), [#allocation7], 4294967264 }
 0xfb8 PF: > { %s6327_s28 = sld [smem:[#allocation29_spill]] }
 0xfb9   : > { %s6328_s30 = sld [smem:[#allocation27_spill]] }
 0xfba   : > { %s6329_s9 = sld [smem:[#allocation28_spill]] }
 0xfbb   : > { %s6330_s5 = sld [smem:[#allocation30_spill]] }
 0xfbe   : > { %p48_p4 = scmp.ge.s32.totalorder %s6327_s28, 4  }
 0xfc0   :  { %50 = sbr.rel (!%p48_p4) target bundleno = 48 (0x30), region = 276 }
 0xfc5   :  { %3677 = vsyncpa [#allocation6], 1 }
 0xfc6   :  { %3679 = vsyncpa [#allocation6 + $0x1], 1 }
 0xfc7   :  { %3680 = vsyncpa [#allocation9], 1 }
 0xfc8   :  { %3681 = vsyncpa [#allocation12], 1 }
 0xfc9   :  { %3682 = vsyncpa [#allocation15], 1 }
 0xfca   :  { %3684 = vsyncpa [#allocation15 + $0x1], 1 }
 0xfcb   :  { %3685 = vsyncpa [#allocation18], 1 }
 0xfcc   :  { %3687 = vsyncpa [#allocation18 + $0x1], 1 }
 0xfcd   :  { %3688 = vsyncpa [#allocation7], 1 }
 0xfce   :  { %3690 = vsyncpa [#allocation7 + $0x1], 1 }

</bundles_post_ra>
